<compile_context>
chip_gen: v5e
topology: v5e:2x2
jax: 0.10.0
libtpu: 0.0.40
codegen_flags: <defaults>
</compile_context>

<pallas_src>
import functools

import jax
import jax.numpy as jnp
from jax.experimental import pallas as pl
from jax.experimental.pallas import tpu as pltpu


def _gelu_tanh(x):
    # tanh-approximation GELU (EUP-friendly), computed in f32.
    # TODO(synk): PyTorch nn.GELU defaults to the exact erf form; expect a
    # small numerical mismatch vs a strict PyTorch parity check.
    c = 0.7978845608028654  # sqrt(2/pi)
    return 0.5 * x * (1.0 + jnp.tanh(c * (x + 0.044715 * x * x * x)))


def _imagebind_kernel(patches_ref, wp_ref, bp_ref, wh_ref, bh_ref, semt_ref,
                      scores_ref, *, tb, np_total, np_chunk):
    # patches: (TB*NP, CPPp) bf16  current batch tile, p-major within tile
    # wp:      (CPPp, DM)    bf16  VMEM-resident
    # bp:      (1, DM)       f32
    # wh:      (DM, DE)      bf16
    # bh:      (1, DE)       f32
    # semt:    (DE, Npad)    bf16  semantic_modal.T, lane-padded
    # scores:  (TB, Npad)    f32   lane-dense output tile
    dm = wp_ref.shape[1]
    n_chunks = np_total // np_chunk
    rows = tb * np_chunk

    # --- patch embedding + GELU + mean pool, chunked over the NP axis -------
    pooled = jnp.zeros((tb, dm), jnp.float32)
    for c in range(n_chunks):                      # static; 1 chunk at demo dims
        x = patches_ref[pl.ds(c * rows, rows), :]                  # bf16
        pe = jnp.dot(x, wp_ref[...], preferred_element_type=jnp.float32)
        pe = _gelu_tanh(pe + bp_ref[...])                          # f32
        # pool: static, sublane-aligned slice adds (VPU; no MXU, no XLU).
        for p in range(np_chunk):
            pooled = pooled + pe[p * tb:(p + 1) * tb, :]
    pooled = pooled * (1.0 / np_total)

    # --- projection head -----------------------------------------------------
    emb = jnp.dot(pooled.astype(jnp.bfloat16), wh_ref[...],
                  preferred_element_type=jnp.float32) + bh_ref[...]   # (TB, DE)

    # --- L2 normalize (ImageBind vision postprocessor) -----------------------
    inv_norm = jax.lax.rsqrt(jnp.sum(emb * emb, axis=-1, keepdims=True) + 1e-12)
    emb = emb * inv_norm

    # --- scores = emb @ semantic_modal.T  (RHS pre-transposed, lane-dense) ---
    # NOTE: emb is downcast to bf16 here; keep it f32 if exact parity with a
    # pure-f32 PyTorch path is required (this matmul is tiny either way).
    scores_ref[...] = jnp.dot(emb.astype(jnp.bfloat16), semt_ref[...],
                              preferred_element_type=jnp.float32)     # (TB, Npad)


def _unfold_nchw(x, patch):
    """NCHW -> (B, num_patches, C*P*P), PyTorch Conv2d(stride=P) flatten order."""
    B, C, H, W = x.shape
    hp, wp = H // patch, W // patch
    x = x.reshape(B, C, hp, patch, wp, patch)
    x = jnp.transpose(x, (0, 2, 4, 1, 3, 5))          # (B, hp, wp, C, P, P)
    return x.reshape(B, hp * wp, C * patch * patch)


def _round_up(x, m):
    return (x + m - 1) // m * m


def _cdiv(a, b):
    return -(-a // b)


def imagebind_super_forward(vision_inputs, params, semantic_modal, *, patch,
                            m_target=256, lane_multiple=256,
                            pe_budget_bytes=8 << 20):
    """vision_inputs: (B, C, H, W) float32 NCHW. Returns scores (B, N) f32."""
    B, C, H, W = vision_inputs.shape
    assert H % patch == 0 and W % patch == 0

    # bf16 cast fused into the unfold path (single HBM materialization).
    patches = _unfold_nchw(vision_inputs.astype(jnp.bfloat16), patch)  # (B,NP,CPP)
    NP = (H // patch) * (W // patch)
    CPP = C * patch * patch
    CPP_pad = _round_up(CPP, 128)       # unmasked vld / full-depth MXU K passes

    # ---- tile sizing ---------------------------------------------------------
    # TB so that TB*NP >= m_target (fills the 256-wide MXU M dim on v6e/v7x),
    # sublane-aligned.
    TB = _round_up(max(8, _cdiv(m_target, NP)), 8)
    # grid length >= 2 and even so "parallel" shards over v7x's 2 TensorCores.
    n_tiles = max(2, _cdiv(B, TB))
    n_tiles += n_tiles % 2
    B_pad = n_tiles * TB

    # Chunk the NP axis so the f32 `pe` intermediate stays within budget
    # (dominant VMEM term at real ImageBind dims on v7x's 64 MiB VMEM).
    DM = params["w_patch"].shape[1]
    DE = params["w_head"].shape[1]
    np_chunk = 1
    for d in range(NP, 0, -1):
        if NP % d == 0 and TB * d * DM * 4 <= pe_budget_bytes:
            np_chunk = d
            break

    # ---- patch tensor: pad batch, reorder p-major within each tile, pad CPP -
    if B_pad != B:
        patches = jnp.pad(patches, ((0, B_pad - B), (0, 0), (0, 0)))
    patches = patches.reshape(n_tiles, TB, NP, CPP)
    patches = jnp.transpose(patches, (0, 2, 1, 3))        # (tiles, NP, TB, CPP)
    patches2d = patches.reshape(n_tiles * NP * TB, CPP)
    if CPP_pad != CPP:
        patches2d = jnp.pad(patches2d, ((0, 0), (0, CPP_pad - CPP)))

    # ---- weights (bf16 MXU operands, f32 biases) -----------------------------
    w_patch = params["w_patch"].astype(jnp.bfloat16)      # (CPP, DM)
    if CPP_pad != CPP:
        w_patch = jnp.pad(w_patch, ((0, CPP_pad - CPP), (0, 0)))
    b_patch = params["b_patch"].astype(jnp.float32)       # (1, DM)
    w_head = params["w_head"].astype(jnp.bfloat16)        # (DM, DE)
    b_head = params["b_head"].astype(jnp.float32)         # (1, DE)

    # semantic_modal: pre-transpose to (DE, N), pad N to a lane-dense multiple
    # of 256 (full 256-wide MXU on v6e/v7x; extra zero pass is free on v5e).
    N, DE_s = semantic_modal.shape
    assert DE_s == DE
    N_pad = _round_up(N, lane_multiple)
    sem_t = jnp.transpose(semantic_modal)
    if N_pad != N:
        sem_t = jnp.pad(sem_t, ((0, 0), (0, N_pad - N)))
    sem_t = sem_t.astype(jnp.bfloat16)

    # ---- VMEM budget (set vmem_limit_bytes explicitly, headroom included) ---
    bytes_patches = TB * NP * CPP_pad * 2 * 2             # bf16, double-buffered
    bytes_out = TB * N_pad * 4 * 2
    bytes_consts = ((CPP_pad * DM + DM * DE + DE * N_pad) * 2
                    + (DM + DE) * 4) * 2                  # worst case 2 buffers
    bytes_interm = TB * np_chunk * DM * 4 * 2             # f32 pe + GELU temp
    est = bytes_patches + bytes_out + bytes_consts + bytes_interm
    vmem_limit = int(min(max(2 * est, 16 << 20), 64 << 20))

    kernel = functools.partial(_imagebind_kernel, tb=TB, np_total=NP,
                               np_chunk=np_chunk)
    grid = (n_tiles,)
    out_shape = jax.ShapeDtypeStruct((B_pad, N_pad), jnp.float32)
    cparams = pltpu.CompilerParams(
        dimension_semantics=("parallel",),                # megacore on v7x
        vmem_limit_bytes=vmem_limit)

    def _run(single_buffer_consts):
        def const_spec(shape):
            idx = lambda i: (0,) * len(shape)
            if single_buffer_consts:
                # Constant-index blocks never change -> 1 buffer saves VMEM.
                return pl.BlockSpec(shape, idx, pipeline_mode=pl.Buffered(1))
            return pl.BlockSpec(shape, idx)

        return pl.pallas_call(
            kernel,
            out_shape=out_shape,
            grid=grid,
            in_specs=[
                pl.BlockSpec((TB * NP, CPP_pad), lambda i: (i, 0)),  # patches
                const_spec((CPP_pad, DM)),                           # w_patch
                const_spec((1, DM)),                                 # b_patch
                const_spec((DM, DE)),                                # w_head
                const_spec((1, DE)),                                 # b_head
                const_spec((DE, N_pad)),                             # sem_t
            ],
            out_specs=pl.BlockSpec((TB, N_pad), lambda i: (i, 0)),
            compiler_params=cparams,
        )(patches2d, w_patch, b_patch, w_head, b_head, sem_t)

    try:
        scores = _run(True)
    except Exception:
        # pipeline_mode=pl.Buffered(1) not supported by this jax build;
        # fall back to default (double-buffered) constant blocks.
        scores = _run(False)

    return scores[:B, :N]


def make_params(key, *, C, patch, d_model, d_emb, n_modal):
    """Deterministic synthetic parameters (stand-in for the base_model)."""
    ks = jax.random.split(key, 3)
    cpp = C * patch * patch
    w_patch = jax.random.normal(ks[0], (cpp, d_model), jnp.float32) / jnp.sqrt(cpp)
    b_patch = jnp.zeros((1, d_model), jnp.float32)
    w_head = jax.random.normal(ks[1], (d_model, d_emb), jnp.float32) / jnp.sqrt(d_model)
    b_head = jnp.zeros((1, d_emb), jnp.float32)
    # semantic_modal: precomputed (e.g. text) embeddings, L2-normalized.
    sem = jax.random.normal(ks[2], (n_modal, d_emb), jnp.float32)
    sem = sem / jnp.linalg.norm(sem, axis=-1, keepdims=True)
    params = dict(w_patch=w_patch, b_patch=b_patch, w_head=w_head, b_head=b_head)
    return params, sem


if __name__ == "__main__":
    # Small shapes consistent with the module's forward (D_MODEL/D_EMB chosen
    # as multiples of 256 per the MXU-width feedback, still small).
    B, C, H, W = 2, 4, 16, 16
    PATCH = 8
    D_MODEL, D_EMB, N_MODAL = 256, 256, 8

    key = jax.random.PRNGKey(0)
    k_x, k_p = jax.random.split(key)
    vision_inputs = jax.random.normal(k_x, (B, C, H, W), jnp.float32)  # NCHW

    params, semantic_modal = make_params(
        k_p, C=C, patch=PATCH, d_model=D_MODEL, d_emb=D_EMB, n_modal=N_MODAL)

    scores = imagebind_super_forward(
        vision_inputs, params, semantic_modal, patch=PATCH)
    scores = jax.block_until_ready(scores)

    assert scores.shape == (B, N_MODAL)
    assert scores.dtype == jnp.float32
    assert bool(jnp.all(jnp.isfinite(scores)))
    print("KERNEL_OK")
</pallas_src>

<mosaic_0001>
module attributes {stable_mosaic.version = 11 : i64} {
  func.func @_imagebind_kernel(%arg0: i32, %arg1: memref<256x256xbf16, #tpu.memory_space<vmem>>, %arg2: memref<256x256xbf16, #tpu.memory_space<vmem>>, %arg3: memref<1x256xf32, #tpu.memory_space<vmem>>, %arg4: memref<256x256xbf16, #tpu.memory_space<vmem>>, %arg5: memref<1x256xf32, #tpu.memory_space<vmem>>, %arg6: memref<256x256xbf16, #tpu.memory_space<vmem>>, %arg7: memref<64x256xf32, #tpu.memory_space<vmem>>) attributes {dimension_semantics = [#tpu.dimension_semantics<parallel>], iteration_bounds = array<i64: 2>, scalar_prefetch = 0 : i64, scratch_operands = 0 : i64, tpu.core_type = #tpu.core_type<tc>, window_params = [{transform_indices = @transform_0, window_bounds = array<i64: 256, 256>}, {pipeline_mode = #tpu.pipeline_mode<synchronous>, transform_indices = @transform_1, window_bounds = array<i64: 256, 256>}, {pipeline_mode = #tpu.pipeline_mode<synchronous>, transform_indices = @transform_2, window_bounds = array<i64: 1, 256>}, {pipeline_mode = #tpu.pipeline_mode<synchronous>, transform_indices = @transform_3, window_bounds = array<i64: 256, 256>}, {pipeline_mode = #tpu.pipeline_mode<synchronous>, transform_indices = @transform_4, window_bounds = array<i64: 1, 256>}, {pipeline_mode = #tpu.pipeline_mode<synchronous>, transform_indices = @transform_5, window_bounds = array<i64: 256, 256>}, {transform_indices = @transform_6, window_bounds = array<i64: 64, 256>}]} {
    %cst = arith.constant 0.000000e+00 : f32
    %0 = vector.broadcast %cst : f32 to vector<64x256xf32>
    %c0 = arith.constant 0 : index
    %c0_0 = arith.constant 0 : index
    %1 = vector.load %arg1[%c0, %c0_0] : memref<256x256xbf16, #tpu.memory_space<vmem>>, vector<256x256xbf16>
    %c0_1 = arith.constant 0 : index
    %c0_2 = arith.constant 0 : index
    %2 = vector.load %arg2[%c0_1, %c0_2] : memref<256x256xbf16, #tpu.memory_space<vmem>>, vector<256x256xbf16>
    %cst_3 = arith.constant dense<0.000000e+00> : vector<256x256xf32>
    %3 = tpu.matmul %1, %2, %cst_3 {dimension_numbers = #tpu.dot_dimension_numbers<[1], [0], [0], [1], [0, 0, 1, 1], [], []>} : vector<256x256xbf16>, vector<256x256xbf16>, vector<256x256xf32> -> vector<256x256xf32>
    %c0_4 = arith.constant 0 : index
    %c0_5 = arith.constant 0 : index
    %4 = vector.load %arg3[%c0_4, %c0_5] : memref<1x256xf32, #tpu.memory_space<vmem>>, vector<1x256xf32>
    %5 = vector.broadcast %4 : vector<1x256xf32> to vector<256x256xf32>
    %6 = arith.addf %3, %5 : vector<256x256xf32>
    %cst_6 = arith.constant 5.000000e-01 : f32
    %7 = vector.broadcast %cst_6 : f32 to vector<256x256xf32>
    %8 = arith.mulf %7, %6 : vector<256x256xf32>
    %cst_7 = arith.constant 4.471500e-02 : f32
    %9 = vector.broadcast %cst_7 : f32 to vector<256x256xf32>
    %10 = arith.mulf %9, %6 : vector<256x256xf32>
    %11 = arith.mulf %10, %6 : vector<256x256xf32>
    %12 = arith.mulf %11, %6 : vector<256x256xf32>
    %13 = arith.addf %6, %12 : vector<256x256xf32>
    %cst_8 = arith.constant 0.797884583 : f32
    %14 = vector.broadcast %cst_8 : f32 to vector<256x256xf32>
    %15 = arith.mulf %14, %13 : vector<256x256xf32>
    %16 = math.tanh %15 : vector<256x256xf32>
    %cst_9 = arith.constant 1.000000e+00 : f32
    %17 = vector.broadcast %cst_9 : f32 to vector<256x256xf32>
    %18 = arith.addf %17, %16 : vector<256x256xf32>
    %19 = arith.mulf %8, %18 : vector<256x256xf32>
    %20 = vector.extract_strided_slice %19 {offsets = [0, 0], sizes = [64, 256], strides = [1, 1]} : vector<256x256xf32> to vector<64x256xf32>
    %21 = arith.addf %0, %20 : vector<64x256xf32>
    %22 = vector.extract_strided_slice %19 {offsets = [64, 0], sizes = [64, 256], strides = [1, 1]} : vector<256x256xf32> to vector<64x256xf32>
    %23 = arith.addf %21, %22 : vector<64x256xf32>
    %24 = vector.extract_strided_slice %19 {offsets = [128, 0], sizes = [64, 256], strides = [1, 1]} : vector<256x256xf32> to vector<64x256xf32>
    %25 = arith.addf %23, %24 : vector<64x256xf32>
    %26 = vector.extract_strided_slice %19 {offsets = [192, 0], sizes = [64, 256], strides = [1, 1]} : vector<256x256xf32> to vector<64x256xf32>
    %27 = arith.addf %25, %26 : vector<64x256xf32>
    %cst_10 = arith.constant 2.500000e-01 : f32
    %28 = vector.broadcast %cst_10 : f32 to vector<64x256xf32>
    %29 = arith.mulf %27, %28 : vector<64x256xf32>
    %30 = arith.truncf %29 : vector<64x256xf32> to vector<64x256xbf16>
    %c0_11 = arith.constant 0 : index
    %c0_12 = arith.constant 0 : index
    %31 = vector.load %arg4[%c0_11, %c0_12] : memref<256x256xbf16, #tpu.memory_space<vmem>>, vector<256x256xbf16>
    %cst_13 = arith.constant dense<0.000000e+00> : vector<64x256xf32>
    %32 = tpu.matmul %30, %31, %cst_13 {dimension_numbers = #tpu.dot_dimension_numbers<[1], [0], [0], [1], [0, 0, 1, 1], [], []>} : vector<64x256xbf16>, vector<256x256xbf16>, vector<64x256xf32> -> vector<64x256xf32>
    %c0_14 = arith.constant 0 : index
    %c0_15 = arith.constant 0 : index
    %33 = vector.load %arg5[%c0_14, %c0_15] : memref<1x256xf32, #tpu.memory_space<vmem>>, vector<1x256xf32>
    %34 = vector.broadcast %33 : vector<1x256xf32> to vector<64x256xf32>
    %35 = arith.addf %32, %34 : vector<64x256xf32>
    %36 = arith.mulf %35, %35 : vector<64x256xf32>
    %cst_16 = arith.constant dense<0.000000e+00> : vector<64xf32>
    %37 = vector.multi_reduction <add>, %36, %cst_16 [1] : vector<64x256xf32> to vector<64xf32>
    %38 = vector.shape_cast %37 : vector<64xf32> to vector<64x1xf32>
    %cst_17 = arith.constant 9.99999996E-13 : f32
    %39 = vector.broadcast %cst_17 : f32 to vector<64x1xf32>
    %40 = arith.addf %38, %39 : vector<64x1xf32>
    %41 = math.rsqrt %40 : vector<64x1xf32>
    %42 = vector.broadcast %41 : vector<64x1xf32> to vector<64x256xf32>
    %43 = arith.mulf %35, %42 : vector<64x256xf32>
    %44 = arith.truncf %43 : vector<64x256xf32> to vector<64x256xbf16>
    %c0_18 = arith.constant 0 : index
    %c0_19 = arith.constant 0 : index
    %45 = vector.load %arg6[%c0_18, %c0_19] : memref<256x256xbf16, #tpu.memory_space<vmem>>, vector<256x256xbf16>
    %cst_20 = arith.constant dense<0.000000e+00> : vector<64x256xf32>
    %46 = tpu.matmul %44, %45, %cst_20 {dimension_numbers = #tpu.dot_dimension_numbers<[1], [0], [0], [1], [0, 0, 1, 1], [], []>} : vector<64x256xbf16>, vector<256x256xbf16>, vector<64x256xf32> -> vector<64x256xf32>
    %c0_21 = arith.constant 0 : index
    %c0_22 = arith.constant 0 : index
    %47 = vector.load %arg7[%c0_21, %c0_22] : memref<64x256xf32, #tpu.memory_space<vmem>>, vector<64x256xf32>
    tpu.vector_store %arg7[%c0_21, %c0_22], %46 {strides = array<i32>} : memref<64x256xf32, #tpu.memory_space<vmem>>, vector<64x256xf32>,
    return
  }
  func.func @transform_0(%arg0: i32) -> (i32, i32) {
    %c0_i32 = arith.constant 0 : i32
    %c0_i32_0 = arith.constant 0 : i32
    return %arg0, %c0_i32 : i32, i32
  }
  func.func @transform_1(%arg0: i32) -> (i32, i32) {
    %c0_i32 = arith.constant 0 : i32
    %c0_i32_0 = arith.constant 0 : i32
    %c0_i32_1 = arith.constant 0 : i32
    return %c0_i32, %c0_i32_0 : i32, i32
  }
  func.func @transform_2(%arg0: i32) -> (i32, i32) {
    %c0_i32 = arith.constant 0 : i32
    %c0_i32_0 = arith.constant 0 : i32
    %c0_i32_1 = arith.constant 0 : i32
    return %c0_i32, %c0_i32_0 : i32, i32
  }
  func.func @transform_3(%arg0: i32) -> (i32, i32) {
    %c0_i32 = arith.constant 0 : i32
    %c0_i32_0 = arith.constant 0 : i32
    %c0_i32_1 = arith.constant 0 : i32
    return %c0_i32, %c0_i32_0 : i32, i32
  }
  func.func @transform_4(%arg0: i32) -> (i32, i32) {
    %c0_i32 = arith.constant 0 : i32
    %c0_i32_0 = arith.constant 0 : i32
    %c0_i32_1 = arith.constant 0 : i32
    return %c0_i32, %c0_i32_0 : i32, i32
  }
  func.func @transform_5(%arg0: i32) -> (i32, i32) {
    %c0_i32 = arith.constant 0 : i32
    %c0_i32_0 = arith.constant 0 : i32
    %c0_i32_1 = arith.constant 0 : i32
    return %c0_i32, %c0_i32_0 : i32, i32
  }
  func.func @transform_6(%arg0: i32) -> (i32, i32) {
    %c0_i32 = arith.constant 0 : i32
    %c0_i32_0 = arith.constant 0 : i32
    return %arg0, %c0_i32 : i32, i32
  }
}

module attributes {stable_mosaic.version = 11 : i64} {
  func.func @_imagebind_kernel(%arg0: i32, %arg1: memref<256x256xbf16, #tpu.memory_space<vmem>>, %arg2: memref<256x256xbf16, #tpu.memory_space<vmem>>, %arg3: memref<1x256xf32, #tpu.memory_space<vmem>>, %arg4: memref<256x256xbf16, #tpu.memory_space<vmem>>, %arg5: memref<1x256xf32, #tpu.memory_space<vmem>>, %arg6: memref<256x256xbf16, #tpu.memory_space<vmem>>, %arg7: memref<64x256xf32, #tpu.memory_space<vmem>>) attributes {dimension_semantics = [#tpu.dimension_semantics<parallel>], iteration_bounds = array<i64: 2>, scalar_prefetch = 0 : i64, scratch_operands = 0 : i64, tpu.core_type = #tpu.core_type<tc>, window_params = [{transform_indices = @transform_0, window_bounds = array<i64: 256, 256>}, {pipeline_mode = #tpu.pipeline_mode<synchronous>, transform_indices = @transform_1, window_bounds = array<i64: 256, 256>}, {pipeline_mode = #tpu.pipeline_mode<synchronous>, transform_indices = @transform_2, window_bounds = array<i64: 1, 256>}, {pipeline_mode = #tpu.pipeline_mode<synchronous>, transform_indices = @transform_3, window_bounds = array<i64: 256, 256>}, {pipeline_mode = #tpu.pipeline_mode<synchronous>, transform_indices = @transform_4, window_bounds = array<i64: 1, 256>}, {pipeline_mode = #tpu.pipeline_mode<synchronous>, transform_indices = @transform_5, window_bounds = array<i64: 256, 256>}, {transform_indices = @transform_6, window_bounds = array<i64: 64, 256>}]} {
    %cst = arith.constant 0.000000e+00 : f32
    %0 = vector.broadcast %cst : f32 to vector<64x256xf32>
    %c0 = arith.constant 0 : index
    %c0_0 = arith.constant 0 : index
    %1 = vector.load %arg1[%c0, %c0_0] : memref<256x256xbf16, #tpu.memory_space<vmem>>, vector<256x256xbf16>
    %c0_1 = arith.constant 0 : index
    %c0_2 = arith.constant 0 : index
    %2 = vector.load %arg2[%c0_1, %c0_2] : memref<256x256xbf16, #tpu.memory_space<vmem>>, vector<256x256xbf16>
    %cst_3 = arith.constant dense<0.000000e+00> : vector<256x256xf32>
    %3 = tpu.matmul %1, %2, %cst_3 {dimension_numbers = #tpu.dot_dimension_numbers<[1], [0], [0], [1], [0, 0, 1, 1], [], []>} : vector<256x256xbf16>, vector<256x256xbf16>, vector<256x256xf32> -> vector<256x256xf32>
    %c0_4 = arith.constant 0 : index
    %c0_5 = arith.constant 0 : index
    %4 = vector.load %arg3[%c0_4, %c0_5] : memref<1x256xf32, #tpu.memory_space<vmem>>, vector<1x256xf32>
    %5 = vector.broadcast %4 : vector<1x256xf32> to vector<256x256xf32>
    %6 = arith.addf %3, %5 : vector<256x256xf32>
    %cst_6 = arith.constant 5.000000e-01 : f32
    %7 = vector.broadcast %cst_6 : f32 to vector<256x256xf32>
    %8 = arith.mulf %7, %6 : vector<256x256xf32>
    %cst_7 = arith.constant 4.471500e-02 : f32
    %9 = vector.broadcast %cst_7 : f32 to vector<256x256xf32>
    %10 = arith.mulf %9, %6 : vector<256x256xf32>
    %11 = arith.mulf %10, %6 : vector<256x256xf32>
    %12 = arith.mulf %11, %6 : vector<256x256xf32>
    %13 = arith.addf %6, %12 : vector<256x256xf32>
    %cst_8 = arith.constant 0.797884583 : f32
    %14 = vector.broadcast %cst_8 : f32 to vector<256x256xf32>
    %15 = arith.mulf %14, %13 : vector<256x256xf32>
    %16 = math.tanh %15 : vector<256x256xf32>
    %cst_9 = arith.constant 1.000000e+00 : f32
    %17 = vector.broadcast %cst_9 : f32 to vector<256x256xf32>
    %18 = arith.addf %17, %16 : vector<256x256xf32>
    %19 = arith.mulf %8, %18 : vector<256x256xf32>
    %20 = vector.extract_strided_slice %19 {offsets = [0, 0], sizes = [64, 256], strides = [1, 1]} : vector<256x256xf32> to vector<64x256xf32>
    %21 = arith.addf %0, %20 : vector<64x256xf32>
    %22 = vector.extract_strided_slice %19 {offsets = [64, 0], sizes = [64, 256], strides = [1, 1]} : vector<256x256xf32> to vector<64x256xf32>
    %23 = arith.addf %21, %22 : vector<64x256xf32>
    %24 = vector.extract_strided_slice %19 {offsets = [128, 0], sizes = [64, 256], strides = [1, 1]} : vector<256x256xf32> to vector<64x256xf32>
    %25 = arith.addf %23, %24 : vector<64x256xf32>
    %26 = vector.extract_strided_slice %19 {offsets = [192, 0], sizes = [64, 256], strides = [1, 1]} : vector<256x256xf32> to vector<64x256xf32>
    %27 = arith.addf %25, %26 : vector<64x256xf32>
    %cst_10 = arith.constant 2.500000e-01 : f32
    %28 = vector.broadcast %cst_10 : f32 to vector<64x256xf32>
    %29 = arith.mulf %27, %28 : vector<64x256xf32>
    %30 = arith.truncf %29 : vector<64x256xf32> to vector<64x256xbf16>
    %c0_11 = arith.constant 0 : index
    %c0_12 = arith.constant 0 : index
    %31 = vector.load %arg4[%c0_11, %c0_12] : memref<256x256xbf16, #tpu.memory_space<vmem>>, vector<256x256xbf16>
    %cst_13 = arith.constant dense<0.000000e+00> : vector<64x256xf32>
    %32 = tpu.matmul %30, %31, %cst_13 {dimension_numbers = #tpu.dot_dimension_numbers<[1], [0], [0], [1], [0, 0, 1, 1], [], []>} : vector<64x256xbf16>, vector<256x256xbf16>, vector<64x256xf32> -> vector<64x256xf32>
    %c0_14 = arith.constant 0 : index
    %c0_15 = arith.constant 0 : index
    %33 = vector.load %arg5[%c0_14, %c0_15] : memref<1x256xf32, #tpu.memory_space<vmem>>, vector<1x256xf32>
    %34 = vector.broadcast %33 : vector<1x256xf32> to vector<64x256xf32>
    %35 = arith.addf %32, %34 : vector<64x256xf32>
    %36 = arith.mulf %35, %35 : vector<64x256xf32>
    %cst_16 = arith.constant dense<0.000000e+00> : vector<64xf32>
    %37 = vector.multi_reduction <add>, %36, %cst_16 [1] : vector<64x256xf32> to vector<64xf32>
    %38 = vector.shape_cast %37 : vector<64xf32> to vector<64x1xf32>
    %cst_17 = arith.constant 9.99999996E-13 : f32
    %39 = vector.broadcast %cst_17 : f32 to vector<64x1xf32>
    %40 = arith.addf %38, %39 : vector<64x1xf32>
    %41 = math.rsqrt %40 : vector<64x1xf32>
    %42 = vector.broadcast %41 : vector<64x1xf32> to vector<64x256xf32>
    %43 = arith.mulf %35, %42 : vector<64x256xf32>
    %44 = arith.truncf %43 : vector<64x256xf32> to vector<64x256xbf16>
    %c0_18 = arith.constant 0 : index
    %c0_19 = arith.constant 0 : index
    %45 = vector.load %arg6[%c0_18, %c0_19] : memref<256x256xbf16, #tpu.memory_space<vmem>>, vector<256x256xbf16>
    %cst_20 = arith.constant dense<0.000000e+00> : vector<64x256xf32>
    %46 = tpu.matmul %44, %45, %cst_20 {dimension_numbers = #tpu.dot_dimension_numbers<[1], [0], [0], [1], [0, 0, 1, 1], [], []>} : vector<64x256xbf16>, vector<256x256xbf16>, vector<64x256xf32> -> vector<64x256xf32>
    %c0_21 = arith.constant 0 : index
    %c0_22 = arith.constant 0 : index
    %47 = vector.load %arg7[%c0_21, %c0_22] : memref<64x256xf32, #tpu.memory_space<vmem>>, vector<64x256xf32>
    tpu.vector_store %arg7[%c0_21, %c0_22], %46 {strides = array<i32>} : memref<64x256xf32, #tpu.memory_space<vmem>>, vector<64x256xf32>,
    return
  }
  func.func @transform_0(%arg0: i32) -> (i32, i32) {
    %c0_i32 = arith.constant 0 : i32
    %c0_i32_0 = arith.constant 0 : i32
    return %arg0, %c0_i32 : i32, i32
  }
  func.func @transform_1(%arg0: i32) -> (i32, i32) {
    %c0_i32 = arith.constant 0 : i32
    %c0_i32_0 = arith.constant 0 : i32
    %c0_i32_1 = arith.constant 0 : i32
    return %c0_i32, %c0_i32_0 : i32, i32
  }
  func.func @transform_2(%arg0: i32) -> (i32, i32) {
    %c0_i32 = arith.constant 0 : i32
    %c0_i32_0 = arith.constant 0 : i32
    %c0_i32_1 = arith.constant 0 : i32
    return %c0_i32, %c0_i32_0 : i32, i32
  }
  func.func @transform_3(%arg0: i32) -> (i32, i32) {
    %c0_i32 = arith.constant 0 : i32
    %c0_i32_0 = arith.constant 0 : i32
    %c0_i32_1 = arith.constant 0 : i32
    return %c0_i32, %c0_i32_0 : i32, i32
  }
  func.func @transform_4(%arg0: i32) -> (i32, i32) {
    %c0_i32 = arith.constant 0 : i32
    %c0_i32_0 = arith.constant 0 : i32
    %c0_i32_1 = arith.constant 0 : i32
    return %c0_i32, %c0_i32_0 : i32, i32
  }
  func.func @transform_5(%arg0: i32) -> (i32, i32) {
    %c0_i32 = arith.constant 0 : i32
    %c0_i32_0 = arith.constant 0 : i32
    %c0_i32_1 = arith.constant 0 : i32
    return %c0_i32, %c0_i32_0 : i32, i32
  }
  func.func @transform_6(%arg0: i32) -> (i32, i32) {
    %c0_i32 = arith.constant 0 : i32
    %c0_i32_0 = arith.constant 0 : i32
    return %arg0, %c0_i32 : i32, i32
  }
}

</mosaic_0001>

<bundles_post_ra>
// kernel: tpu_custom_call.1
= control target key start
LH: loop header
LB: loop body
LE: loop exit
PB: predicated region body
PF: predicated region fallthrough
CT: control target
= control target key end

     0   :  { %11 = vsyncpa [#allocation3], 0  ;;  %s4947_s0 = inlined_call_operand.hbm [shape: bf16[512,256], index: 0, kind: input, shape index: {}]   ;;  %s4948_s1 = inlined_call_operand.hbm [shape: bf16[256,256], index: 1, kind: input, shape index: {}]   ;;  %s4949_s2 = inlined_call_operand.hbm [shape: f32[1,256], index: 2, kind: input, shape index: {}]   ;;  %s4950_s3 = inlined_call_operand.hbm [shape: bf16[256,256], index: 3, kind: input, shape index: {}]   ;;  %s4951_s4 = inlined_call_operand.vmem [shape: f32[1,256], index: 4, kind: input, shape index: {}]   ;;  %s4952_s5 = inlined_call_operand.hbm [shape: bf16[256,256], index: 5, kind: input, shape index: {}]   ;;  %s4953_s6 = inlined_call_operand.hbm [shape: f32[128,256], index: 6, kind: output, shape index: {}]  }
   0x1   :  { %13 = vsyncpa [#allocation3 + $0x1], 0 }
   0x2   :  { %14 = vsyncpa [#allocation6], 0 }
   0x3   :  { %15 = vsyncpa [#allocation9], 0 }
   0x4   :  { %16 = vsyncpa [#allocation4], 0 }
   0x5   :  { %18 = vsyncpa [#allocation4 + $0x1], 0  ;;  %s3839_s21 = smov 0   ;;  %s3841_s22 = smov 0  }
   0x6   :  { %s3843_s23 = smov 0   ;;  %s3845_s24 = smov 0  }
   0x7 LB: > { %s3860_s25 = sadd.s32 4294967295, %s3794_s24   ;;  %s2667_s26 = sadd.s32 4294967294, %s3794_s24   ;;  %s3794_s24 = sphi %s3845_s24, %s4978_s24   ;;  %s3790_s23 = sphi %s3843_s23, %s4977_s23   ;;  %s3786_s22 = sphi %s3841_s22, %s4976_s22   ;;  %s3782_s21 = sphi %s3839_s21, %s4975_s21  }
   0x8   : > { %p44_p0 = scmp.ne.s32.totalorder %s3786_s22, %s3782_s21  ;;  %p45_p1 = scmp.eq.s32.totalorder %s3860_s25, 0 }
   0x9   : > { %p173_p2 = scmp.eq.s32.totalorder %s3860_s25, 1  ;;  %p179_p3 = scmp.eq.s32.totalorder %s2667_s26, 1 }
   0xa   : > { %p3869_p4 = por %p45_p1, %p44_p0  ;;  %p2668_p5 = scmp.ge.s32.totalorder %s3794_s24, 1 }
   0xb   : > { %p3874_p6 = por %p179_p3, %p44_p0  ;;  %p186_p7 = scmp.lt.s32.totalorder %s3794_s24, 3 }
   0xc   : > { %s197_s7 = sshll.u32 %s4948_s1, 4  ;;  %s3796_s9 = smov [#allocation5]   ;;  %s198_s7 = int_to_ptr.hbm [resolvable:$true] %s197_s7 }
   0xd   : > { %p3882_p8 = pnand %p2668_p5, %p186_p7  ;;  %s199_s10 = sshll.u32 %s3796_s9, 4  ;;  %s200_s10 = int_to_ptr.vmem [resolvable:$true] %s199_s10 }
   0xe   : > { %s223_s14 = sshll.u32 %s4950_s3, 4  ;;  %s4954_s15 = smov 128   ;;  %s224_s14 = int_to_ptr.hbm [resolvable:$true] %s223_s14 }
   0xf   : > { %p3355_p9 = pneg %p3882_p8  ;;  %s4955_s16 = smov 8  }
  0x10   : > { %s3799_s17 = smov [#allocation8]   ;;  %s212_s26 = sshll.u32 %s4949_s2, 4  ;;  %s213_s26 = int_to_ptr.hbm [resolvable:$true] %s212_s26 }
  0x11   : > { %p3890_p10 = pnand %p3355_p9, %p45_p1  ;;  %s225_s18 = sshll.u32 %s3799_s17, 4  ;;  %s226_s18 = int_to_ptr.vmem [resolvable:$true] %s225_s18 }
  0x12   : > { %s3800_s9 = smov [#allocation7]   ;;  %s3801_s12 = smov [#allocation10]  }
  0x13   : > { %3358 = dma.hbm_to_vmem [thread:$0]  (!%p3890_p10), %s198_s7, 4096, %s200_s10, [#allocation6], %s4954_s15, %s4954_s15, %s4955_s16  }
  0x14   : > { %3364 = dma.hbm_to_vmem [thread:$0]  (!%p3890_p10), %s224_s14, 4096, %s226_s18, [#allocation9], %s4954_s15, %s4954_s15, %s4955_s16  }
  0x15   : > { %s240_s7 = sshll.u32 %s4952_s5, 4  ;;  %s214_s10 = sshll.u32 %s3800_s9, 4  ;;  %s241_s7 = int_to_ptr.hbm [resolvable:$true] %s240_s7  ;;  %s215_s10 = int_to_ptr.vmem [resolvable:$true] %s214_s10 }
  0x16   : > { %3361 = dma.hbm_to_vmem [thread:$0]  (!%p3890_p10), %s213_s26, 32, %s215_s10, [#allocation6]  }
  0x17   : > { %s242_s13 = sshll.u32 %s3801_s12, 4  ;;  %s3922_s14 = sadd.s32 1, %s3794_s24   ;;  %s243_s13 = int_to_ptr.vmem [resolvable:$true] %s242_s13 }
  0x18   : > { %3367 = dma.hbm_to_vmem [thread:$0]  (!%p3890_p10), %s241_s7, 4096, %s243_s13, [#allocation9], %s4954_s15, %s4954_s15, %s4955_s16  }
  0x19   : > { %s31_s17 = sadd.s32 1, %s3790_s23  ;;  %s28_s18 = ssub.s32 %s3794_s24, %s3922_s14 }
  0x1a   : > { %p38_p12 = scmp.ne.s32.totalorder %s3790_s23, %s3786_s22  ;;  %p29_p13 = scmp.eq.s32.totalorder %s28_s18, 0 }
  0x1b   : > { %p39_p0 = scmp.eq.s32.totalorder %s3794_s24, 0  ;;  %p3380_p5 = scmp.lt.s32.totalorder %s3794_s24, 2 }
  0x1c   : > { %p3932_p3 = por %p173_p2, %p38_p12  ;;  %s256_s11 = sand.u32 1, %s3790_s23  }
  0x1d   : > { %s3938_s20 = scalar_select %p29_p13, %s3790_s23, %s31_s17  }
  0x1e   : > { %p40_p7 = por %p39_p0, %p38_p12  ;;  %s2674_s26 = sshll.u32 %s256_s11, 8 }
  0x1f   : > { %s3204_s29 = sshll.u32 %s3794_s24, 8  ;;  %s260_s10 = scalar_lea.vmem [#allocation2], %s2674_s26 }
  0x20   : > { %s266_s9 = scalar_lea.hbm %s4947_s0, %s3204_s29  ;;  %s269_s12 = sshll.u32 %s260_s10, 4  ;;  %s270_s12 = int_to_ptr.vmem [resolvable:$true] %s269_s12 }
  0x21   : > { %s267_s13 = sshll.u32 %s266_s9, 4  ;;  %p3945_p2 = pnand %p3380_p5, %p40_p7  ;;  %s268_s13 = int_to_ptr.hbm [resolvable:$true] %s267_s13 }
  0x22   : > { %s257_s17 = scalar_lea.sflag [#allocation3], %s256_s11  ;;  %s3690_s15 = sshra.s32 %s268_s13, 4  ;;  %s3691_s15 = int_to_ptr.hbm [resolvable:$true] %s3690_s15 }
  0x23   : > { %s3692_s16 = scalar_lea.hbm %s3691_s15, 256  ;;  %p3694_p10 = pneg %p3945_p2 }
  0x24   : > { %p3693_p9 = scmp.ne.s32.totalorder %s3691_s15, %s3692_s16  ;;  %s3697_s30 = scalar_lea.hbm %s4947_s0, 512 }
  0x25   : > { %p3698_p0 = scmp.lt.s32.totalorder %s3691_s15, %s4947_s0  ;;  %p3699_p5 = scmp.lt.s32.totalorder %s3697_s30, %s3692_s16 }
  0x26   : > { %p3695_p12 = pnand %p3694_p10, %p3693_p9 }
  0x27   : > { %p3700_p7 = por %p3699_p5, %p3698_p0 }
  0x28   : > { %p3696_p13 = pneg %p3695_p12 }
  0x2a   : > { %p3701_p11 = pnand %p3700_p7, %p3696_p13 }
  0x2c   : > { %3704 = shalt.err (!%p3701_p11)
}
  0x2d   : > { %s4964_s11 = smov 8   ;;  %s4965_s10 = smov 128  }
  0x2e   : > { %3371 = dma.hbm_to_vmem [thread:$0]  (!%p3945_p2), %s268_s13, 4096, %s270_s12, %s257_s17, %s4965_s10, %s4965_s10, %s4964_s11  }
  0x2f   : > { %281 = sbr.rel (%p3882_p8) target bundleno = 940 (0x3ac), region = 44 }
  0x34   : > { %s3965_s29 = sand.u32 1, %s3786_s22  }
  0x35   : > { %s2679_s15 = sshll.u32 %s3965_s29, 8  ;;  %s284_s16 = scalar_lea.sflag [#allocation3], %s3965_s29 }
  0x36   : > { %s3969_s26 = scalar_lea.vmem [#allocation2], %s2679_s15 }
  0x37   : > { %3765 = dma.done.wait (%p3869_p4), %s284_s16, 4096  }
  0x38   : > { %3767 = vsyncadd (%p3869_p4), %s284_s16, 4294963200 }
  0x39   : > { %3769 = dma.done.wait (%p45_p1), [#allocation6], 4128  }
  0x3a   : > { %3771 = vsyncadd (%p45_p1), [#allocation6], 4294963168 }
  0x3b   : > { %3773 = dma.done.wait (%p45_p1), [#allocation9], 8192  }
  0x3c   : > { %3775 = vsyncadd (%p45_p1), [#allocation9], 4294959104  ;;  %v2871_v0 = vld [vmem:[#allocation5 + $0x70] sm:$0xf]  ;;  %v3252_v1 = vld [vmem:[#allocation5 + $0x74] sm:$0xf0] }
  0x3d   : > { %v2935_v2 = vld [vmem:[#allocation5 + $0xf0] sm:$0xf]  ;;  %v2872_v3 = vor.u32 %v3252_v1, %v2871_v0  ;;  %v3268_v4 = vld [vmem:[#allocation5 + $0xf4] sm:$0xf0]  ;;  %v3251_v5 = vld [vmem:[#allocation5 + $0x74] sm:$0xf] }
  0x3e   : > { %v2873_v6 = vld [vmem:[#allocation5 + $0x78] sm:$0xf0]  ;;  %v2936_v7 = vor.u32 %v3268_v4, %v2935_v2  ;;  %v3267_v9 = vld [vmem:[#allocation5 + $0xf4] sm:$0xf]  ;;  %v2863_v11 = vld [vmem:[#allocation5 + $0x60] sm:$0xf] }
  0x3f   : > { %v2876_v8 = vor.u32 %v3251_v5, %v2873_v6  ;;  %v2937_v10 = vld [vmem:[#allocation5 + $0xf8] sm:$0xf0]  ;;  %729 = vmatpush.bf16.msra.mxu0 %v2872_v3  ;;  %v3250_v13 = vld [vmem:[#allocation5 + $0x64] sm:$0xf0]  ;;  %v2927_v14 = vld [vmem:[#allocation5 + $0xe0] sm:$0xf] }
  0x40   : > { %v2940_v12 = vor.u32 %v3267_v9, %v2937_v10  ;;  %v3266_v15 = vld [vmem:[#allocation5 + $0xe4] sm:$0xf0]  ;;  %818 = vmatpush.bf16.msra.mxu1 %v2936_v7  ;;  %v2864_v16 = vor.u32 %v3250_v13, %v2863_v11  ;;  %v3249_v18 = vld [vmem:[#allocation5 + $0x64] sm:$0xf]  ;;  %v2865_v19 = vld [vmem:[#allocation5 + $0x68] sm:$0xf0] }
  0x41   : > { %907 = vmatpush.bf16.msra.mxu2 %v2876_v8  ;;  %v2928_v17 = vor.u32 %v3266_v15, %v2927_v14  ;;  %v3265_v20 = vld [vmem:[#allocation5 + $0xe4] sm:$0xf]  ;;  %v2868_v21 = vor.u32 %v3249_v18, %v2865_v19  ;;  %v2929_v22 = vld [vmem:[#allocation5 + $0xe8] sm:$0xf0]  ;;  %v2855_v23 = vld [vmem:[#allocation5 + $0x50] sm:$0xf] }
  0x42   : > { %996 = vmatpush.bf16.msra.mxu3 %v2940_v12  ;;  %v3248_v24 = vld [vmem:[#allocation5 + $0x54] sm:$0xf0]  ;;  %v2932_v25 = vor.u32 %v3265_v20, %v2929_v22  ;;  %v2919_v26 = vld [vmem:[#allocation5 + $0xd0] sm:$0xf]  ;;  %v3247_v28 = vld [vmem:[#allocation5 + $0x54] sm:$0xf] }
  0x43   : > { %v3264_v27 = vld [vmem:[#allocation5 + $0xd4] sm:$0xf0]  ;;  %730 = vmatpush.bf16.msra.mxu0 %v2864_v16  ;;  %v2856_v29 = vor.u32 %v3248_v24, %v2855_v23  ;;  %v2857_v30 = vld [vmem:[#allocation5 + $0x58] sm:$0xf0]  ;;  %v3263_v31 = vld [vmem:[#allocation5 + $0xd4] sm:$0xf] }
  0x44   : > { %v2921_v32 = vld [vmem:[#allocation5 + $0xd8] sm:$0xf0]  ;;  %819 = vmatpush.bf16.msra.mxu1 %v2928_v17  ;;  %v2920_v33 = vor.u32 %v3264_v27, %v2919_v26  ;;  %v2860_v34 = vor.u32 %v3247_v28, %v2857_v30  ;;  %v2847_v35 = vld [vmem:[#allocation5 + $0x40] sm:$0xf]  ;;  %v3246_v36 = vld [vmem:[#allocation5 + $0x44] sm:$0xf0] }
  0x45   : > { %908 = vmatpush.bf16.msra.mxu2 %v2868_v21  ;;  %v2911_v37 = vld [vmem:[#allocation5 + $0xc0] sm:$0xf]  ;;  %v2924_v38 = vor.u32 %v3263_v31, %v2921_v32  ;;  %v3262_v39 = vld [vmem:[#allocation5 + $0xc4] sm:$0xf0]  ;;  %v3245_v40 = vld [vmem:[#allocation5 + $0x44] sm:$0xf]  ;;  %v2848_v44 = vor.u32 %v3246_v36, %v2847_v35 }
  0x46   : > { %997 = vmatpush.bf16.msra.mxu3 %v2932_v25  ;;  %v2849_v41 = vld [vmem:[#allocation5 + $0x48] sm:$0xf0]  ;;  %v3261_v42 = vld [vmem:[#allocation5 + $0xc4] sm:$0xf]  ;;  %v2912_v45 = vor.u32 %v3262_v39, %v2911_v37  ;;  %v2839_v47 = vld [vmem:[#allocation5 + $0x30] sm:$0xf] }
  0x47   : > { %v2913_v43 = vld [vmem:[#allocation5 + $0xc8] sm:$0xf0]  ;;  %731 = vmatpush.bf16.msra.mxu0 %v2856_v29  ;;  %v2852_v46 = vor.u32 %v3245_v40, %v2849_v41  ;;  %v3244_v48 = vld [vmem:[#allocation5 + $0x34] sm:$0xf0]  ;;  %v2903_v49 = vld [vmem:[#allocation5 + $0xb0] sm:$0xf] }
  0x48   : > { %820 = vmatpush.bf16.msra.mxu1 %v2920_v33  ;;  %v2916_v50 = vor.u32 %v3261_v42, %v2913_v43  ;;  %v3260_v51 = vld [vmem:[#allocation5 + $0xb4] sm:$0xf0]  ;;  %v3243_v52 = vld [vmem:[#allocation5 + $0x34] sm:$0xf]  ;;  %v2841_v53 = vld [vmem:[#allocation5 + $0x38] sm:$0xf0]  ;;  %v2840_v56 = vor.u32 %v3244_v48, %v2839_v47 }
  0x49   : > { %909 = vmatpush.bf16.msra.mxu2 %v2860_v34  ;;  %v3259_v54 = vld [vmem:[#allocation5 + $0xb4] sm:$0xf]  ;;  %v2905_v55 = vld [vmem:[#allocation5 + $0xb8] sm:$0xf0]  ;;  %v2904_v57 = vor.u32 %v3260_v51, %v2903_v49  ;;  %v2844_v58 = vor.u32 %v3243_v52, %v2841_v53  ;;  %v2831_v59 = vld [vmem:[#allocation5 + $0x20] sm:$0xf] }
  0x4a   : > { %998 = vmatpush.bf16.msra.mxu3 %v2924_v38  ;;  %v3242_v60 = vld [vmem:[#allocation5 + $0x24] sm:$0xf0]  ;;  %v2895_v61 = vld [vmem:[#allocation5 + $0xa0] sm:$0xf]  ;;  %v2908_v62 = vor.u32 %v3259_v54, %v2905_v55  ;;  %v3241_v0 = vld [vmem:[#allocation5 + $0x24] sm:$0xf] }
  0x4b   : > { %732 = vmatpush.bf16.msra.mxu0 %v2848_v44  ;;  %v3258_v63 = vld [vmem:[#allocation5 + $0xa4] sm:$0xf0]  ;;  %v2833_v1 = vld [vmem:[#allocation5 + $0x28] sm:$0xf0]  ;;  %v3257_v2 = vld [vmem:[#allocation5 + $0xa4] sm:$0xf]  ;;  %v2832_v4 = vor.u32 %v3242_v60, %v2831_v59 }
  0x4c   : > { %821 = vmatpush.bf16.msra.mxu1 %v2912_v45  ;;  %v2897_v3 = vld [vmem:[#allocation5 + $0xa8] sm:$0xf0]  ;;  %v2896_v5 = vor.u32 %v3258_v63, %v2895_v61  ;;  %v2836_v6 = vor.u32 %v3241_v0, %v2833_v1  ;;  %v2823_v7 = vld [vmem:[#allocation5 + $0x10] sm:$0xf]  ;;  %v3240_v8 = vld [vmem:[#allocation5 + $0x14] sm:$0xf0] }
  0x4d   : > { %910 = vmatpush.bf16.msra.mxu2 %v2852_v46  ;;  %v2887_v9 = vld [vmem:[#allocation5 + $0x90] sm:$0xf]  ;;  %v2900_v10 = vor.u32 %v3257_v2, %v2897_v3  ;;  %v3256_v11 = vld [vmem:[#allocation5 + $0x94] sm:$0xf0]  ;;  %v3239_v12 = vld [vmem:[#allocation5 + $0x14] sm:$0xf]  ;;  %v2824_v16 = vor.u32 %v3240_v8, %v2823_v7 }
  0x4e   : > { %999 = vmatpush.bf16.msra.mxu3 %v2916_v50  ;;  %v2825_v13 = vld [vmem:[#allocation5 + $0x18] sm:$0xf0]  ;;  %v3255_v14 = vld [vmem:[#allocation5 + $0x94] sm:$0xf]  ;;  %v2888_v17 = vor.u32 %v3256_v11, %v2887_v9  ;;  %v2815_v19 = vld [vmem:[#allocation5] sm:$0xf] }
  0x4f   : > { %733 = vmatpush.bf16.msra.mxu0 %v2840_v56  ;;  %v2889_v15 = vld [vmem:[#allocation5 + $0x98] sm:$0xf0]  ;;  %v2828_v18 = vor.u32 %v3239_v12, %v2825_v13  ;;  %v3238_v20 = vld [vmem:[#allocation5 + $0x4] sm:$0xf0]  ;;  %v2879_v21 = vld [vmem:[#allocation5 + $0x80] sm:$0xf] }
  0x50   : > { %822 = vmatpush.bf16.msra.mxu1 %v2904_v57  ;;  %v2892_v22 = vor.u32 %v3255_v14, %v2889_v15  ;;  %v3254_v23 = vld [vmem:[#allocation5 + $0x84] sm:$0xf0]  ;;  %v3237_v24 = vld [vmem:[#allocation5 + $0x4] sm:$0xf]  ;;  %v2817_v25 = vld [vmem:[#allocation5 + $0x8] sm:$0xf0]  ;;  %v2816_v28 = vor.u32 %v3238_v20, %v2815_v19 }
  0x51   : > { %911 = vmatpush.bf16.msra.mxu2 %v2844_v58  ;;  %v3253_v26 = vld [vmem:[#allocation5 + $0x84] sm:$0xf]  ;;  %v2881_v27 = vld [vmem:[#allocation5 + $0x88] sm:$0xf0]  ;;  %v2687_v29 = vld [vmem:[%s3969_s26] sm:$0xf]  ;;  %v2880_v31 = vor.u32 %v3254_v23, %v2879_v21  ;;  %v2820_v32 = vor.u32 %v3237_v24, %v2817_v25 }
  0x52   : > { %1000 = vmatpush.bf16.msra.mxu3 %v2908_v62  ;;  %v3206_v30 = vld [vmem:[%s3969_s26 + $0x4] sm:$0xf0]  ;;  %v3205_v33 = vld [vmem:[%s3969_s26 + $0x4] sm:$0xf]  ;;  %v2689_v34 = vld [vmem:[%s3969_s26 + $0x8] sm:$0xf0]  ;;  %v2884_v35 = vor.u32 %v3253_v26, %v2881_v27 }
  0x53   : > { %734 = vmatpush.bf16.msra.mxu0 %v2832_v4  ;;  %v2688_v36 = vor.u32 %v3206_v30, %v2687_v29  ;;  %v2692_v37 = vor.u32 %v3205_v33, %v2689_v34  ;;  %v2695_v38 = vld [vmem:[%s3969_s26 + $0x10] sm:$0xf]  ;;  %v3208_v39 = vld [vmem:[%s3969_s26 + $0x14] sm:$0xf0]  ;;  %v3207_v40 = vld [vmem:[%s3969_s26 + $0x14] sm:$0xf] }
  0x54   : > { %823 = vmatpush.bf16.msra.mxu1 %v2896_v5  ;;  %v2697_v41 = vld [vmem:[%s3969_s26 + $0x18] sm:$0xf0]  ;;  %v2696_v42 = vor.u32 %v3208_v39, %v2695_v38  ;;  %v2703_v44 = vld [vmem:[%s3969_s26 + $0x20] sm:$0xf]  ;;  %v3210_v45 = vld [vmem:[%s3969_s26 + $0x24] sm:$0xf0] }
  0x55   : > { %912 = vmatpush.bf16.msra.mxu2 %v2836_v6  ;;  %v2700_v43 = vor.u32 %v3207_v40, %v2697_v41  ;;  %v3209_v46 = vld [vmem:[%s3969_s26 + $0x24] sm:$0xf]  ;;  %v2705_v47 = vld [vmem:[%s3969_s26 + $0x28] sm:$0xf0]  ;;  %v2704_v48 = vor.u32 %v3210_v45, %v2703_v44  ;;  %v2711_v50 = vld [vmem:[%s3969_s26 + $0x30] sm:$0xf] }
  0x56   : > { %1001 = vmatpush.bf16.msra.mxu3 %v2900_v10  ;;  %v2708_v49 = vor.u32 %v3209_v46, %v2705_v47  ;;  %v3212_v51 = vld [vmem:[%s3969_s26 + $0x34] sm:$0xf0]  ;;  %v3211_v52 = vld [vmem:[%s3969_s26 + $0x34] sm:$0xf]  ;;  %v2713_v53 = vld [vmem:[%s3969_s26 + $0x38] sm:$0xf0] }
  0x57   : > { %735 = vmatpush.bf16.msra.mxu0 %v2824_v16  ;;  %v2712_v54 = vor.u32 %v3212_v51, %v2711_v50  ;;  %v2716_v55 = vor.u32 %v3211_v52, %v2713_v53  ;;  %v2719_v56 = vld [vmem:[%s3969_s26 + $0x40] sm:$0xf]  ;;  %v3214_v57 = vld [vmem:[%s3969_s26 + $0x44] sm:$0xf0]  ;;  %v3213_v58 = vld [vmem:[%s3969_s26 + $0x44] sm:$0xf] }
  0x58   : > { %824 = vmatpush.bf16.msra.mxu1 %v2888_v17  ;;  %v2721_v59 = vld [vmem:[%s3969_s26 + $0x48] sm:$0xf0]  ;;  %v2720_v60 = vor.u32 %v3214_v57, %v2719_v56  ;;  %v3283_v62 = vld [vmem:[#allocation8 + $0x74] sm:$0xf]  ;;  %v3001_v63 = vld [vmem:[#allocation8 + $0x78] sm:$0xf0] }
  0x59   : > { %913 = vmatpush.bf16.msra.mxu2 %v2828_v18  ;;  %v2724_v61 = vor.u32 %v3213_v58, %v2721_v59  ;;  %v3299_v0 = vld [vmem:[#allocation8 + $0xf4] sm:$0xf]  ;;  %v3004_v1 = vor.u32 %v3283_v62, %v3001_v63  ;;  %v3065_v2 = vld [vmem:[#allocation8 + $0xf8] sm:$0xf0]  ;;  %v2999_v3 = vld [vmem:[#allocation8 + $0x70] sm:$0xf] }
  0x5a   : > { %1002 = vmatpush.bf16.msra.mxu3 %v2892_v22  ;;  %v3284_v4 = vld [vmem:[#allocation8 + $0x74] sm:$0xf0]  ;;  %v3068_v5 = vor.u32 %v3299_v0, %v3065_v2  ;;  %v2727_v7 = vld [vmem:[%s3969_s26 + $0x50] sm:$0xf]  ;;  %v3215_v9 = vld [vmem:[%s3969_s26 + $0x54] sm:$0xf] }
  0x5b   : > { %736 = vmatpush.bf16.msra.mxu0 %v2816_v28  ;;  %v3000_v6 = vor.u32 %v3284_v4, %v2999_v3  ;;  %v3216_v8 = vld [vmem:[%s3969_s26 + $0x54] sm:$0xf0]  ;;  %v2729_v10 = vld [vmem:[%s3969_s26 + $0x58] sm:$0xf0]  ;;  %v3063_v13 = vld [vmem:[#allocation8 + $0xf0] sm:$0xf] }
  0x5c   : > { %825 = vmatpush.bf16.msra.mxu1 %v2880_v31  ;;  %v2728_v11 = vor.u32 %v3216_v8, %v2727_v7  ;;  %v2732_v12 = vor.u32 %v3215_v9, %v2729_v10  ;;  %v3300_v14 = vld [vmem:[#allocation8 + $0xf4] sm:$0xf0]  ;;  %v2735_v16 = vld [vmem:[%s3969_s26 + $0x60] sm:$0xf]  ;;  %v3218_v17 = vld [vmem:[%s3969_s26 + $0x64] sm:$0xf0] }
  0x5d   : > { %914 = vmatpush.bf16.msra.mxu2 %v2820_v32  ;;  %v3064_v15 = vor.u32 %v3300_v14, %v3063_v13  ;;  %v3217_v18 = vld [vmem:[%s3969_s26 + $0x64] sm:$0xf]  ;;  %v2737_v19 = vld [vmem:[%s3969_s26 + $0x68] sm:$0xf0]  ;;  %v2736_v20 = vor.u32 %v3218_v17, %v2735_v16  ;;  %v2743_v22 = vld [vmem:[%s3969_s26 + $0x70] sm:$0xf] }
  0x5e   : > { %1003 = vmatpush.bf16.msra.mxu3 %v2884_v35  ;;  %737 = vmatmul.bf16.vlgmr.msra.gmra.mxu0 %v2688_v36  ;;  %v2740_v21 = vor.u32 %v3217_v18, %v2737_v19  ;;  %v3220_v23 = vld [vmem:[%s3969_s26 + $0x74] sm:$0xf0]  ;;  %v3219_v24 = vld [vmem:[%s3969_s26 + $0x74] sm:$0xf]  ;;  %v2745_v25 = vld [vmem:[%s3969_s26 + $0x78] sm:$0xf0] }
  0x5f   : > { %826 = vmatmul.bf16.vlgmr.msra.gmra.mxu1 %v2692_v37  ;;  %1947 = vmatpush.bf16.msrb.mxu0 %v3000_v6  ;;  %v2744_v26 = vor.u32 %v3220_v23, %v2743_v22  ;;  %v2748_v27 = vor.u32 %v3219_v24, %v2745_v25  ;;  %v403_v28 = vld [vmem:[#allocation7] sm:$0x3]  ;;  %v3222_v30 = vld [vmem:[%s3969_s26 + $0x84] sm:$0xf0]  ;;  %v3221_v32 = vld [vmem:[%s3969_s26 + $0x84] sm:$0xf] }
  0x60   : > { %915 = vmatmul.bf16.vlgmr.msra.gmra.mxu2 %v2688_v36  ;;  %1976 = vmatpush.bf16.msrb.mxu1 %v3064_v15  ;;  %v2751_v29 = vld [vmem:[%s3969_s26 + $0x80] sm:$0xf]  ;;  %v4017_v31 = vperm.slane %v403_v28, 0  ;;  %v2753_v33 = vld [vmem:[%s3969_s26 + $0x88] sm:$0xf0]  ;;  %s2684_s12 = sshll.u32 %s3965_s29, 7 }
  0x61   : > { %1004 = vmatmul.bf16.vlgmr.msra.gmra.mxu3 %v2692_v37  ;;  %2005 = vmatpush.bf16.msrb.mxu2 %v3004_v1  ;;  %v2752_v34 = vor.u32 %v3222_v30, %v2751_v29  ;;  %v3281_v35 = vld [vmem:[#allocation8 + $0x64] sm:$0xf]  ;;  %v2993_v36 = vld [vmem:[#allocation8 + $0x68] sm:$0xf0]  ;;  %v2756_v38 = vor.u32 %v3221_v32, %v2753_v33  ;;  %v2991_v46 = vld [vmem:[#allocation8 + $0x60] sm:$0xf] }
  0x62   : > { %2034 = vmatpush.bf16.msrb.mxu3 %v3068_v5  ;;  %v2996_v39 = vor.u32 %v3281_v35, %v2993_v36  ;;  %v3297_v44 = vld [vmem:[#allocation8 + $0xe4] sm:$0xf]  ;;  %v3057_v45 = vld [vmem:[#allocation8 + $0xe8] sm:$0xf0]  ;;  %v3282_v47 = vld [vmem:[#allocation8 + $0x64] sm:$0xf0] }
  0x63   : > { %v2992_v50 = vor.u32 %v3282_v47, %v2991_v46  ;;  %v3055_v51 = vld [vmem:[#allocation8 + $0xe0] sm:$0xf]  ;;  %v3298_v52 = vld [vmem:[#allocation8 + $0xe4] sm:$0xf0]  ;;  %v3224_v62 = vld [vmem:[%s3969_s26 + $0x94] sm:$0xf0] }
  0x64   : > { %v3056_v56 = vor.u32 %v3298_v52, %v3055_v51  ;;  %v3223_v63 = vld [vmem:[%s3969_s26 + $0x94] sm:$0xf]  ;;  %v2761_v0 = vld [vmem:[%s3969_s26 + $0x98] sm:$0xf0]  ;;  %v2767_v22 = vld [vmem:[%s3969_s26 + $0xa0] sm:$0xf] }
  0x65   : > { %2006 = vmatpush.bf16.msrb.mxu2 %v2996_v39  ;;  %1948 = vmatpush.bf16.msrb.mxu0 %v2992_v50  ;;  %v2764_v6 = vor.u32 %v3223_v63, %v2761_v0  ;;  %v2985_v13 = vld [vmem:[#allocation8 + $0x58] sm:$0xf0]  ;;  %v3226_v23 = vld [vmem:[%s3969_s26 + $0xa4] sm:$0xf0]  ;;  %v3225_v24 = vld [vmem:[%s3969_s26 + $0xa4] sm:$0xf] }
  0x66   : > { %1977 = vmatpush.bf16.msrb.mxu1 %v3056_v56  ;;  %v2769_v25 = vld [vmem:[%s3969_s26 + $0xa8] sm:$0xf0]  ;;  %v2768_v29 = vor.u32 %v3226_v23, %v2767_v22  ;;  %v2983_v32 = vld [vmem:[#allocation8 + $0x50] sm:$0xf]  ;;  %v3280_v33 = vld [vmem:[#allocation8 + $0x54] sm:$0xf0] }
  0x67   : > { %v2984_v39 = vor.u32 %v3280_v33, %v2983_v32  ;;  %v2775_v56 = vld [vmem:[%s3969_s26 + $0xb0] sm:$0xf]  ;;  %v2783_v23 = vld [vmem:[%s3969_s26 + $0xc0] sm:$0xf]  ;;  %v3277_v32 = vld [vmem:[#allocation8 + $0x44] sm:$0xf] }
  0x68   : > { %v2977_v33 = vld [vmem:[#allocation8 + $0x48] sm:$0xf0]  ;;  %s4895_s13 = scalar_lea.vmem [#allocation11], %s2684_s12  ;;  %s3334_s18 = sshll.u32 %s3860_s25, 7 }
  0x69   : > { %1949 = vmatpush.bf16.msrb.mxu0 %v2984_v39  ;;  %s2552_s7 = scalar_lea.hbm %s4953_s6, %s3334_s18  ;;  %s2553_s9 = sshll.u32 %s4895_s13, 4  ;;  %s2554_s9 = int_to_ptr.vmem [resolvable:$true] %s2553_s9 }
  0x6a   : > { %s2555_s11 = sshll.u32 %s2552_s7, 4  ;;  %s2540_s25 = scalar_lea.sflag [#allocation4], %s3965_s29  ;;  %s2556_s11 = int_to_ptr.hbm [resolvable:$true] %s2555_s11 }
  0x6b   : > { %s3734_s10 = sshra.s32 %s2556_s11, 4  ;;  %s3740_s27 = scalar_lea.hbm %s4953_s6, 256  ;;  %s3735_s10 = int_to_ptr.hbm [resolvable:$true] %s3734_s10 }
  0x6c   : > { %s3736_s15 = scalar_lea.hbm %s3735_s10, 128  ;;  %p3741_p11 = scmp.lt.s32.totalorder %s3735_s10, %s4953_s6 }
  0x6d   : > { %p3737_p1 = scmp.ne.s32.totalorder %s3735_s10, %s3736_s15  ;;  %p3742_p2 = scmp.lt.s32.totalorder %s3740_s27, %s3736_s15 }
  0x6e   : > { %742 = vmatmul.bf16.gmra.mxu0 %v2696_v42 }
  0x6f   : > { %831 = vmatmul.bf16.gmra.mxu1 %v2700_v43  ;;  %p3738_p4 = pnand %p3737_p1, %p3932_p3  ;;  %p3743_p9 = por %p3742_p2, %p3741_p11 }
  0x70   : > { %920 = vmatmul.bf16.gmra.mxu2 %v2696_v42 }
  0x71   : > { %1009 = vmatmul.bf16.gmra.mxu3 %v2700_v43  ;;  %v4024_v43 = vperm.slane %v403_v28, 1  ;;  %p3739_p8 = pneg %p3738_p4 }
  0x73   : > { %p3744_p10 = pnand %p3743_p9, %p3739_p8 }
  0x7e   : > { %747 = vmatmul.bf16.gmra.mxu0 %v2704_v48 }
  0x7f   : > { %836 = vmatmul.bf16.gmra.mxu1 %v2708_v49 }
  0x80   : > { %925 = vmatmul.bf16.gmra.mxu2 %v2704_v48 }
  0x81   : > { %1014 = vmatmul.bf16.gmra.mxu3 %v2708_v49  ;;  %v3060_v49 = vor.u32 %v3297_v44, %v3057_v45 }
  0x83   : > { %2035 = vmatpush.bf16.msrb.mxu3 %v3060_v49 }
  0x8e   : > { %752 = vmatmul.bf16.gmra.mxu0 %v2712_v54 }
  0x8f   : > { %841 = vmatmul.bf16.gmra.mxu1 %v2716_v55 }
  0x90   : > { %930 = vmatmul.bf16.gmra.mxu2 %v2712_v54 }
  0x91   : > { %1019 = vmatmul.bf16.gmra.mxu3 %v2716_v55 }
  0x9e   : > { %757 = vmatmul.bf16.gmra.mxu0 %v2720_v60 }
  0x9f   : > { %846 = vmatmul.bf16.gmra.mxu1 %v2724_v61 }
  0xa0   : > { %935 = vmatmul.bf16.gmra.mxu2 %v2720_v60 }
  0xa1   : > { %1024 = vmatmul.bf16.gmra.mxu3 %v2724_v61  ;;  %v2759_v61 = vld [vmem:[%s3969_s26 + $0x90] sm:$0xf] }
  0xa2   : > { %v2760_v2 = vor.u32 %v3224_v62, %v2759_v61  ;;  %v2777_v61 = vld [vmem:[%s3969_s26 + $0xb8] sm:$0xf0] }
  0xae   : > { %762 = vmatmul.bf16.gmra.mxu0 %v2728_v11 }
  0xaf   : > { %851 = vmatmul.bf16.gmra.mxu1 %v2732_v12 }
  0xb0   : > { %940 = vmatmul.bf16.gmra.mxu2 %v2728_v11 }
  0xb1   : > { %1029 = vmatmul.bf16.gmra.mxu3 %v2732_v12  ;;  %v3279_v12 = vld [vmem:[#allocation8 + $0x54] sm:$0xf] }
  0xb2   : > { %v2988_v17 = vor.u32 %v3279_v12, %v2985_v13 }
  0xb4   : > { %2007 = vmatpush.bf16.msrb.mxu2 %v2988_v17 }
  0xbe   : > { %767 = vmatmul.bf16.gmra.mxu0 %v2736_v20 }
  0xbf   : > { %856 = vmatmul.bf16.gmra.mxu1 %v2740_v21 }
  0xc0   : > { %945 = vmatmul.bf16.gmra.mxu2 %v2736_v20 }
  0xc1   : > { %1034 = vmatmul.bf16.gmra.mxu3 %v2740_v21 }
  0xce   : > { %772 = vmatmul.bf16.gmra.mxu0 %v2744_v26 }
  0xcf   : > { %861 = vmatmul.bf16.gmra.mxu1 %v2748_v27 }
  0xd0   : > { %950 = vmatmul.bf16.gmra.mxu2 %v2744_v26  ;;  %v3295_v26 = vld [vmem:[#allocation8 + $0xd4] sm:$0xf] }
  0xd1   : > { %1039 = vmatmul.bf16.gmra.mxu3 %v2748_v27  ;;  %v3049_v27 = vld [vmem:[#allocation8 + $0xd8] sm:$0xf0] }
  0xd2   : > { %v3052_v30 = vor.u32 %v3295_v26, %v3049_v27  ;;  %v3229_v26 = vld [vmem:[%s3969_s26 + $0xc4] sm:$0xf]  ;;  %v2785_v27 = vld [vmem:[%s3969_s26 + $0xc8] sm:$0xf0] }
  0xd4   : > { %2036 = vmatpush.bf16.msrb.mxu3 %v3052_v30 }
  0xdb   : > { %v738_v37 = vpop.f32.mrf.mxu0 }
  0xdc   : > { %v739_v40 = vadd.f32 %v738_v37, %v4017_v31  ;;  %v827_v41 = vpop.f32.mrf.mxu1 }
  0xde   : > { %v4022_v42 = vadd.f32 %v827_v41, %v739_v40  ;;  %777 = vmatmul.bf16.gmra.mxu0 %v2752_v34  ;;  %v3296_v40 = vld [vmem:[#allocation8 + $0xd4] sm:$0xf0] }
  0xdf   : > { %866 = vmatmul.bf16.gmra.mxu1 %v2756_v38 }
  0xe0   : > { %955 = vmatmul.bf16.gmra.mxu2 %v2752_v34  ;;  %v3047_v34 = vld [vmem:[#allocation8 + $0xd0] sm:$0xf] }
  0xe1   : > { %1044 = vmatmul.bf16.gmra.mxu3 %v2756_v38  ;;  %v2772_v38 = vor.u32 %v3225_v24, %v2769_v25  ;;  %v3048_v45 = vor.u32 %v3296_v40, %v3047_v34  ;;  %v3230_v24 = vld [vmem:[%s3969_s26 + $0xc4] sm:$0xf0] }
  0xe2   : > { %v2784_v30 = vor.u32 %v3230_v24, %v2783_v23  ;;  %v2791_v23 = vld [vmem:[%s3969_s26 + $0xd0] sm:$0xf]  ;;  %v3232_v24 = vld [vmem:[%s3969_s26 + $0xd4] sm:$0xf0] }
  0xe3   : > { %v916_v48 = vpop.f32.mrf.mxu2  ;;  %v740_v55 = vpop.f32.mrf.mxu0  ;;  %1978 = vmatpush.bf16.msrb.mxu1 %v3048_v45 }
  0xe4   : > { %v917_v53 = vadd.f32 %v916_v48, %v4024_v43  ;;  %v1005_v54 = vpop.f32.mrf.mxu3  ;;  %v741_v57 = vadd.f32 %v740_v55, %v4017_v31  ;;  %v829_v58 = vpop.f32.mrf.mxu1 }
  0xe6   : > { %v4028_v59 = vadd.f32 %v1005_v54, %v917_v53  ;;  %v4030_v60 = vadd.f32 %v829_v58, %v741_v57  ;;  %v3228_v57 = vld [vmem:[%s3969_s26 + $0xb4] sm:$0xf0]  ;;  %v3227_v58 = vld [vmem:[%s3969_s26 + $0xb4] sm:$0xf] }
  0xe7   : > { %v2776_v63 = vor.u32 %v3228_v57, %v2775_v56  ;;  %v2975_v56 = vld [vmem:[#allocation8 + $0x40] sm:$0xf] }
  0xeb   : > { %v918_v1 = vpop.f32.mrf.mxu2  ;;  %v743_v5 = vpop.f32.mrf.mxu0 }
  0xec   : > { %v919_v3 = vadd.f32 %v918_v1, %v4024_v43  ;;  %v1007_v4 = vpop.f32.mrf.mxu3  ;;  %v744_v7 = vadd.f32 %v743_v5, %v4017_v31  ;;  %v832_v8 = vpop.f32.mrf.mxu1 }
  0xee   : > { %v4038_v9 = vadd.f32 %v1007_v4, %v919_v3  ;;  %v4040_v10 = vadd.f32 %v832_v8, %v744_v7  ;;  %782 = vmatmul.bf16.gmra.mxu0 %v2760_v2  ;;  %v2780_v3 = vor.u32 %v3227_v58, %v2777_v61  ;;  %v1149_v8 = vmul.f32 0.044715, %v4022_v42 }
  0xef   : > { %871 = vmatmul.bf16.gmra.mxu1 %v2764_v6 }
  0xf0   : > { %960 = vmatmul.bf16.gmra.mxu2 %v2760_v2 }
  0xf1   : > { %1049 = vmatmul.bf16.gmra.mxu3 %v2764_v6 }
  0xf3   : > { %v921_v11 = vpop.f32.mrf.mxu2  ;;  %v745_v16 = vpop.f32.mrf.mxu0 }
  0xf4   : > { %v922_v14 = vadd.f32 %v921_v11, %v4024_v43  ;;  %v1010_v15 = vpop.f32.mrf.mxu3  ;;  %v746_v18 = vadd.f32 %v745_v16, %v4017_v31  ;;  %v834_v19 = vpop.f32.mrf.mxu1 }
  0xf6   : > { %v4044_v20 = vadd.f32 %v1010_v15, %v922_v14  ;;  %v4046_v21 = vadd.f32 %v834_v19, %v746_v18  ;;  %v1213_v15 = vmul.f32 %v1149_v8, %v4022_v42  ;;  %v1150_v19 = vmul.f32 0.044715, %v4028_v59 }
  0xf8   : > { %v1277_v25 = vmul.f32 %v1213_v15, %v4022_v42 }
  0xfa   : > { %v1341_v39 = vadd.f32 %v1277_v25, %v4022_v42 }
  0xfb   : > { %v923_v28 = vpop.f32.mrf.mxu2  ;;  %v748_v37 = vpop.f32.mrf.mxu0 }
  0xfc   : > { %v924_v35 = vadd.f32 %v923_v28, %v4024_v43  ;;  %v1012_v36 = vpop.f32.mrf.mxu3  ;;  %v749_v41 = vadd.f32 %v748_v37, %v4017_v31  ;;  %v837_v44 = vpop.f32.mrf.mxu1  ;;  %v1214_v28 = vmul.f32 %v1150_v19, %v4028_v59  ;;  %v2788_v37 = vor.u32 %v3229_v26, %v2785_v27  ;;  %v3231_v26 = vld [vmem:[%s3969_s26 + $0xd4] sm:$0xf]  ;;  %v2793_v27 = vld [vmem:[%s3969_s26 + $0xd8] sm:$0xf0] }
  0xfe   : > { %v4054_v46 = vadd.f32 %v1012_v36, %v924_v35  ;;  %v4056_v47 = vadd.f32 %v837_v44, %v749_v41  ;;  %787 = vmatmul.bf16.gmra.mxu0 %v2768_v29  ;;  %v1278_v45 = vmul.f32 %v1214_v28, %v4028_v59 }
  0xff   : > { %876 = vmatmul.bf16.gmra.mxu1 %v2772_v38 }
 0x100   : > { %965 = vmatmul.bf16.gmra.mxu2 %v2768_v29  ;;  %v1342_v57 = vadd.f32 %v1278_v45, %v4028_v59 }
 0x101   : > { %1054 = vmatmul.bf16.gmra.mxu3 %v2772_v38  ;;  %v2980_v38 = vor.u32 %v3277_v32, %v2977_v33  ;;  %v2792_v33 = vor.u32 %v3232_v24, %v2791_v23 }
 0x103   : > { %v926_v48 = vpop.f32.mrf.mxu2  ;;  %v750_v51 = vpop.f32.mrf.mxu0  ;;  %2008 = vmatpush.bf16.msrb.mxu2 %v2980_v38  ;;  %v2796_v38 = vor.u32 %v3231_v26, %v2793_v27  ;;  %v1086_v27 = vmul.f32 0.5, %v4028_v59 }
 0x104   : > { %v927_v49 = vadd.f32 %v926_v48, %v4024_v43  ;;  %v1015_v50 = vpop.f32.mrf.mxu3  ;;  %v751_v52 = vadd.f32 %v750_v51, %v4017_v31  ;;  %v839_v53 = vpop.f32.mrf.mxu1 }
 0x106   : > { %v4060_v54 = vadd.f32 %v1015_v50, %v927_v49  ;;  %v4062_v55 = vadd.f32 %v839_v53, %v751_v52  ;;  %v1405_v49 = vmul.f32 0.7978846, %v1341_v39  ;;  %v1153_v50 = vmul.f32 0.044715, %v4040_v10  ;;  %v3293_v52 = vld [vmem:[#allocation8 + $0xc4] sm:$0xf] }
 0x107   : > { %v3041_v53 = vld [vmem:[#allocation8 + $0xc8] sm:$0xf0] }
 0x108   : > { %3426 = vtanh.f32 %v1405_v49  ;;  %v1217_v15 = vmul.f32 %v1153_v50, %v4040_v10  ;;  %v1158_v59 = vmul.f32 0.044715, %v4060_v54 }
 0x10b   : > { %v928_v62 = vpop.f32.mrf.mxu2  ;;  %v753_v2 = vpop.f32.mrf.mxu0 }
 0x10c   : > { %v929_v0 = vadd.f32 %v928_v62, %v4024_v43  ;;  %v1017_v1 = vpop.f32.mrf.mxu3  ;;  %v754_v4 = vadd.f32 %v753_v2, %v4017_v31  ;;  %v842_v5 = vpop.f32.mrf.mxu1  ;;  %v3044_v62 = vor.u32 %v3293_v52, %v3041_v53 }
 0x10e   : > { %v4070_v6 = vadd.f32 %v1017_v1, %v929_v0  ;;  %v4072_v7 = vadd.f32 %v842_v5, %v754_v4  ;;  %792 = vmatmul.bf16.gmra.mxu0 %v2776_v63  ;;  %v3039_v0 = vld [vmem:[#allocation8 + $0xc0] sm:$0xf]  ;;  %v3294_v1 = vld [vmem:[#allocation8 + $0xc4] sm:$0xf0]  ;;  %2037 = vmatpush.bf16.msrb.mxu3 %v3044_v62 }
 0x10f   : > { %881 = vmatmul.bf16.gmra.mxu1 %v2780_v3  ;;  %v3040_v8 = vor.u32 %v3294_v1, %v3039_v0 }
 0x110   : > { %970 = vmatmul.bf16.gmra.mxu2 %v2776_v63  ;;  %v3278_v63 = vld [vmem:[#allocation8 + $0x44] sm:$0xf0] }
 0x111   : > { %1059 = vmatmul.bf16.gmra.mxu3 %v2780_v3  ;;  %v2976_v5 = vor.u32 %v3278_v63, %v2975_v56  ;;  %1979 = vmatpush.bf16.msrb.mxu1 %v3040_v8  ;;  %v1085_v56 = vmul.f32 0.5, %v4022_v42  ;;  %v2969_v8 = vld [vmem:[#allocation8 + $0x38] sm:$0xf0] }
 0x113   : > { %v931_v11 = vpop.f32.mrf.mxu2  ;;  %v755_v14 = vpop.f32.mrf.mxu0  ;;  %1950 = vmatpush.bf16.msrb.mxu0 %v2976_v5  ;;  %v3275_v5 = vld [vmem:[#allocation8 + $0x34] sm:$0xf] }
 0x114   : > { %v932_v12 = vadd.f32 %v931_v11, %v4024_v43  ;;  %v1020_v13 = vpop.f32.mrf.mxu3  ;;  %v756_v16 = vadd.f32 %v755_v14, %v4017_v31  ;;  %v844_v17 = vpop.f32.mrf.mxu1  ;;  %v1406_v14 = vmul.f32 0.7978846, %v1342_v57 }
 0x116   : > { %v4078_v18 = vadd.f32 %v1020_v13, %v932_v12  ;;  %v4081_v22 = vadd.f32 %v844_v17, %v756_v16  ;;  %v1154_v16 = vmul.f32 0.044715, %v4044_v20 }
 0x118   : > { %4966 = vst [vmem:[#allocation16_spill] sm:$0xff] %v4081_v22 }
 0x11b   : > { %v933_v29 = vpop.f32.mrf.mxu2  ;;  %v758_v36 = vpop.f32.mrf.mxu0 }
 0x11c   : > { %v934_v34 = vadd.f32 %v933_v29, %v4024_v43  ;;  %v1022_v35 = vpop.f32.mrf.mxu3  ;;  %v759_v40 = vadd.f32 %v758_v36, %v4017_v31  ;;  %v847_v41 = vpop.f32.mrf.mxu1  ;;  %v1281_v29 = vmul.f32 %v1217_v15, %v4040_v10 }
 0x11e   : > { %v4092_v44 = vadd.f32 %v1022_v35, %v934_v34  ;;  %v4095_v48 = vadd.f32 %v847_v41, %v759_v40  ;;  %797 = vmatmul.bf16.gmra.mxu0 %v2784_v30  ;;  %v3427_v34 = vpop.eup %3426  ;;  %v1345_v45 = vadd.f32 %v1281_v29, %v4040_v10 }
 0x11f   : > { %886 = vmatmul.bf16.gmra.mxu1 %v2788_v37 }
 0x120   : > { %4967 = vst [vmem:[#allocation17_spill] sm:$0xff] %v4092_v44  ;;  %975 = vmatmul.bf16.gmra.mxu2 %v2784_v30  ;;  %v1165_v51 = vmul.f32 0.044715, %v4095_v48  ;;  %v1218_v30 = vmul.f32 %v1154_v16, %v4044_v20  ;;  %v1409_v0 = vmul.f32 0.7978846, %v1345_v45 }
 0x121   : > { %1064 = vmatmul.bf16.gmra.mxu3 %v2788_v37 }
 0x122   : > { %v1229_v58 = vmul.f32 %v1165_v51, %v4095_v48  ;;  %v1282_v49 = vmul.f32 %v1218_v30, %v4044_v20  ;;  %v1533_v51 = vadd.f32 1.0, %v3427_v34  ;;  %v2799_v30 = vld [vmem:[%s3969_s26 + $0xe0] sm:$0xf] }
 0x123   : > { %v936_v61 = vpop.f32.mrf.mxu2  ;;  %v4102_v4 = vpop.f32.mrf.mxu0 }
 0x124   : > { %v937_v2 = vadd.f32 %v936_v61, %v4024_v43  ;;  %v1025_v3 = vpop.f32.mrf.mxu3  ;;  %v1293_v11 = vmul.f32 %v1229_v58, %v4095_v48  ;;  %v4105_v12 = vpop.f32.mrf.mxu1  ;;  %v1157_v58 = vmul.f32 0.044715, %v4056_v47  ;;  %v1101_v61 = vmul.f32 0.5, %v4095_v48 }
 0x125   : > { %v1346_v1 = vadd.f32 %v1282_v49, %v4044_v20 }
 0x126   : > { %v4107_v13 = vadd.f32 %v1025_v3, %v937_v2  ;;  %v1357_v17 = vadd.f32 %v1293_v11, %v4095_v48  ;;  %v1597_v11 = vmul.f32 %v1533_v51, %v1085_v56  ;;  %v2972_v48 = vor.u32 %v3275_v5, %v2969_v8  ;;  %v3292_v8 = vld [vmem:[#allocation8 + $0xb4] sm:$0xf0] }
 0x127   : > { %v1221_v24 = vmul.f32 %v1157_v58, %v4056_v47 }
 0x128   : > { %v1166_v19 = vmul.f32 0.044715, %v4107_v13  ;;  %v1421_v25 = vmul.f32 0.7978846, %v1357_v17  ;;  %2009 = vmatpush.bf16.msrb.mxu2 %v2972_v48 }
 0x129   : > { %v1285_v49 = vmul.f32 %v1221_v24, %v4056_v47 }
 0x12a   : > { %v1230_v28 = vmul.f32 %v1166_v19, %v4107_v13  ;;  %3428 = vtanh.f32 %v1421_v25 }
 0x12b   : > { %v4120_v32 = vpop.f32.mrf.mxu2  ;;  %v763_v37 = vpop.f32.mrf.mxu0  ;;  %3430 = vtanh.f32 %v1406_v14  ;;  %v1349_v24 = vadd.f32 %v1285_v49, %v4056_v47 }
 0x12c   : > { %v1294_v35 = vmul.f32 %v1230_v28, %v4107_v13  ;;  %v4123_v36 = vpop.f32.mrf.mxu3  ;;  %v764_v39 = vadd.f32 %v763_v37, %v4017_v31  ;;  %v852_v40 = vpop.f32.mrf.mxu1  ;;  %v1410_v28 = vmul.f32 0.7978846, %v1346_v1  ;;  %v3233_v37 = vld [vmem:[%s3969_s26 + $0xe4] sm:$0xf] }
 0x12e   : > { %v1358_v41 = vadd.f32 %v1294_v35, %v4107_v13  ;;  %v4129_v50 = vadd.f32 %v852_v40, %v764_v39  ;;  %802 = vmatmul.bf16.gmra.mxu0 %v2792_v33  ;;  %v3234_v35 = vld [vmem:[%s3969_s26 + $0xe4] sm:$0xf0] }
 0x12f   : > { %891 = vmatmul.bf16.gmra.mxu1 %v2796_v38  ;;  %v2800_v58 = vor.u32 %v3234_v35, %v2799_v30 }
 0x130   : > { %v1422_v52 = vmul.f32 0.7978846, %v1358_v41  ;;  %980 = vmatmul.bf16.gmra.mxu2 %v2792_v33  ;;  %v3429_v53 = vpop.eup %3428  ;;  %v1169_v57 = vmul.f32 0.044715, %v4129_v50  ;;  %v2801_v41 = vld [vmem:[%s3969_s26 + $0xe8] sm:$0xf0] }
 0x131   : > { %1069 = vmatmul.bf16.gmra.mxu3 %v2796_v38  ;;  %v1549_v62 = vadd.f32 1.0, %v3429_v53  ;;  %v3431_v63 = vpop.eup %3430  ;;  %v1102_v38 = vmul.f32 0.5, %v4107_v13  ;;  %v3033_v53 = vld [vmem:[#allocation8 + $0xb8] sm:$0xf0]  ;;  %v3276_v13 = vld [vmem:[#allocation8 + $0x34] sm:$0xf0] }
 0x132   : > { %3432 = vtanh.f32 %v1422_v52  ;;  %v1233_v2 = vmul.f32 %v1169_v57, %v4129_v50  ;;  %v1534_v23 = vadd.f32 1.0, %v3431_v63  ;;  %v3291_v52 = vld [vmem:[#allocation8 + $0xb4] sm:$0xf]  ;;  %v3031_v63 = vld [vmem:[#allocation8 + $0xb0] sm:$0xf] }
 0x133   : > { %v941_v3 = vpop.f32.mrf.mxu2  ;;  %v1613_v42 = vmul.f32 %v1549_v62, %v1101_v61  ;;  %v4138_v16 = vpop.f32.mrf.mxu0  ;;  %3434 = vtanh.f32 %v1409_v0  ;;  %v3036_v61 = vor.u32 %v3291_v52, %v3033_v53  ;;  %v2967_v62 = vld [vmem:[#allocation8 + $0x30] sm:$0xf] }
 0x134   : > { %v942_v14 = vadd.f32 %v941_v3, %v4024_v43  ;;  %v1030_v15 = vpop.f32.mrf.mxu3  ;;  %v1297_v17 = vmul.f32 %v1233_v2, %v4129_v50  ;;  %v4141_v19 = vpop.f32.mrf.mxu1  ;;  %v1598_v45 = vmul.f32 %v1534_v23, %v1086_v27  ;;  %v2804_v3 = vor.u32 %v3233_v37, %v2801_v41 }
 0x135   : > { %v4146_v26 = vadd.f32 %v1613_v42, %v1597_v11  ;;  %v2968_v5 = vor.u32 %v3276_v13, %v2967_v62  ;;  %2038 = vmatpush.bf16.msrb.mxu3 %v3036_v61  ;;  %v1105_v37 = vmul.f32 0.5, %v4129_v50  ;;  %v1161_v41 = vmul.f32 0.044715, %v4072_v7 }
 0x136   : > { %v4144_v25 = vadd.f32 %v1030_v15, %v942_v14  ;;  %v1361_v29 = vadd.f32 %v1297_v17, %v4129_v50  ;;  %v3032_v15 = vor.u32 %v3292_v8, %v3031_v63  ;;  %v1222_v17 = vmul.f32 %v1158_v59, %v4060_v54  ;;  %v2807_v8 = vld [vmem:[%s3969_s26 + $0xf0] sm:$0xf] }
 0x137   : > { %1951 = vmatpush.bf16.msrb.mxu0 %v2968_v5  ;;  %v1151_v59 = vmul.f32 0.044715, %v4030_v60  ;;  %v1152_v50 = vmul.f32 0.044715, %v4038_v9  ;;  %v1162_v5 = vmul.f32 0.044715, %v4078_v18 }
 0x138   : > { %v3433_v33 = vpop.eup %3432  ;;  %v1170_v34 = vmul.f32 0.044715, %v4144_v25  ;;  %v1425_v40 = vmul.f32 0.7978846, %v1361_v29  ;;  %1980 = vmatpush.bf16.msrb.mxu1 %v3032_v15  ;;  %v1286_v35 = vmul.f32 %v1222_v17, %v4060_v54  ;;  %v3236_v15 = vld [vmem:[%s3969_s26 + $0xf4] sm:$0xf0] }
 0x139   : > { %v1550_v39 = vadd.f32 1.0, %v3433_v33  ;;  %v3435_v11 = vpop.eup %3434  ;;  %v1089_v33 = vmul.f32 0.5, %v4040_v10  ;;  %v3235_v17 = vld [vmem:[%s3969_s26 + $0xf4] sm:$0xf] }
 0x13a   : > { %v1234_v51 = vmul.f32 %v1170_v34, %v4144_v25  ;;  %3436 = vtanh.f32 %v1425_v40  ;;  %v1413_v40 = vmul.f32 0.7978846, %v1349_v24  ;;  %v1350_v13 = vadd.f32 %v1286_v35, %v4060_v54 }
 0x13b   : > { %v1614_v56 = vmul.f32 %v1550_v39, %v1102_v38  ;;  %v4159_v57 = vpop.f32.mrf.mxu2  ;;  %v768_v2 = vpop.f32.mrf.mxu0  ;;  %3438 = vtanh.f32 %v1410_v28  ;;  %v1537_v28 = vadd.f32 1.0, %v3435_v11  ;;  %v1106_v24 = vmul.f32 0.5, %v4144_v25 }
 0x13c   : > { %v1298_v0 = vmul.f32 %v1234_v51, %v4144_v25  ;;  %v4162_v1 = vpop.f32.mrf.mxu3  ;;  %v769_v42 = vadd.f32 %v768_v2, %v4017_v31  ;;  %v857_v14 = vpop.f32.mrf.mxu1 }
 0x13d   : > { %v4165_v48 = vadd.f32 %v1614_v56, %v1598_v45  ;;  %v1601_v53 = vmul.f32 %v1537_v28, %v1089_v33  ;;  %v2809_v28 = vld [vmem:[%s3969_s26 + $0xf8] sm:$0xf0]  ;;  %v1414_v33 = vmul.f32 0.7978846, %v1350_v13  ;;  %v1155_v13 = vmul.f32 0.044715, %v4046_v21 }
 0x13e   : > { %v1362_v23 = vadd.f32 %v1298_v0, %v4144_v25  ;;  %v4170_v27 = vadd.f32 %v857_v14, %v769_v42  ;;  %807 = vmatmul.bf16.gmra.mxu0 %v2800_v58  ;;  %v1215_v42 = vmul.f32 %v1151_v59, %v4030_v60  ;;  %v2812_v59 = vor.u32 %v3235_v17, %v2809_v28 }
 0x13f   : > { %896 = vmatmul.bf16.gmra.mxu1 %v2804_v3  ;;  %v1093_v17 = vmul.f32 0.5, %v4056_v47 }
 0x140   : > { %v1426_v29 = vmul.f32 0.7978846, %v1362_v23  ;;  %985 = vmatmul.bf16.gmra.mxu2 %v2800_v58  ;;  %v3437_v30 = vpop.eup %3436  ;;  %v1173_v34 = vmul.f32 0.044715, %v4170_v27  ;;  %v1090_v58 = vmul.f32 0.5, %v4044_v20  ;;  %v1216_v23 = vmul.f32 %v1152_v50, %v4038_v9 }
 0x141   : > { %1074 = vmatmul.bf16.gmra.mxu3 %v2804_v3  ;;  %v1553_v38 = vadd.f32 1.0, %v3437_v30  ;;  %v3439_v39 = vpop.eup %3438  ;;  %v1225_v3 = vmul.f32 %v1161_v41, %v4072_v7  ;;  %v1279_v41 = vmul.f32 %v1215_v42, %v4030_v60 }
 0x142   : > { %3440 = vtanh.f32 %v1426_v29  ;;  %v1237_v45 = vmul.f32 %v1173_v34, %v4170_v27  ;;  %v1538_v2 = vadd.f32 1.0, %v3439_v39  ;;  %v2808_v39 = vor.u32 %v3236_v15, %v2807_v8 }
 0x143   : > { %v946_v49 = vpop.f32.mrf.mxu2  ;;  %v4180_v52 = vpop.f32.mrf.mxu0  ;;  %v1617_v56 = vmul.f32 %v1553_v38, %v1105_v37  ;;  %3442 = vtanh.f32 %v1413_v40  ;;  %v1289_v37 = vmul.f32 %v1225_v3, %v4072_v7 }
 0x144   : > { %v947_v10 = vadd.f32 %v946_v49, %v4024_v43  ;;  %v1035_v51 = vpop.f32.mrf.mxu3  ;;  %v1301_v61 = vmul.f32 %v1237_v45, %v4170_v27  ;;  %v4185_v62 = vpop.f32.mrf.mxu1  ;;  %v1602_v35 = vmul.f32 %v1538_v2, %v1090_v58 }
 0x145   : > { %v4190_v0 = vadd.f32 %v1617_v56, %v1601_v53  ;;  %v1226_v53 = vmul.f32 %v1162_v5, %v4078_v18  ;;  %v1353_v2 = vadd.f32 %v1289_v37, %v4072_v7 }
 0x146   : > { %v4188_v63 = vadd.f32 %v1035_v51, %v947_v10  ;;  %v1365_v20 = vadd.f32 %v1301_v61, %v4170_v27  ;;  %v1280_v51 = vmul.f32 %v1216_v23, %v4038_v9  ;;  %v1109_v23 = vmul.f32 0.5, %v4170_v27 }
 0x147   : > { %v1417_v28 = vmul.f32 0.7978846, %v1353_v2  ;;  %v1159_v2 = vmul.f32 0.044715, %v4062_v55 }
 0x148   : > { %v3441_v11 = vpop.eup %3440  ;;  %v1174_v14 = vmul.f32 0.044715, %v4188_v63  ;;  %v1429_v29 = vmul.f32 0.7978846, %v1365_v20  ;;  %v1344_v42 = vadd.f32 %v1280_v51, %v4038_v9 }
 0x149   : > { %v1554_v30 = vadd.f32 1.0, %v3441_v11  ;;  %v3443_v10 = vpop.eup %3442  ;;  %v1343_v11 = vadd.f32 %v1279_v41, %v4030_v60 }
 0x14a   : > { %v1238_v34 = vmul.f32 %v1174_v14, %v4188_v63  ;;  %3444 = vtanh.f32 %v1429_v29  ;;  %v1541_v8 = vadd.f32 1.0, %v3443_v10  ;;  %v1290_v14 = vmul.f32 %v1226_v53, %v4078_v18 }
 0x14b   : > { %v4205_v38 = vpop.f32.mrf.mxu2  ;;  %v1618_v40 = vmul.f32 %v1554_v30, %v1106_v24  ;;  %v773_v25 = vpop.f32.mrf.mxu0  ;;  %3446 = vtanh.f32 %v1414_v33  ;;  %v1219_v29 = vmul.f32 %v1155_v13, %v4046_v21  ;;  %v1094_v13 = vmul.f32 0.5, %v4060_v54 }
 0x14c   : > { %v1302_v45 = vmul.f32 %v1238_v34, %v4188_v63  ;;  %v4209_v49 = vpop.f32.mrf.mxu3  ;;  %v774_v56 = vadd.f32 %v773_v25, %v4017_v31  ;;  %v862_v50 = vpop.f32.mrf.mxu1  ;;  %v1354_v47 = vadd.f32 %v1290_v14, %v4078_v18  ;;  %v1407_v25 = vmul.f32 0.7978846, %v1343_v11 }
 0x14d   : > { %v4214_v58 = vadd.f32 %v1618_v40, %v1602_v35  ;;  %v1283_v53 = vmul.f32 %v1219_v29, %v4046_v21  ;;  %v1110_v11 = vmul.f32 0.5, %v4188_v63 }
 0x14e   : > { %v1366_v61 = vadd.f32 %v1302_v45, %v4188_v63  ;;  %v4219_v3 = vadd.f32 %v862_v50, %v774_v56  ;;  %812 = vmatmul.bf16.gmra.mxu0 %v2808_v39  ;;  %v1156_v56 = vmul.f32 0.044715, %v4054_v46 }
 0x14f   : > { %901 = vmatmul.bf16.gmra.mxu1 %v2812_v59  ;;  %v1347_v29 = vadd.f32 %v1283_v53, %v4046_v21 }
 0x150   : > { %v1430_v20 = vmul.f32 0.7978846, %v1366_v61  ;;  %990 = vmatmul.bf16.gmra.mxu2 %v2808_v39  ;;  %v3445_v5 = vpop.eup %3444  ;;  %v1177_v15 = vmul.f32 0.044715, %v4219_v3  ;;  %v1605_v39 = vmul.f32 %v1541_v8, %v1093_v17  ;;  %v3273_v17 = vld [vmem:[#allocation8 + $0x24] sm:$0xf]  ;;  %v1220_v53 = vmul.f32 %v1156_v56, %v4054_v46 }
 0x151   : > { %1079 = vmatmul.bf16.gmra.mxu3 %v2812_v59  ;;  %v1557_v24 = vadd.f32 1.0, %v3445_v5  ;;  %v3447_v41 = vpop.eup %3446  ;;  %v1408_v59 = vmul.f32 0.7978846, %v1344_v42  ;;  %v1418_v5 = vmul.f32 0.7978846, %v1354_v47 }
 0x152   : > { %3448 = vtanh.f32 %v1430_v20  ;;  %v1241_v30 = vmul.f32 %v1177_v15, %v4219_v3  ;;  %v1542_v8 = vadd.f32 1.0, %v3447_v41  ;;  %v1160_v56 = vmul.f32 0.044715, %v4070_v6 }
 0x153   : > { %v951_v33 = vpop.f32.mrf.mxu2  ;;  %v4230_v37 = vpop.f32.mrf.mxu0  ;;  %v1621_v40 = vmul.f32 %v1557_v24, %v1109_v23  ;;  %3450 = vtanh.f32 %v1417_v28  ;;  %v2961_v23 = vld [vmem:[#allocation8 + $0x28] sm:$0xf0]  ;;  %v3289_v24 = vld [vmem:[#allocation8 + $0xa4] sm:$0xf] }
 0x154   : > { %v952_v34 = vadd.f32 %v951_v33, %v4024_v43  ;;  %v1040_v35 = vpop.f32.mrf.mxu3  ;;  %v1305_v27 = vmul.f32 %v1241_v30, %v4219_v3  ;;  %v4234_v45 = vpop.f32.mrf.mxu1  ;;  %3452 = vtanh.f32 %v1407_v25  ;;  %v2964_v28 = vor.u32 %v3273_v17, %v2961_v23  ;;  %v3025_v30 = vld [vmem:[#allocation8 + $0xa8] sm:$0xf0]  ;;  %v2959_v33 = vld [vmem:[#allocation8 + $0x20] sm:$0xf]  ;;  %v3290_v25 = vld [vmem:[#allocation8 + $0xa4] sm:$0xf0] }
 0x155   : > { %v4238_v51 = vadd.f32 %v1621_v40, %v1605_v39  ;;  %v3028_v41 = vor.u32 %v3289_v24, %v3025_v30  ;;  %v1411_v23 = vmul.f32 0.7978846, %v1347_v29  ;;  %v1097_v29 = vmul.f32 0.5, %v4072_v7 }
 0x156   : > { %v4236_v10 = vadd.f32 %v1040_v35, %v952_v34  ;;  %v1369_v50 = vadd.f32 %v1305_v27, %v4219_v3  ;;  %v3274_v34 = vld [vmem:[#allocation8 + $0x24] sm:$0xf0]  ;;  %v3023_v27 = vld [vmem:[#allocation8 + $0xa0] sm:$0xf]  ;;  %2010 = vmatpush.bf16.msrb.mxu2 %v2964_v28  ;;  %v1284_v28 = vmul.f32 %v1220_v53, %v4054_v46 }
 0x157   : > { %v2960_v47 = vor.u32 %v3274_v34, %v2959_v33  ;;  %2039 = vmatpush.bf16.msrb.mxu3 %v3028_v41  ;;  %v761_v33 = vadd.f32 %v4102_v4, %v4017_v31 }
 0x158   : > { %v3449_v61 = vpop.eup %3448  ;;  %v1178_v20 = vmul.f32 0.044715, %v4236_v10  ;;  %v1433_v42 = vmul.f32 0.7978846, %v1369_v50  ;;  %v1606_v50 = vmul.f32 %v1542_v8, %v1094_v13 }
 0x159   : > { %v1558_v14 = vadd.f32 1.0, %v3449_v61  ;;  %v3451_v61 = vpop.eup %3450  ;;  %1952 = vmatpush.bf16.msrb.mxu0 %v2960_v47 }
 0x15a   : > { %v1242_v15 = vmul.f32 %v1178_v20, %v4236_v10  ;;  %3454 = vtanh.f32 %v1433_v42  ;;  %v1223_v20 = vmul.f32 %v1159_v2, %v4062_v55  ;;  %v3453_v13 = vpop.eup %3452  ;;  %v1545_v8 = vadd.f32 1.0, %v3451_v61 }
 0x15b   : > { %v4249_v54 = vpop.f32.mrf.mxu2  ;;  %v1622_v35 = vmul.f32 %v1558_v14, %v1110_v11  ;;  %v778_v40 = vpop.f32.mrf.mxu0  ;;  %v3024_v11 = vor.u32 %v3290_v25, %v3023_v27  ;;  %3456 = vtanh.f32 %v1418_v5  ;;  %v1224_v25 = vmul.f32 %v1160_v56, %v4070_v6 }
 0x15c   : > { %v1306_v63 = vmul.f32 %v1242_v15, %v4236_v10  ;;  %v4252_v39 = vpop.f32.mrf.mxu3  ;;  %v779_v42 = vadd.f32 %v778_v40, %v4017_v31  ;;  %v867_v17 = vpop.f32.mrf.mxu1  ;;  %3458 = vtanh.f32 %v1408_v59  ;;  %v1287_v5 = vmul.f32 %v1223_v20, %v4062_v55 }
 0x15d   : > { %v4258_v15 = vadd.f32 %v1622_v35, %v1606_v50  ;;  %1981 = vmatpush.bf16.msrb.mxu1 %v3024_v11  ;;  %v1113_v35 = vmul.f32 0.5, %v4219_v3  ;;  %v1535_v40 = vadd.f32 1.0, %v3453_v13  ;;  %v1609_v7 = vmul.f32 %v1545_v8, %v1097_v29 }
 0x15e   : > { %v1370_v14 = vadd.f32 %v1306_v63, %v4236_v10  ;;  %v4260_v24 = vadd.f32 %v867_v17, %v779_v42  ;;  %v1087_v63 = vmul.f32 0.5, %v4030_v60  ;;  %v1088_v3 = vmul.f32 0.5, %v4038_v9 }
 0x15f   : > { %v1091_v20 = vmul.f32 0.5, %v4046_v21  ;;  %v4279_v60 = vadd.f32 %v4105_v12, %v761_v33  ;;  %v4291_v9 = vmul.f32 0.5, %v4054_v46  ;;  %v1098_v33 = vmul.f32 0.5, %v4078_v18 }
 0x160   : > { %v1434_v2 = vmul.f32 0.7978846, %v1370_v14  ;;  %v3455_v30 = vpop.eup %3454  ;;  %v1181_v34 = vmul.f32 0.044715, %v4260_v24  ;;  %v1348_v14 = vadd.f32 %v1284_v28, %v4054_v46  ;;  %v4294_v12 = vmul.f32 %v1535_v40, %v1087_v63 }
 0x161   : > { %v1561_v59 = vadd.f32 1.0, %v3455_v30  ;;  %v3457_v27 = vpop.eup %3456  ;;  %v1288_v30 = vmul.f32 %v1224_v25, %v4070_v6  ;;  %v1163_v28 = vmul.f32 0.044715, %v4081_v22  ;;  %v1167_v29 = vmul.f32 0.044715, %v4279_v60 }
 0x162   : > { %3460 = vtanh.f32 %v1434_v2  ;;  %v1245_v41 = vmul.f32 %v1181_v34, %v4260_v24  ;;  %v3459_v11 = vpop.eup %3458  ;;  %v1546_v2 = vadd.f32 1.0, %v3457_v27  ;;  %v1114_v46 = vmul.f32 0.5, %v4236_v10 }
 0x163   : > { %3462 = vtanh.f32 %v1411_v23  ;;  %v956_v47 = vpop.f32.mrf.mxu2  ;;  %v4274_v61 = vpop.f32.mrf.mxu0  ;;  %v1625_v53 = vmul.f32 %v1561_v59, %v1113_v35  ;;  %v1351_v23 = vadd.f32 %v1287_v5, %v4062_v55  ;;  %v1412_v63 = vmul.f32 0.7978846, %v1348_v14 }
 0x164   : > { %v957_v4 = vadd.f32 %v956_v47, %v4024_v43  ;;  %v1045_v50 = vpop.f32.mrf.mxu3  ;;  %v1309_v42 = vmul.f32 %v1245_v41, %v4260_v24  ;;  %v4282_v17 = vpop.f32.mrf.mxu1  ;;  %v1536_v41 = vadd.f32 1.0, %v3459_v11  ;;  %v939_v27 = vadd.f32 %v4120_v32, %v4024_v43 }
 0x165   : > { %v4288_v56 = vadd.f32 %v1625_v53, %v1609_v7  ;;  %v1415_v40 = vmul.f32 0.7978846, %v1351_v23  ;;  %v1610_v25 = vmul.f32 %v1546_v2, %v1098_v33  ;;  %v1227_v7 = vmul.f32 %v1163_v28, %v4081_v22 }
 0x166   : > { %v4286_v13 = vadd.f32 %v1045_v50, %v957_v4  ;;  %v1373_v21 = vadd.f32 %v1309_v42, %v4260_v24  ;;  %v1352_v50 = vadd.f32 %v1288_v30, %v4070_v6  ;;  %v1231_v14 = vmul.f32 %v1167_v29, %v4279_v60 }
 0x167   : > { %v766_v32 = vadd.f32 %v4138_v16, %v4017_v31  ;;  %v4322_v33 = vmul.f32 %v1536_v41, %v1088_v3  ;;  %v4325_v28 = vadd.f32 %v4123_v36, %v939_v27  ;;  %v944_v16 = vadd.f32 %v4159_v57, %v4024_v43 }
 0x168   : > { %v3461_v8 = vpop.eup %3460  ;;  %v1182_v5 = vmul.f32 0.044715, %v4286_v13  ;;  %v1437_v35 = vmul.f32 0.7978846, %v1373_v21  ;;  %v1164_v29 = vmul.f32 0.044715, %v4092_v44  ;;  %v1295_v3 = vmul.f32 %v1231_v14, %v4279_v60 }
 0x169   : > { %v3463_v34 = vpop.eup %3462  ;;  %v1562_v59 = vadd.f32 1.0, %v3461_v8  ;;  %v4319_v8 = vmul.f32 0.5, %v4062_v55  ;;  %v4337_v41 = vadd.f32 %v4141_v19, %v766_v32  ;;  %v771_v57 = vadd.f32 %v4180_v52, %v4017_v31 }
 0x16a   : > { %v1246_v47 = vmul.f32 %v1182_v5, %v4286_v13  ;;  %3464 = vtanh.f32 %v1437_v35  ;;  %v1539_v11 = vadd.f32 1.0, %v3463_v34  ;;  %v1416_v34 = vmul.f32 0.7978846, %v1352_v50 }
 0x16b   : > { %v4305_v18 = vpop.f32.mrf.mxu2  ;;  %v1626_v4 = vmul.f32 %v1562_v59, %v1114_v46  ;;  %v783_v42 = vpop.f32.mrf.mxu0  ;;  %3466 = vtanh.f32 %v1412_v63  ;;  %v1291_v59 = vmul.f32 %v1227_v7, %v4081_v22  ;;  %v1117_v63 = vmul.f32 0.5, %v4260_v24 }
 0x16c   : > { %v1310_v10 = vmul.f32 %v1246_v47, %v4286_v13  ;;  %v4310_v53 = vpop.f32.mrf.mxu3  ;;  %v784_v23 = vadd.f32 %v783_v42, %v4017_v31  ;;  %v872_v21 = vpop.f32.mrf.mxu1  ;;  %3468 = vtanh.f32 %v1415_v40  ;;  %v4332_v35 = vmul.f32 %v1539_v11, %v1091_v20  ;;  %v3271_v47 = vld [vmem:[#allocation8 + $0x14] sm:$0xf]  ;;  %v2953_v20 = vld [vmem:[#allocation8 + $0x18] sm:$0xf0] }
 0x16d   : > { %v4316_v2 = vadd.f32 %v1626_v4, %v1610_v25  ;;  %v1168_v27 = vmul.f32 0.044715, %v4325_v28  ;;  %v4345_v25 = vadd.f32 %v4162_v1, %v944_v16  ;;  %v2956_v50 = vor.u32 %v3271_v47, %v2953_v20 }
 0x16e   : > { %v1374_v30 = vadd.f32 %v1310_v10, %v4286_v13  ;;  %v4329_v5 = vadd.f32 %v872_v21, %v784_v23  ;;  %v4349_v10 = vmul.f32 0.5, %v4070_v6  ;;  %v1228_v52 = vmul.f32 %v1164_v29, %v4092_v44 }
 0x16f   : > { %v1355_v1 = vadd.f32 %v1291_v59, %v4081_v22  ;;  %v1171_v23 = vmul.f32 0.044715, %v4337_v41  ;;  %2011 = vmatpush.bf16.msrb.mxu2 %v2956_v50  ;;  %v1359_v6 = vadd.f32 %v1295_v3, %v4279_v60  ;;  %v4362_v16 = vadd.f32 %v4185_v62, %v771_v57 }
 0x170   : > { %v1438_v46 = vmul.f32 0.7978846, %v1374_v30  ;;  %v3465_v55 = vpop.eup %3464  ;;  %v1185_v36 = vmul.f32 0.044715, %v4329_v5  ;;  %v1232_v59 = vmul.f32 %v1168_v27, %v4325_v28  ;;  %v1292_v3 = vmul.f32 %v1228_v52, %v4092_v44 }
 0x171   : > { %v1565_v40 = vadd.f32 1.0, %v3465_v55  ;;  %v3467_v7 = vpop.eup %3466  ;;  %v3017_v55 = vld [vmem:[#allocation8 + $0x98] sm:$0xf0]  ;;  %v1419_v27 = vmul.f32 0.7978846, %v1355_v1  ;;  %v949_v1 = vadd.f32 %v4205_v38, %v4024_v43 }
 0x172   : > { %3470 = vtanh.f32 %v1438_v46  ;;  %v1249_v4 = vmul.f32 %v1185_v36, %v4329_v5  ;;  %v3469_v32 = vpop.eup %3468  ;;  %v3287_v46 = vld [vmem:[#allocation8 + $0x94] sm:$0xf]  ;;  %v1172_v36 = vmul.f32 0.044715, %v4345_v25  ;;  %v1540_v57 = vadd.f32 1.0, %v3467_v7 }
 0x173   : > { %v961_v19 = vpop.f32.mrf.mxu2  ;;  %v4353_v11 = vpop.f32.mrf.mxu0  ;;  %v1629_v14 = vmul.f32 %v1565_v40, %v1117_v63  ;;  %3472 = vtanh.f32 %v1416_v34  ;;  %v3020_v40 = vor.u32 %v3287_v46, %v3017_v55  ;;  %v1543_v20 = vadd.f32 1.0, %v3469_v32  ;;  %v2951_v32 = vld [vmem:[#allocation8 + $0x10] sm:$0xf] }
 0x174   : > { %v962_v24 = vadd.f32 %v961_v19, %v4024_v43  ;;  %v1050_v42 = vpop.f32.mrf.mxu3  ;;  %v1313_v21 = vmul.f32 %v1249_v4, %v4329_v5  ;;  %v4358_v30 = vpop.f32.mrf.mxu1  ;;  %v1235_v4 = vmul.f32 %v1171_v23, %v4337_v41  ;;  %v1118_v19 = vmul.f32 0.5, %v4286_v13  ;;  %v3272_v23 = vld [vmem:[#allocation8 + $0x14] sm:$0xf0]  ;;  %v3015_v13 = vld [vmem:[#allocation8 + $0x90] sm:$0xf] }
 0x175   : > { %v4367_v34 = vadd.f32 %v4146_v26, %v1629_v14  ;;  %2040 = vmatpush.bf16.msrb.mxu3 %v3020_v40  ;;  %v1296_v52 = vmul.f32 %v1232_v59, %v4325_v28  ;;  %v1236_v46 = vmul.f32 %v1172_v36, %v4345_v25  ;;  %v2952_v59 = vor.u32 %v3272_v23, %v2951_v32 }
 0x176   : > { %v4364_v29 = vadd.f32 %v1050_v42, %v962_v24  ;;  %v1377_v63 = vadd.f32 %v1313_v21, %v4329_v5  ;;  %v1423_v24 = vmul.f32 0.7978846, %v1359_v6  ;;  %v1175_v42 = vmul.f32 0.044715, %v4362_v16 }
 0x177   : > { %4968 = vst [vmem:[#allocation18_spill] sm:$0xff] %v4367_v34  ;;  %v1299_v36 = vmul.f32 %v1235_v4, %v4337_v41  ;;  %1953 = vmatpush.bf16.msrb.mxu0 %v2952_v59  ;;  %v1300_v4 = vmul.f32 %v1236_v46, %v4345_v25  ;;  %v781_v32 = vadd.f32 %v4274_v61, %v4017_v31 }
 0x178   : > { %v3471_v47 = vpop.eup %3470  ;;  %v1186_v62 = vmul.f32 0.044715, %v4364_v29  ;;  %v1441_v50 = vmul.f32 0.7978846, %v1377_v63  ;;  %v1356_v63 = vadd.f32 %v1292_v3, %v4092_v44  ;;  %v1239_v3 = vmul.f32 %v1175_v42, %v4362_v16 }
 0x179   : > { %v1566_v26 = vadd.f32 1.0, %v3471_v47  ;;  %v3473_v21 = vpop.eup %3472  ;;  %v4408_v42 = vmul.f32 %v1543_v20, %v4319_v8  ;;  %v4416_v8 = vadd.f32 %v4282_v17, %v781_v32 }
 0x17a   : > { %v1250_v14 = vmul.f32 %v1186_v62, %v4364_v29  ;;  %3474 = vtanh.f32 %v1441_v50  ;;  %v3288_v62 = vld [vmem:[#allocation8 + $0x94] sm:$0xf0]  ;;  %v1303_v61 = vmul.f32 %v1239_v3, %v4362_v16 }
 0x17b   : > { %v4380_v7 = vpop.f32.mrf.mxu2  ;;  %v1630_v55 = vmul.f32 %v1566_v26, %v1118_v19  ;;  %v788_v47 = vpop.f32.mrf.mxu0  ;;  %v3016_v34 = vor.u32 %v3288_v62, %v3015_v13  ;;  %3476 = vtanh.f32 %v1423_v24  ;;  %v4396_v26 = vmul.f32 %v1540_v57, %v4291_v9 }
 0x17c   : > { %v1314_v6 = vmul.f32 %v1250_v14, %v4364_v29  ;;  %v4386_v40 = vpop.f32.mrf.mxu3  ;;  %v789_v50 = vadd.f32 %v788_v47, %v4017_v31  ;;  %v877_v22 = vpop.f32.mrf.mxu1  ;;  %v1360_v14 = vadd.f32 %v1296_v52, %v4325_v28  ;;  %v1544_v13 = vadd.f32 1.0, %v3473_v21 }
 0x17d   : > { %v4391_v19 = vadd.f32 %v4165_v48, %v1630_v55  ;;  %1982 = vmatpush.bf16.msrb.mxu1 %v3016_v34  ;;  %v4405_v48 = vadd.f32 %v4209_v49, %v949_v1  ;;  %3478 = vtanh.f32 %v1419_v27  ;;  %v1420_v57 = vmul.f32 0.7978846, %v1356_v63 }
 0x17e   : > { %v1378_v38 = vadd.f32 %v1314_v6, %v4364_v29  ;;  %v4402_v23 = vadd.f32 %v877_v22, %v789_v50  ;;  %v1363_v52 = vadd.f32 %v1299_v36, %v4337_v41  ;;  %v1121_v22 = vmul.f32 0.5, %v4329_v5 }
 0x17f   : > { %v1424_v49 = vmul.f32 0.7978846, %v1360_v14  ;;  %v1364_v55 = vadd.f32 %v1300_v4, %v4345_v25  ;;  %v1176_v63 = vmul.f32 0.044715, %v4405_v48  ;;  %v959_v1 = vadd.f32 %v4305_v18, %v4024_v43 }
 0x180   : > { %v1442_v24 = vmul.f32 0.7978846, %v1378_v38  ;;  %v3475_v9 = vpop.eup %3474  ;;  %v1189_v46 = vmul.f32 0.044715, %v4402_v23  ;;  %v1103_v62 = vmul.f32 0.5, %v4279_v60  ;;  %v4430_v50 = vmul.f32 %v1544_v13, %v4349_v10 }
 0x181   : > { %v1569_v34 = vadd.f32 1.0, %v3475_v9  ;;  %v3477_v21 = vpop.eup %3476  ;;  %v1427_v3 = vmul.f32 0.7978846, %v1363_v52  ;;  %v1367_v38 = vadd.f32 %v1303_v61, %v4362_v16  ;;  %v1183_v60 = vmul.f32 0.044715, %v4416_v8 }
 0x182   : > { %3480 = vtanh.f32 %v1442_v24  ;;  %v1253_v20 = vmul.f32 %v1189_v46, %v4402_v23  ;;  %v1551_v32 = vadd.f32 1.0, %v3477_v21  ;;  %v1240_v10 = vmul.f32 %v1176_v63, %v4405_v48 }
 0x183   : > { %v966_v27 = vpop.f32.mrf.mxu2  ;;  %v4423_v5 = vpop.f32.mrf.mxu0  ;;  %v1633_v59 = vmul.f32 %v1569_v34, %v1121_v22  ;;  %3482 = vtanh.f32 %v1420_v57  ;;  %v1428_v57 = vmul.f32 0.7978846, %v1364_v55  ;;  %v4442_v13 = vadd.f32 %v4310_v53, %v959_v1 }
 0x184   : > { %v967_v6 = vadd.f32 %v966_v27, %v4024_v43  ;;  %v1055_v47 = vpop.f32.mrf.mxu3  ;;  %v1317_v17 = vmul.f32 %v1253_v20, %v4402_v23  ;;  %v4427_v36 = vpop.f32.mrf.mxu1  ;;  %3484 = vtanh.f32 %v1424_v49  ;;  %v1122_v61 = vmul.f32 0.5, %v4364_v29 }
 0x185   : > { %v4436_v14 = vadd.f32 %v4190_v0, %v1633_v59  ;;  %v3479_v4 = vpop.eup %3478  ;;  %v786_v0 = vadd.f32 %v4353_v11, %v4017_v31  ;;  %3486 = vtanh.f32 %v1427_v3  ;;  %v1431_v34 = vmul.f32 0.7978846, %v1367_v38 }
 0x186   : > { %v4433_v18 = vadd.f32 %v1055_v47, %v967_v6  ;;  %v1381_v24 = vadd.f32 %v1317_v17, %v4402_v23  ;;  %v4449_v20 = vadd.f32 1.0, %v3479_v4  ;;  %v776_v53 = vadd.f32 %v4230_v37, %v4017_v31 }
 0x187   : > { %v1247_v27 = vmul.f32 %v1183_v60, %v4416_v8  ;;  %v1184_v29 = vmul.f32 0.044715, %v4442_v13  ;;  %v1615_v47 = vmul.f32 %v1551_v32, %v1103_v62  ;;  %v1304_v17 = vmul.f32 %v1240_v10, %v4405_v48 }
 0x188   : > { %v3481_v9 = vpop.eup %3480  ;;  %v1190_v52 = vmul.f32 0.044715, %v4433_v18  ;;  %v1445_v46 = vmul.f32 0.7978846, %v1381_v24  ;;  %v4464_v37 = vadd.f32 %v4358_v30, %v786_v0  ;;  %v1104_v60 = vmul.f32 0.5, %v4325_v28 }
 0x189   : > { %v1570_v22 = vadd.f32 1.0, %v3481_v9  ;;  %v4451_v55 = vpop.eup %3482  ;;  %v964_v24 = vadd.f32 %v4380_v7, %v4024_v43  ;;  %v1107_v32 = vmul.f32 0.5, %v4337_v41  ;;  %v4476_v9 = vadd.f32 %v4234_v45, %v776_v53 }
 0x18a   : > { %v1254_v49 = vmul.f32 %v1190_v52, %v4433_v18  ;;  %4969 = vst [vmem:[#allocation19_spill] sm:$0xff] %v4451_v55  ;;  %3488 = vtanh.f32 %v1445_v46  ;;  %v3485_v59 = vpop.eup %3484  ;;  %v1311_v30 = vmul.f32 %v1247_v27, %v4416_v8  ;;  %v1248_v28 = vmul.f32 %v1184_v29, %v4442_v13 }
 0x18b   : > { %v4456_v21 = vpop.f32.mrf.mxu2  ;;  %v1634_v11 = vmul.f32 %v1570_v22, %v1122_v61  ;;  %3490 = vtanh.f32 %v1428_v57  ;;  %v793_v6 = vpop.f32.mrf.mxu0  ;;  %v4486_v7 = vadd.f32 %v1615_v47, %v4294_v12  ;;  %v1552_v46 = vadd.f32 1.0, %v3485_v59 }
 0x18c   : > { %v1318_v63 = vmul.f32 %v1254_v49, %v4433_v18  ;;  %v4460_v1 = vpop.f32.mrf.mxu3  ;;  %v794_v3 = vadd.f32 %v793_v6, %v4017_v31  ;;  %v882_v38 = vpop.f32.mrf.mxu1  ;;  %3492 = vtanh.f32 %v1431_v34  ;;  %v1368_v41 = vadd.f32 %v1304_v17, %v4405_v48  ;;  %v2945_v6 = vld [vmem:[#allocation8 + $0x8] sm:$0xf0] }
 0x18d   : > { %v4468_v4 = vadd.f32 %v4214_v58, %v1634_v11  ;;  %v3487_v10 = vpop.eup %3486  ;;  %v4482_v58 = vmul.f32 0.5, %v4345_v25  ;;  %v1187_v45 = vmul.f32 0.044715, %v4464_v37  ;;  %v4492_v34 = vadd.f32 %v4386_v40, %v964_v24 }
 0x18e   : > { %v1382_v62 = vadd.f32 %v1318_v63, %v4433_v18  ;;  %v4479_v57 = vadd.f32 %v882_v38, %v794_v3  ;;  %v1125_v25 = vmul.f32 0.5, %v4402_v23  ;;  %v1179_v53 = vmul.f32 0.044715, %v4476_v9  ;;  %v3269_v63 = vld [vmem:[#allocation8 + $0x4] sm:$0xf] }
 0x18f   : > { %v954_v12 = vadd.f32 %v4249_v54, %v4024_v43  ;;  %v1375_v27 = vadd.f32 %v1311_v30, %v4416_v8  ;;  %v1312_v40 = vmul.f32 %v1248_v28, %v4442_v13  ;;  %v2948_v3 = vor.u32 %v3269_v63, %v2945_v6 }
 0x190   : > { %v1446_v52 = vmul.f32 0.7978846, %v1382_v62  ;;  %v3489_v0 = vpop.eup %3488  ;;  %v1193_v61 = vmul.f32 0.044715, %v4479_v57  ;;  %v1251_v24 = vmul.f32 %v1187_v45, %v4464_v37  ;;  %v1616_v30 = vmul.f32 %v1552_v46, %v1104_v60 }
 0x191   : > { %v3491_v22 = vpop.eup %3490  ;;  %v1573_v49 = vadd.f32 1.0, %v3489_v0  ;;  %v1432_v0 = vmul.f32 0.7978846, %v1368_v41  ;;  %2012 = vmatpush.bf16.msrb.mxu2 %v2948_v3  ;;  %v4517_v63 = vadd.f32 %v4252_v39, %v954_v12  ;;  %v1439_v60 = vmul.f32 0.7978846, %v1375_v27 }
 0x192   : > { %3494 = vtanh.f32 %v1446_v52  ;;  %v1257_v11 = vmul.f32 %v1193_v61, %v4479_v57  ;;  %v3493_v47 = vpop.eup %3492  ;;  %v1555_v52 = vadd.f32 1.0, %v3487_v10  ;;  %v1188_v61 = vmul.f32 0.044715, %v4492_v34  ;;  %v2943_v39 = vld [vmem:[#allocation8] sm:$0xf] }
 0x193   : > { %v971_v29 = vpop.f32.mrf.mxu2  ;;  %v4502_v23 = vpop.f32.mrf.mxu0  ;;  %v1637_v38 = vmul.f32 %v1573_v49, %v1125_v25  ;;  %v1556_v45 = vadd.f32 1.0, %v3491_v22  ;;  %v1559_v49 = vadd.f32 1.0, %v3493_v47  ;;  %v1376_v10 = vadd.f32 %v1312_v40, %v4442_v13  ;;  %v3285_v47 = vld [vmem:[#allocation8 + $0x84] sm:$0xf] }
 0x194   : > { %v972_v59 = vadd.f32 %v971_v29, %v4024_v43  ;;  %v1060_v17 = vpop.f32.mrf.mxu3  ;;  %v1321_v54 = vmul.f32 %v1257_v11, %v4479_v57  ;;  %v4506_v62 = vpop.f32.mrf.mxu1  ;;  %v1243_v29 = vmul.f32 %v1179_v53, %v4476_v9  ;;  %v1315_v41 = vmul.f32 %v1251_v24, %v4464_v37  ;;  %v3007_v24 = vld [vmem:[#allocation8 + $0x80] sm:$0xf] }
 0x195   : > { %v4512_v28 = vadd.f32 %v4238_v51, %v1637_v38  ;;  %v1126_v51 = vmul.f32 0.5, %v4433_v18  ;;  %3496 = vtanh.f32 %v1432_v0  ;;  %v1252_v53 = vmul.f32 %v1188_v61, %v4492_v34  ;;  %v3270_v38 = vld [vmem:[#allocation8 + $0x4] sm:$0xf0] }
 0x196   : > { %v4509_v44 = vadd.f32 %v1060_v17, %v972_v59  ;;  %v1385_v25 = vadd.f32 %v1321_v54, %v4479_v57  ;;  %v3009_v17 = vld [vmem:[#allocation8 + $0x88] sm:$0xf0]  ;;  %v1619_v12 = vmul.f32 %v1555_v52, %v1107_v32  ;;  %v1307_v27 = vmul.f32 %v1243_v29, %v4476_v9  ;;  %v3286_v54 = vld [vmem:[#allocation8 + $0x84] sm:$0xf0] }
 0x197   : > { %v3012_v3 = vor.u32 %v3285_v47, %v3009_v17  ;;  %v1180_v0 = vmul.f32 0.044715, %v4517_v63  ;;  %v3008_v55 = vor.u32 %v3286_v54, %v3007_v24  ;;  %v1440_v32 = vmul.f32 0.7978846, %v1376_v10 }
 0x198   : > { %v3495_v11 = vpop.eup %3494  ;;  %v1194_v46 = vmul.f32 0.044715, %v4509_v44  ;;  %v1449_v6 = vmul.f32 0.7978846, %v1385_v25  ;;  %v1379_v52 = vadd.f32 %v1315_v41, %v4464_v37  ;;  %v4541_v17 = vadd.f32 %v1616_v30, %v4322_v33 }
 0x199   : > { %v1574_v59 = vadd.f32 1.0, %v3495_v11  ;;  %2041 = vmatpush.bf16.msrb.mxu3 %v3012_v3  ;;  %1983 = vmatpush.bf16.msrb.mxu1 %v3008_v55  ;;  %v1371_v10 = vadd.f32 %v1307_v27, %v4476_v9  ;;  %v791_v41 = vadd.f32 %v4423_v5, %v4017_v31  ;;  %v1620_v55 = vmul.f32 %v1556_v45, %v4482_v58 }
 0x19a   : > { %v1258_v22 = vmul.f32 %v1194_v46, %v4509_v44  ;;  %3498 = vtanh.f32 %v1449_v6  ;;  %v2944_v46 = vor.u32 %v3270_v38, %v2943_v39  ;;  %v1443_v30 = vmul.f32 0.7978846, %v1379_v52 }
 0x19b   : > { %v4526_v40 = vpop.f32.mrf.mxu2  ;;  %v1638_v18 = vmul.f32 %v1574_v59, %v1126_v51  ;;  %v798_v11 = vpop.f32.mrf.mxu0  ;;  %v1111_v51 = vmul.f32 0.5, %v4362_v16  ;;  %v1316_v59 = vmul.f32 %v1252_v53, %v4492_v34  ;;  %3500 = vtanh.f32 %v1439_v60 }
 0x19c   : > { %v1322_v61 = vmul.f32 %v1258_v22, %v4509_v44  ;;  %v4530_v25 = vpop.f32.mrf.mxu3  ;;  %v799_v29 = vadd.f32 %v798_v11, %v4017_v31  ;;  %v887_v6 = vpop.f32.mrf.mxu1  ;;  %1954 = vmatpush.bf16.msrb.mxu0 %v2944_v46  ;;  %v1244_v16 = vmul.f32 %v1180_v0, %v4517_v63  ;;  %v4550_v53 = vadd.f32 %v1619_v12, %v4332_v35 }
 0x19d   : > { %v4535_v47 = vadd.f32 %v4258_v15, %v1638_v18  ;;  %v3497_v15 = vpop.eup %3496  ;;  %3502 = vtanh.f32 %v1440_v32  ;;  %v1623_v60 = vmul.f32 %v1559_v49, %v1111_v51  ;;  %v1380_v27 = vadd.f32 %v1316_v59, %v4492_v34 }
 0x19e   : > { %v1386_v22 = vadd.f32 %v1322_v61, %v4509_v44  ;;  %v4546_v39 = vadd.f32 %v887_v6, %v799_v29  ;;  %v1129_v5 = vmul.f32 0.5, %v4479_v57  ;;  %v4557_v54 = vmul.f32 0.5, %v4405_v48 }
 0x19f   : > { %v1435_v18 = vmul.f32 0.7978846, %v1371_v10  ;;  %v4560_v35 = vadd.f32 %v4427_v36, %v791_v41  ;;  %v1308_v12 = vmul.f32 %v1244_v16, %v4517_v63  ;;  %v4566_v11 = vadd.f32 %v1620_v55, %v4396_v26 }
 0x1a0   : > { %v1450_v3 = vmul.f32 0.7978846, %v1386_v22  ;;  %v3499_v38 = vpop.eup %3498  ;;  %v1197_v33 = vmul.f32 0.044715, %v4546_v39  ;;  %v4571_v52 = vadd.f32 %v1623_v60, %v4408_v42  ;;  %v1444_v6 = vmul.f32 0.7978846, %v1380_v27 }
 0x1a1   : > { %v1577_v24 = vadd.f32 1.0, %v3499_v38  ;;  %v3501_v46 = vpop.eup %3500  ;;  %v1560_v51 = vadd.f32 1.0, %v3497_v15  ;;  %v1191_v22 = vmul.f32 0.044715, %v4560_v35  ;;  %v969_v42 = vadd.f32 %v4456_v21, %v4024_v43 }
 0x1a2   : > { %3504 = vtanh.f32 %v1450_v3  ;;  %v1261_v58 = vmul.f32 %v1197_v33, %v4546_v39  ;;  %v1372_v3 = vadd.f32 %v1308_v12, %v4517_v63  ;;  %v1567_v15 = vadd.f32 1.0, %v3501_v46 }
 0x1a3   : > { %v976_v45 = vpop.f32.mrf.mxu2  ;;  %v800_v61 = vpop.f32.mrf.mxu0  ;;  %v1641_v57 = vmul.f32 %v1577_v24, %v1129_v5  ;;  %3506 = vtanh.f32 %v1443_v30  ;;  %v1130_v33 = vmul.f32 0.5, %v4509_v44  ;;  %v1119_v60 = vmul.f32 0.5, %v4416_v8 }
 0x1a4   : > { %v977_v49 = vadd.f32 %v976_v45, %v4024_v43  ;;  %v1065_v0 = vpop.f32.mrf.mxu3  ;;  %v1325_v48 = vmul.f32 %v1261_v58, %v4546_v39  ;;  %v801_v32 = vadd.f32 %v800_v61, %v4017_v31  ;;  %v889_v36 = vpop.f32.mrf.mxu1  ;;  %3508 = vtanh.f32 %v1435_v18 }
 0x1a5   : > { %v4576_v59 = vadd.f32 %v4288_v56, %v1641_v57  ;;  %v3503_v26 = vpop.eup %3502  ;;  %3510 = vtanh.f32 %v1444_v6  ;;  %v1255_v18 = vmul.f32 %v1191_v22, %v4560_v35  ;;  %v1120_v12 = vmul.f32 0.5, %v4442_v13 }
 0x1a6   : > { %v4573_v29 = vadd.f32 %v1065_v0, %v977_v49  ;;  %v1389_v10 = vadd.f32 %v1325_v48, %v4546_v39  ;;  %v4580_v41 = vadd.f32 %v889_v36, %v801_v32  ;;  %v1568_v5 = vadd.f32 1.0, %v3503_v26 }
 0x1a7   : > { %v1631_v61 = vmul.f32 %v1567_v15, %v1119_v60  ;;  %v4598_v46 = vadd.f32 %v4460_v1, %v969_v42  ;;  %v4605_v13 = vmul.f32 0.7978846, %v1372_v3  ;;  %v4617_v3 = vmul.f32 %v1560_v51, %v4557_v54 }
 0x1a8   : > { %v3505_v16 = vpop.eup %3504  ;;  %v1198_v55 = vmul.f32 0.044715, %v4573_v29  ;;  %v1453_v38 = vmul.f32 0.7978846, %v1389_v10  ;;  %v1199_v56 = vmul.f32 0.044715, %v4580_v41 }
 0x1a9   : > { %v1578_v30 = vadd.f32 1.0, %v3505_v16  ;;  %v3507_v24 = vpop.eup %3506  ;;  %v1319_v16 = vmul.f32 %v1255_v18, %v4560_v35 }
 0x1aa   : > { %v1262_v27 = vmul.f32 %v1198_v55, %v4573_v29  ;;  %3512 = vtanh.f32 %v1453_v38  ;;  %v1263_v21 = vmul.f32 %v1199_v56, %v4580_v41  ;;  %v4595_v57 = vpop.eup %3508  ;;  %v1571_v10 = vadd.f32 1.0, %v3507_v24 }
 0x1ab   : > { %v978_v58 = vpop.f32.mrf.mxu2  ;;  %v1642_v45 = vmul.f32 %v1578_v30, %v1130_v33  ;;  %v803_v8 = vpop.f32.mrf.mxu0  ;;  %v1632_v55 = vmul.f32 %v1568_v5, %v1120_v12  ;;  %v1192_v30 = vmul.f32 0.044715, %v4598_v46  ;;  %v1695_v24 = vadd.f32 %v4486_v7, %v1631_v61 }
 0x1ac   : > { %v1326_v49 = vmul.f32 %v1262_v27, %v4573_v29  ;;  %v979_v44 = vadd.f32 %v978_v58, %v4024_v43  ;;  %v1067_v0 = vpop.f32.mrf.mxu3  ;;  %v1327_v48 = vmul.f32 %v1263_v21, %v4580_v41  ;;  %v804_v32 = vadd.f32 %v803_v8, %v4017_v31  ;;  %v892_v36 = vpop.f32.mrf.mxu1 }
 0x1ad   : > { %v4603_v6 = vadd.f32 %v4316_v2, %v1642_v45  ;;  %v3511_v15 = vpop.eup %3510  ;;  %v1123_v2 = vmul.f32 0.5, %v4464_v37  ;;  %v1124_v21 = vmul.f32 0.5, %v4492_v34  ;;  %v1383_v58 = vadd.f32 %v1319_v16, %v4560_v35 }
 0x1ae   : > { %v1390_v26 = vadd.f32 %v1326_v49, %v4573_v29  ;;  %v4608_v22 = vadd.f32 %v1067_v0, %v979_v44  ;;  %v1391_v1 = vadd.f32 %v1327_v48, %v4580_v41  ;;  %v4612_v42 = vadd.f32 %v892_v36, %v804_v32 }
 0x1af   : > { %v1635_v18 = vmul.f32 %v1571_v10, %v1123_v2  ;;  %v4627_v51 = vadd.f32 %v4541_v17, %v1632_v55  ;;  %v1572_v0 = vadd.f32 1.0, %v3511_v15  ;;  %v1256_v8 = vmul.f32 %v1192_v30, %v4598_v46 }
 0x1b0   : > { %v1454_v38 = vmul.f32 0.7978846, %v1390_v26  ;;  %v1200_v56 = vmul.f32 0.044715, %v4608_v22  ;;  %v3513_v33 = vpop.eup %3512  ;;  %v1455_v60 = vmul.f32 0.7978846, %v1391_v1 }
 0x1b1   : > { %v1201_v27 = vmul.f32 0.044715, %v4612_v42  ;;  %v1581_v44 = vadd.f32 1.0, %v3513_v33  ;;  %v4635_v32 = vmul.f32 0.5, %v4560_v35  ;;  %v1133_v17 = vmul.f32 0.5, %v4546_v39 }
 0x1b2   : > { %3514 = vtanh.f32 %v1454_v38  ;;  %v1264_v5 = vmul.f32 %v1200_v56, %v4608_v22  ;;  %v4642_v10 = vadd.f32 %v4550_v53, %v1635_v18  ;;  %v1447_v55 = vmul.f32 0.7978846, %v1383_v58 }
 0x1b3   : > { %3516 = vtanh.f32 %v1455_v60  ;;  %v1265_v37 = vmul.f32 %v1201_v27, %v4612_v42  ;;  %v981_v54 = vpop.f32.mrf.mxu2  ;;  %v805_v49 = vpop.f32.mrf.mxu0  ;;  %v4648_v15 = vmul.f32 0.5, %v4598_v46  ;;  %v1645_v39 = vmul.f32 %v1581_v44, %v1133_v17 }
 0x1b4   : > { %v1328_v45 = vmul.f32 %v1264_v5, %v4608_v22  ;;  %v982_v12 = vadd.f32 %v981_v54, %v4024_v43  ;;  %v1070_v7 = vpop.f32.mrf.mxu3  ;;  %v806_v61 = vadd.f32 %v805_v49, %v4017_v31  ;;  %v894_v48 = vpop.f32.mrf.mxu1  ;;  %v4651_v2 = vmul.f32 %v1572_v0, %v1124_v21  ;;  %v4970_v0 = vld [vmem:[#allocation18_spill] sm:$0xff] }
 0x1b5   : > { %v1329_v34 = vmul.f32 %v1265_v37, %v4612_v42  ;;  %v1320_v30 = vmul.f32 %v1256_v8, %v4598_v46  ;;  %v1135_v53 = vmul.f32 0.5, %v4580_v41  ;;  %v796_v37 = vadd.f32 %v4502_v23, %v4017_v31 }
 0x1b6   : > { %v1392_v36 = vadd.f32 %v1328_v45, %v4608_v22  ;;  %v4639_v26 = vadd.f32 %v1070_v7, %v982_v12  ;;  %v4645_v1 = vadd.f32 %v894_v48, %v806_v61  ;;  %v1134_v54 = vmul.f32 0.5, %v4573_v29 }
 0x1b7   : > { %v1393_v16 = vadd.f32 %v1329_v34, %v4612_v42  ;;  %v1709_v8 = vadd.f32 %v4970_v0, %v1645_v39  ;;  %v1384_v34 = vadd.f32 %v1320_v30, %v4598_v46 }
 0x1b8   : > { %v3515_v38 = vpop.eup %3514  ;;  %v1456_v35 = vmul.f32 0.7978846, %v1392_v36  ;;  %v1202_v56 = vmul.f32 0.044715, %v4639_v26  ;;  %v1203_v60 = vmul.f32 0.044715, %v4645_v1 }
 0x1b9   : > { %v3517_v33 = vpop.eup %3516  ;;  %v1457_v27 = vmul.f32 0.7978846, %v1393_v16  ;;  %v1582_v58 = vadd.f32 1.0, %v3515_v38  ;;  %v4671_v38 = vadd.f32 %v4506_v62, %v796_v37 }
 0x1ba   : > { %3518 = vtanh.f32 %v1456_v35  ;;  %v1266_v5 = vmul.f32 %v1202_v56, %v4639_v26  ;;  %v1583_v18 = vadd.f32 1.0, %v3517_v33  ;;  %v1267_v21 = vmul.f32 %v1203_v60, %v4645_v1 }
 0x1bb   : > { %v983_v45 = vpop.f32.mrf.mxu2  ;;  %3520 = vtanh.f32 %v1457_v27  ;;  %v808_v49 = vpop.f32.mrf.mxu0  ;;  %v1646_v16 = vmul.f32 %v1582_v58, %v1134_v54  ;;  %v974_v35 = vadd.f32 %v4526_v40, %v4024_v43 }
 0x1bc   : > { %v1330_v12 = vmul.f32 %v1266_v5, %v4639_v26  ;;  %v984_v41 = vadd.f32 %v983_v45, %v4024_v43  ;;  %v1072_v7 = vpop.f32.mrf.mxu3  ;;  %v1647_v44 = vmul.f32 %v1583_v18, %v1135_v53  ;;  %v1331_v61 = vmul.f32 %v1267_v21, %v4645_v1  ;;  %v897_v29 = vpop.f32.mrf.mxu1 }
 0x1bd   : > { %v809_v23 = vadd.f32 %v808_v49, %v4017_v31  ;;  %3522 = vtanh.f32 %v1447_v55  ;;  %v1725_v55 = vmul.f32 0.25, %v1709_v8  ;;  %v1710_v58 = vadd.f32 %v4391_v19, %v1646_v16 }
 0x1be   : > { %v1394_v48 = vadd.f32 %v1330_v12, %v4639_v26  ;;  %v4668_v17 = vadd.f32 %v1072_v7, %v984_v41  ;;  %v1711_v36 = vadd.f32 %v1695_v24, %v1647_v44  ;;  %v1395_v46 = vadd.f32 %v1331_v61, %v4645_v1 }
 0x1bf   : > { %v4676_v56 = vadd.f32 %v897_v29, %v809_v23  ;;  %v1136_v24 = vmul.f32 0.5, %v4608_v22  ;;  %v1195_v22 = vmul.f32 0.044715, %v4671_v38  ;;  %v1448_v19 = vmul.f32 0.7978846, %v1384_v34 }
 0x1c0   : > { %v3519_v39 = vpop.eup %3518  ;;  %v1204_v33 = vmul.f32 0.044715, %v4668_v17  ;;  %v1727_v30 = vmul.f32 0.25, %v1711_v36  ;;  %v1458_v53 = vmul.f32 0.7978846, %v1394_v48  ;;  %v1137_v29 = vmul.f32 0.5, %v4612_v42 }
 0x1c1   : > { %v3521_v60 = vpop.eup %3520  ;;  %v1205_v27 = vmul.f32 0.044715, %v4676_v56  ;;  %v1584_v62 = vadd.f32 1.0, %v3519_v39  ;;  %v1459_v5 = vmul.f32 0.7978846, %v1395_v46  ;;  %v4694_v48 = vadd.f32 %v4530_v25, %v974_v35 }
 0x1c2   : > { %v1268_v18 = vmul.f32 %v1204_v33, %v4668_v17  ;;  %v1741_v40 = vpack.c.bf16 %v1727_v30, %v1725_v55  ;;  %3524 = vtanh.f32 %v1458_v53  ;;  %v1585_v12 = vadd.f32 1.0, %v3521_v60 }
 0x1c3   : > { %v4683_v37 = vpop.eup %3522  ;;  %v1269_v54 = vmul.f32 %v1205_v27, %v4676_v56  ;;  %v986_v21 = vpop.f32.mrf.mxu2  ;;  %v1648_v45 = vmul.f32 %v1584_v62, %v1136_v24  ;;  %3526 = vtanh.f32 %v1459_v5  ;;  %v1726_v46 = vmul.f32 0.25, %v1710_v58 }
 0x1c4   : > { %v1332_v41 = vmul.f32 %v1268_v18, %v4668_v17  ;;  %v987_v7 = vadd.f32 %v986_v21, %v4024_v43  ;;  %v1075_v49 = vpop.f32.mrf.mxu3  ;;  %v810_v44 = vpop.f32.mrf.mxu0  ;;  %1955 = vmatmul.bf16.vlgmr.msrb.gmra.mxu0 %v1741_v40  ;;  %2013 = vmatmul.bf16.vlgmr.msrb.gmra.mxu2 %v1741_v40  ;;  %v1649_v55 = vmul.f32 %v1585_v12, %v1137_v29  ;;  %3528 = vtanh.f32 %v1448_v19 }
 0x1c5   : > { %v1333_v0 = vmul.f32 %v1269_v54, %v4676_v56  ;;  %v811_v8 = vadd.f32 %v810_v44, %v4017_v31  ;;  %v899_v61 = vpop.f32.mrf.mxu1  ;;  %v1712_v23 = vadd.f32 %v4627_v51, %v1648_v45  ;;  %v4705_v42 = vadd.f32 %v4566_v11, %v4651_v2 }
 0x1c6   : > { %v1396_v36 = vadd.f32 %v1332_v41, %v4668_v17  ;;  %v4697_v16 = vadd.f32 %v1075_v49, %v987_v7  ;;  %v1259_v35 = vmul.f32 %v1195_v22, %v4671_v38  ;;  %v1139_v27 = vmul.f32 0.5, %v4645_v1 }
 0x1c7   : > { %v1397_v39 = vadd.f32 %v1333_v0, %v4676_v56  ;;  %v4700_v34 = vadd.f32 %v899_v61, %v811_v8  ;;  %v1728_v33 = vmul.f32 0.25, %v1712_v23  ;;  %v1196_v40 = vmul.f32 0.044715, %v4694_v48 }
 0x1c8   : > { %v3525_v30 = vpop.eup %3524  ;;  %v1206_v53 = vmul.f32 0.044715, %v4697_v16  ;;  %v1460_v51 = vmul.f32 0.7978846, %v1396_v36  ;;  %v1713_v2 = vadd.f32 %v4436_v14, %v1649_v55  ;;  %v1323_v41 = vmul.f32 %v1259_v35, %v4671_v38 }
 0x1c9   : > { %v3527_v25 = vpop.eup %3526  ;;  %v1207_v60 = vmul.f32 0.044715, %v4700_v34  ;;  %v1742_v24 = vpack.c.bf16 %v1728_v33, %v1726_v46  ;;  %v1461_v18 = vmul.f32 0.7978846, %v1397_v39  ;;  %v1586_v54 = vadd.f32 1.0, %v3525_v30 }
 0x1ca   : > { %v1270_v62 = vmul.f32 %v1206_v53, %v4697_v16  ;;  %v1587_v5 = vadd.f32 1.0, %v3527_v25  ;;  %3530 = vtanh.f32 %v1460_v51  ;;  %v1138_v19 = vmul.f32 0.5, %v4639_v26  ;;  %v3529_v0 = vpop.eup %3528 }
 0x1cb   : > { %v1271_v58 = vmul.f32 %v1207_v60, %v4700_v34  ;;  %v988_v11 = vpop.f32.mrf.mxu2  ;;  %1984 = vmatmul.bf16.vlgmr.msrb.gmra.mxu1 %v1742_v24  ;;  %2042 = vmatmul.bf16.vlgmr.msrb.gmra.mxu3 %v1742_v24  ;;  %3532 = vtanh.f32 %v1461_v18  ;;  %v1575_v23 = vadd.f32 1.0, %v4683_v37  ;;  %v1260_v29 = vmul.f32 %v1196_v40, %v4694_v48 }
 0x1cc   : > { %v1334_v21 = vmul.f32 %v1270_v62, %v4697_v16  ;;  %v989_v45 = vadd.f32 %v988_v11, %v4024_v43  ;;  %v1077_v1 = vpop.f32.mrf.mxu3  ;;  %v813_v12 = vpop.f32.mrf.mxu0  ;;  %v1651_v22 = vmul.f32 %v1587_v5, %v1139_v27  ;;  %v1650_v39 = vmul.f32 %v1586_v54, %v1138_v19 }
 0x1cd   : > { %v1335_v7 = vmul.f32 %v1271_v58, %v4700_v34  ;;  %v814_v49 = vadd.f32 %v813_v12, %v4017_v31  ;;  %v902_v44 = vpop.f32.mrf.mxu1  ;;  %v1729_v26 = vmul.f32 0.25, %v1713_v2  ;;  %v1140_v25 = vmul.f32 0.5, %v4668_v17 }
 0x1ce   : > { %v1398_v14 = vadd.f32 %v1334_v21, %v4697_v16  ;;  %v4721_v8 = vadd.f32 %v1077_v1, %v989_v45  ;;  %v1715_v61 = vadd.f32 %v4642_v10, %v1651_v22  ;;  %v1387_v60 = vadd.f32 %v1323_v41, %v4671_v38 }
 0x1cf   : > { %v1399_v36 = vadd.f32 %v1335_v7, %v4700_v34  ;;  %v4727_v46 = vadd.f32 %v902_v44, %v814_v49  ;;  %v1714_v40 = vadd.f32 %v4468_v4, %v1650_v39  ;;  %v1639_v21 = vmul.f32 %v1575_v23, %v4635_v32 }
 0x1d0   : > { %v3531_v33 = vpop.eup %3530  ;;  %v1208_v55 = vmul.f32 0.044715, %v4721_v8  ;;  %v1731_v30 = vmul.f32 0.25, %v1715_v61  ;;  %v1462_v53 = vmul.f32 0.7978846, %v1398_v14  ;;  %v1324_v45 = vmul.f32 %v1260_v29, %v4694_v48 }
 0x1d1   : > { %v1209_v51 = vmul.f32 0.044715, %v4727_v46  ;;  %v1588_v10 = vadd.f32 1.0, %v3531_v33  ;;  %v1463_v35 = vmul.f32 0.7978846, %v1399_v36  ;;  %v3533_v37 = vpop.eup %3532  ;;  %v1141_v49 = vmul.f32 0.5, %v4676_v56 }
 0x1d2   : > { %v1272_v24 = vmul.f32 %v1208_v55, %v4721_v8  ;;  %v1743_v27 = vpack.c.bf16 %v1731_v30, %v1729_v26  ;;  %3534 = vtanh.f32 %v1462_v53  ;;  %v1589_v54 = vadd.f32 1.0, %v3533_v37 }
 0x1d3   : > { %v1273_v62 = vmul.f32 %v1209_v51, %v4727_v46  ;;  %v991_v5 = vpop.f32.mrf.mxu2  ;;  %v1652_v18 = vmul.f32 %v1588_v10, %v1140_v25  ;;  %3536 = vtanh.f32 %v1463_v35  ;;  %v1451_v44 = vmul.f32 0.7978846, %v1387_v60 }
 0x1d4   : > { %v1336_v58 = vmul.f32 %v1272_v24, %v4721_v8  ;;  %v992_v17 = vadd.f32 %v991_v5, %v4024_v43  ;;  %v1080_v11 = vpop.f32.mrf.mxu3  ;;  %v815_v2 = vpop.f32.mrf.mxu0  ;;  %1960 = vmatmul.bf16.gmra.mxu0 %v1743_v27  ;;  %2018 = vmatmul.bf16.gmra.mxu2 %v1743_v27  ;;  %v1730_v32 = vmul.f32 0.25, %v1714_v40  ;;  %v1388_v33 = vadd.f32 %v1324_v45, %v4694_v48 }
 0x1d5   : > { %v1337_v1 = vmul.f32 %v1273_v62, %v4727_v46  ;;  %v816_v12 = vadd.f32 %v815_v2, %v4017_v31  ;;  %v1716_v4 = vadd.f32 %v4705_v42, %v1652_v18  ;;  %v904_v7 = vpop.f32.mrf.mxu1  ;;  %v1653_v31 = vmul.f32 %v1589_v54, %v1141_v49 }
 0x1d6   : > { %v1400_v22 = vadd.f32 %v1336_v58, %v4721_v8  ;;  %v4744_v41 = vadd.f32 %v1080_v11, %v992_v17  ;;  %v1703_v42 = vadd.f32 %v4571_v52, %v1639_v21  ;;  %v1576_v26 = vadd.f32 1.0, %v3529_v0 }
 0x1d7   : > { %v1401_v19 = vadd.f32 %v1337_v1, %v4727_v46  ;;  %v4748_v14 = vadd.f32 %v904_v7, %v816_v12  ;;  %v1732_v61 = vmul.f32 0.25, %v1716_v4  ;;  %v1143_v53 = vmul.f32 0.5, %v4700_v34 }
 0x1d8   : > { %v3535_v23 = vpop.eup %3534  ;;  %v1210_v29 = vmul.f32 0.044715, %v4744_v41  ;;  %v1464_v36 = vmul.f32 0.7978846, %v1400_v22  ;;  %v1717_v0 = vadd.f32 %v4512_v28, %v1653_v31  ;;  %v1142_v62 = vmul.f32 0.5, %v4697_v16 }
 0x1d9   : > { %v3537_v39 = vpop.eup %3536  ;;  %v1211_v55 = vmul.f32 0.044715, %v4748_v14  ;;  %v1744_v56 = vpack.c.bf16 %v1732_v61, %v1730_v32  ;;  %v1590_v52 = vadd.f32 1.0, %v3535_v23  ;;  %v1465_v35 = vmul.f32 0.7978846, %v1401_v19 }
 0x1da   : > { %v1274_v30 = vmul.f32 %v1210_v29, %v4744_v41  ;;  %v1591_v51 = vadd.f32 1.0, %v3537_v39  ;;  %3538 = vtanh.f32 %v1464_v36  ;;  %v1452_v5 = vmul.f32 0.7978846, %v1388_v33  ;;  %v4971_v29 = vld [vmem:[#allocation16_spill] sm:$0xff] }
 0x1db   : > { %v1275_v25 = vmul.f32 %v1211_v55, %v4748_v14  ;;  %v993_v10 = vpop.f32.mrf.mxu2  ;;  %1989 = vmatmul.bf16.gmra.mxu1 %v1744_v56  ;;  %2047 = vmatmul.bf16.gmra.mxu3 %v1744_v56  ;;  %3540 = vtanh.f32 %v1451_v44  ;;  %v1688_v17 = vadd.f32 %v4617_v3, %v4430_v50  ;;  %v1640_v28 = vmul.f32 %v1576_v26, %v4648_v15 }
 0x1dc   : > { %v1338_v37 = vmul.f32 %v1274_v30, %v4744_v41  ;;  %v994_v60 = vadd.f32 %v993_v10, %v4024_v43  ;;  %v1655_v24 = vmul.f32 %v1591_v51, %v1143_v53  ;;  %v1082_v34 = vpop.f32.mrf.mxu3  ;;  %3542 = vtanh.f32 %v1465_v35 }
 0x1dd   : > { %v1339_v27 = vmul.f32 %v1275_v25, %v4748_v14  ;;  %3544 = vtanh.f32 %v4605_v13  ;;  %v1654_v11 = vmul.f32 %v1590_v52, %v1142_v62  ;;  %v1733_v54 = vmul.f32 0.25, %v1717_v0 }
 0x1de   : > { %v1402_v18 = vadd.f32 %v1338_v37, %v4744_v41  ;;  %v4763_v40 = vadd.f32 %v1082_v34, %v994_v60  ;;  %v1719_v58 = vadd.f32 %v1703_v42, %v1655_v24  ;;  %v1144_v12 = vmul.f32 0.5, %v4721_v8 }
 0x1df   : > { %v1403_v43 = vadd.f32 %v1339_v27, %v4748_v14  ;;  %3546 = vtanh.f32 %v1452_v5  ;;  %v1563_v3 = vadd.f32 1.0, %v4595_v57  ;;  %v1704_v49 = vadd.f32 %v1688_v17, %v1640_v28  ;;  %v4973_v5 = vld [vmem:[#allocation17_spill] sm:$0xff] }
 0x1e0   : > { %v3539_v2 = vpop.eup %3538  ;;  %v1212_v16 = vmul.f32 0.044715, %v4763_v40  ;;  %v1735_v21 = vmul.f32 0.25, %v1719_v58  ;;  %v1466_v45 = vmul.f32 0.7978846, %v1402_v18  ;;  %v1718_v44 = vadd.f32 %v4535_v47, %v1654_v11 }
 0x1e1   : > { %v3541_v1 = vpop.eup %3540  ;;  %v1592_v4 = vadd.f32 1.0, %v3539_v2  ;;  %v1467_v22 = vmul.f32 0.7978846, %v1403_v43  ;;  %v1115_v19 = vmul.f32 0.5, %v4476_v9  ;;  %v1099_v31 = vmul.f32 0.5, %v4971_v29 }
 0x1e2   : > { %v1276_v50 = vmul.f32 %v1212_v16, %v4763_v40  ;;  %v1745_v13 = vpack.c.bf16 %v1735_v21, %v1733_v54  ;;  %3548 = vtanh.f32 %v1466_v45  ;;  %v3543_v15 = vpop.eup %3542  ;;  %v1579_v8 = vadd.f32 1.0, %v3541_v1 }
 0x1e3   : > { %v1656_v7 = vmul.f32 %v1592_v4, %v1144_v12  ;;  %3550 = vtanh.f32 %v1467_v22  ;;  %v1593_v61 = vadd.f32 1.0, %v3543_v15  ;;  %v3545_v23 = vpop.eup %3544  ;;  %v1131_v36 = vmul.f32 0.5, %v4671_v38 }
 0x1e4   : > { %v1340_v32 = vmul.f32 %v1276_v50, %v4763_v40  ;;  %1965 = vmatmul.bf16.gmra.mxu0 %v1745_v13  ;;  %2023 = vmatmul.bf16.gmra.mxu2 %v1745_v13  ;;  %v1145_v39 = vmul.f32 0.5, %v4727_v46  ;;  %v1627_v47 = vmul.f32 %v1563_v3, %v1115_v19  ;;  %v1734_v55 = vmul.f32 0.25, %v1718_v44  ;;  %v4972_v46 = vld [vmem:[#allocation19_spill] sm:$0xff] }
 0x1e5   : > { %v1720_v42 = vadd.f32 %v1704_v49, %v1656_v7  ;;  %v3547_v33 = vpop.eup %3546  ;;  %v1611_v26 = vmul.f32 %v4449_v20, %v1099_v31  ;;  %v1643_v30 = vmul.f32 %v1579_v8, %v1131_v36  ;;  %v1564_v52 = vadd.f32 1.0, %v3545_v23 }
 0x1e6   : > { %v1404_v57 = vadd.f32 %v1340_v32, %v4763_v40  ;;  %v1657_v53 = vmul.f32 %v1593_v61, %v1145_v39  ;;  %v1147_v35 = vmul.f32 0.5, %v4748_v14  ;;  %v1116_v38 = vmul.f32 0.5, %v4517_v63 }
 0x1e7   : > { %v1736_v9 = vmul.f32 0.25, %v1720_v42  ;;  %v1691_v60 = vadd.f32 %v1627_v47, %v1611_v26  ;;  %v1548_v24 = vadd.f32 1.0, %v4972_v46  ;;  %v1580_v0 = vadd.f32 1.0, %v3547_v33 }
 0x1e8   : > { %v3549_v56 = vpop.eup %3548  ;;  %v1468_v51 = vmul.f32 0.7978846, %v1404_v57  ;;  %v1721_v62 = vadd.f32 %v4576_v59, %v1657_v53  ;;  %v1100_v18 = vmul.f32 0.5, %v4973_v5  ;;  %v1132_v58 = vmul.f32 0.5, %v4694_v48 }
 0x1e9   : > { %v3551_v25 = vpop.eup %3550  ;;  %v1746_v10 = vpack.c.bf16 %v1736_v9, %v1734_v55  ;;  %v1594_v27 = vadd.f32 1.0, %v3549_v56  ;;  %v1707_v34 = vadd.f32 %v1691_v60, %v1643_v30  ;;  %v1146_v14 = vmul.f32 0.5, %v4744_v41 }
 0x1ea   : > { %v1595_v37 = vadd.f32 1.0, %v3551_v25  ;;  %3552 = vtanh.f32 %v1468_v51  ;;  %v1628_v17 = vmul.f32 %v1564_v52, %v1116_v38  ;;  %v1612_v28 = vmul.f32 %v1548_v24, %v1100_v18 }
 0x1eb   : > { %1994 = vmatmul.bf16.gmra.mxu1 %v1746_v10  ;;  %2052 = vmatmul.bf16.gmra.mxu3 %v1746_v10  ;;  %v1644_v63 = vmul.f32 %v1580_v0, %v1132_v58  ;;  %v1658_v11 = vmul.f32 %v1594_v27, %v1146_v14  ;;  %v1737_v16 = vmul.f32 0.25, %v1721_v62  ;;  %v1148_v21 = vmul.f32 0.5, %v4763_v40  ;;  %v1781_v40 = vld [vmem:[%s4951_s4] sm:$0x3] }
 0x1ec   : > { %v1659_v20 = vmul.f32 %v1595_v37, %v1147_v35  ;;  %v1692_v1 = vadd.f32 %v1628_v17, %v1612_v28  ;;  %v4794_v15 = vperm.slane %v1781_v40, 0  ;;  %v4796_v44 = vperm.slane %v1781_v40, 1 }
 0x1ed   : > { %v1722_v22 = vadd.f32 %v4603_v6, %v1658_v11 }
 0x1ee   : > { %v1723_v43 = vadd.f32 %v1707_v34, %v1659_v20  ;;  %v1708_v4 = vadd.f32 %v1692_v1, %v1644_v63  ;;  %v3129_v1 = vld [vmem:[#allocation10 + $0x78] sm:$0xf0] }
 0x1ef   : > { %v1738_v41 = vmul.f32 0.25, %v1722_v22  ;;  %v3193_v22 = vld [vmem:[#allocation10 + $0xf8] sm:$0xf0] }
 0x1f0   : > { %v3553_v2 = vpop.eup %3552  ;;  %v1739_v54 = vmul.f32 0.25, %v1723_v43 }
 0x1f1   : > { %v1596_v45 = vadd.f32 1.0, %v3553_v2 }
 0x1f2   : > { %v1747_v12 = vpack.c.bf16 %v1739_v54, %v1737_v16 }
 0x1f3   : > { %v1660_v59 = vmul.f32 %v1596_v45, %v1148_v21  ;;  %v3315_v45 = vld [vmem:[#allocation10 + $0x74] sm:$0xf] }
 0x1f4   : > { %1970 = vmatmul.bf16.gmra.mxu0 %v1747_v12  ;;  %2028 = vmatmul.bf16.gmra.mxu2 %v1747_v12  ;;  %v3331_v12 = vld [vmem:[#allocation10 + $0xf4] sm:$0xf] }
 0x1f5   : > { %v1724_v48 = vadd.f32 %v1708_v4, %v1660_v59  ;;  %v3132_v4 = vor.u32 %v3315_v45, %v3129_v1  ;;  %v3310_v1 = vld [vmem:[#allocation10 + $0x44] sm:$0xf0] }
 0x1f7   : > { %v1740_v50 = vmul.f32 0.25, %v1724_v48  ;;  %v3127_v48 = vld [vmem:[#allocation10 + $0x70] sm:$0xf]  ;;  %2465 = vmatpush.bf16.msra.mxu2 %v3132_v4 }
 0x1f9   : > { %v1748_v13 = vpack.c.bf16 %v1740_v50, %v1738_v41  ;;  %v3316_v41 = vld [vmem:[#allocation10 + $0x74] sm:$0xf0] }
 0x1fa   : > { %v3128_v40 = vor.u32 %v3316_v41, %v3127_v48 }
 0x1fb   : > { %1999 = vmatmul.bf16.gmra.mxu1 %v1748_v13  ;;  %2057 = vmatmul.bf16.gmra.mxu3 %v1748_v13 }
 0x1fc   : > { %2407 = vmatpush.bf16.msra.mxu0 %v3128_v40 }
 0x241   : > { %v1956_v3 = vpop.f32.mrf.mxu0 }
 0x242   : > { %v1957_v19 = vadd.f32 %v1956_v3, %v4794_v15  ;;  %v3196_v3 = vor.u32 %v3331_v12, %v3193_v22  ;;  %v3167_v12 = vld [vmem:[#allocation10 + $0xc0] sm:$0xf] }
 0x244   : > { %2494 = vmatpush.bf16.msra.mxu3 %v3196_v3 }
 0x247   : > { %v2014_v7 = vpop.f32.mrf.mxu2 }
 0x248   : > { %v1985_v49 = vpop.f32.mrf.mxu1  ;;  %v2015_v8 = vadd.f32 %v2014_v7, %v4796_v44  ;;  %v3191_v7 = vld [vmem:[#allocation10 + $0xf0] sm:$0xf] }
 0x249   : > { %v1958_v6 = vpop.f32.mrf.mxu0  ;;  %v4799_v32 = vadd.f32 %v1985_v49, %v1957_v19  ;;  %v3332_v49 = vld [vmem:[#allocation10 + $0xf4] sm:$0xf0] }
 0x24a   : > { %v1959_v39 = vadd.f32 %v1958_v6, %v4794_v15  ;;  %v3313_v6 = vld [vmem:[#allocation10 + $0x64] sm:$0xf] }
 0x24b   : > { %v2063_v57 = vmul.f32 %v4799_v32, %v4799_v32 }
 0x24e   : > { %v2043_v61 = vpop.f32.mrf.mxu3 }
 0x24f   : > { %v4802_v23 = vadd.f32 %v2043_v61, %v2015_v8  ;;  %v2016_v29 = vpop.f32.mrf.mxu2  ;;  %v3192_v8 = vor.u32 %v3332_v49, %v3191_v7  ;;  %v3121_v61 = vld [vmem:[#allocation10 + $0x68] sm:$0xf0] }
 0x250   : > { %v1987_v31 = vpop.f32.mrf.mxu1  ;;  %v2017_v55 = vadd.f32 %v2016_v29, %v4796_v44  ;;  %v3329_v29 = vld [vmem:[#allocation10 + $0xe4] sm:$0xf] }
 0x251   : > { %v1961_v42 = vpop.f32.mrf.mxu0  ;;  %v2064_v36 = vmul.f32 %v4802_v23, %v4802_v23  ;;  %v4809_v33 = vadd.f32 %v1987_v31, %v1959_v39  ;;  %v3185_v31 = vld [vmem:[#allocation10 + $0xe8] sm:$0xf0]  ;;  %v3119_v39 = vld [vmem:[#allocation10 + $0x60] sm:$0xf]  ;;  %2436 = vmatpush.bf16.msra.mxu1 %v3192_v8 }
 0x252   : > { %v1962_v10 = vadd.f32 %v1961_v42, %v4794_v15 }
 0x253   : > { %v2079_v47 = vadd.f32 %v2064_v36, %v2063_v57  ;;  %v2065_v53 = vmul.f32 %v4809_v33, %v4809_v33  ;;  %v3124_v36 = vor.u32 %v3313_v6, %v3121_v61 }
 0x255   : > { %2080 = vadd.xlane.f32.xlu0 %v2079_v47  ;;  %v3314_v47 = vld [vmem:[#allocation10 + $0x64] sm:$0xf0]  ;;  %2466 = vmatpush.bf16.msra.mxu2 %v3124_v36 }
 0x256   : > { %v2045_v9 = vpop.f32.mrf.mxu3 }
 0x257   : > { %v4812_v56 = vadd.f32 %v2045_v9, %v2017_v55  ;;  %v2019_v26 = vpop.f32.mrf.mxu2  ;;  %v3183_v55 = vld [vmem:[#allocation10 + $0xe0] sm:$0xf]  ;;  %v3188_v9 = vor.u32 %v3329_v29, %v3185_v31 }
 0x258   : > { %v1990_v30 = vpop.f32.mrf.mxu1  ;;  %v2020_v37 = vadd.f32 %v2019_v26, %v4796_v44  ;;  %v3120_v26 = vor.u32 %v3314_v47, %v3119_v39 }
 0x259   : > { %v2066_v51 = vmul.f32 %v4812_v56, %v4812_v56  ;;  %v1963_v25 = vpop.f32.mrf.mxu0  ;;  %v4819_v35 = vadd.f32 %v1990_v30, %v1962_v10  ;;  %v3330_v30 = vld [vmem:[#allocation10 + $0xe4] sm:$0xf0]  ;;  %2495 = vmatpush.bf16.msra.mxu3 %v3188_v9 }
 0x25a   : > { %v1964_v34 = vadd.f32 %v1963_v25, %v4794_v15  ;;  %2408 = vmatpush.bf16.msra.mxu0 %v3120_v26 }
 0x25b   : > { %v2082_v52 = vadd.f32 %v2066_v51, %v2065_v53  ;;  %v2067_v0 = vmul.f32 %v4819_v35, %v4819_v35  ;;  %v3311_v53 = vld [vmem:[#allocation10 + $0x54] sm:$0xf]  ;;  %v3113_v51 = vld [vmem:[#allocation10 + $0x58] sm:$0xf0] }
 0x25d   : > { %2083 = vadd.xlane.f32.xlu0 %v2082_v52  ;;  %v3184_v52 = vor.u32 %v3330_v30, %v3183_v55 }
 0x25e   : > { %v2048_v60 = vpop.f32.mrf.mxu3 }
 0x25f   : > { %v4822_v38 = vadd.f32 %v2048_v60, %v2020_v37  ;;  %v2021_v46 = vpop.f32.mrf.mxu2  ;;  %v3327_v37 = vld [vmem:[#allocation10 + $0xd4] sm:$0xf]  ;;  %v3177_v60 = vld [vmem:[#allocation10 + $0xd8] sm:$0xf0]  ;;  %2437 = vmatpush.bf16.msra.mxu1 %v3184_v52 }
 0x260   : > { %v1992_v24 = vpop.f32.mrf.mxu1  ;;  %v2022_v18 = vadd.f32 %v2021_v46, %v4796_v44  ;;  %v3111_v46 = vld [vmem:[#allocation10 + $0x50] sm:$0xf]  ;;  %v3307_v52 = vld [vmem:[#allocation10 + $0x34] sm:$0xf] }
 0x261   : > { %v2068_v27 = vmul.f32 %v4822_v38, %v4822_v38  ;;  %v1966_v20 = vpop.f32.mrf.mxu0  ;;  %v4829_v5 = vadd.f32 %v1992_v24, %v1964_v34  ;;  %v3116_v24 = vor.u32 %v3311_v53, %v3113_v51 }
 0x262   : > { %v1967_v11 = vadd.f32 %v1966_v20, %v4794_v15  ;;  %v3328_v20 = vld [vmem:[#allocation10 + $0xd4] sm:$0xf0] }
 0x263   : > { %v2085_v62 = vadd.f32 %v2068_v27, %v2067_v0  ;;  %v2069_v28 = vmul.f32 %v4829_v5, %v4829_v5  ;;  %v3312_v0 = vld [vmem:[#allocation10 + $0x54] sm:$0xf0]  ;;  %v3175_v27 = vld [vmem:[#allocation10 + $0xd0] sm:$0xf]  ;;  %2467 = vmatpush.bf16.msra.mxu2 %v3116_v24 }
 0x264   : > { %v3095_v24 = vld [vmem:[#allocation10 + $0x30] sm:$0xf] }
 0x265   : > { %2086 = vadd.xlane.f32.xlu1 %v2085_v62 }
 0x266   : > { %v2050_v58 = vpop.f32.mrf.mxu3 }
 0x267   : > { %v4832_v14 = vadd.f32 %v2050_v58, %v2022_v18  ;;  %v2024_v17 = vpop.f32.mrf.mxu2  ;;  %v3180_v18 = vor.u32 %v3327_v37, %v3177_v60  ;;  %v3309_v58 = vld [vmem:[#allocation10 + $0x44] sm:$0xf]  ;;  %v3097_v37 = vld [vmem:[#allocation10 + $0x38] sm:$0xf0] }
 0x268   : > { %v1995_v43 = vpop.f32.mrf.mxu1  ;;  %v2025_v21 = vadd.f32 %v2024_v17, %v4796_v44  ;;  %v3105_v17 = vld [vmem:[#allocation10 + $0x48] sm:$0xf0]  ;;  %v3100_v60 = vor.u32 %v3307_v52, %v3097_v37 }
 0x269   : > { %v2070_v63 = vmul.f32 %v4832_v14, %v4832_v14  ;;  %v1968_v16 = vpop.f32.mrf.mxu0  ;;  %v4839_v54 = vadd.f32 %v1995_v43, %v1967_v11  ;;  %v3176_v11 = vor.u32 %v3328_v20, %v3175_v27  ;;  %v3108_v48 = vor.u32 %v3309_v58, %v3105_v17  ;;  %2496 = vmatpush.bf16.msra.mxu3 %v3180_v18  ;;  %v3159_v20 = vld [vmem:[#allocation10 + $0xb0] sm:$0xf]  ;;  %v3305_v58 = vld [vmem:[#allocation10 + $0x24] sm:$0xf]  ;;  %v3089_v17 = vld [vmem:[#allocation10 + $0x28] sm:$0xf0] }
 0x26a   : > { %v1969_v25 = vadd.f32 %v1968_v16, %v4794_v15  ;;  %v3169_v16 = vld [vmem:[#allocation10 + $0xc8] sm:$0xf0] }
 0x26b   : > { %v2088_v2 = vadd.f32 %v2070_v63, %v2069_v28  ;;  %v2071_v42 = vmul.f32 %v4839_v54, %v4839_v54  ;;  %v3112_v63 = vor.u32 %v3312_v0, %v3111_v46  ;;  %2438 = vmatpush.bf16.msra.mxu1 %v3176_v11  ;;  %2468 = vmatpush.bf16.msra.mxu2 %v3108_v48  ;;  %v3161_v46 = vld [vmem:[#allocation10 + $0xb8] sm:$0xf0]  ;;  %v3308_v0 = vld [vmem:[#allocation10 + $0x34] sm:$0xf0]  ;;  %v3087_v11 = vld [vmem:[#allocation10 + $0x20] sm:$0xf] }
 0x26c   : > { %v3096_v27 = vor.u32 %v3308_v0, %v3095_v24  ;;  %v3319_v48 = vld [vmem:[#allocation10 + $0x94] sm:$0xf] }
 0x26d   : > { %2089 = vadd.xlane.f32.xlu1 %v2088_v2  ;;  %v3325_v2 = vld [vmem:[#allocation10 + $0xc4] sm:$0xf]  ;;  %2409 = vmatpush.bf16.msra.mxu0 %v3112_v63  ;;  %v3153_v63 = vld [vmem:[#allocation10 + $0xa8] sm:$0xf0] }
 0x26e   : > { %v2053_v59 = vpop.f32.mrf.mxu3  ;;  %v3172_v3 = vor.u32 %v3325_v2, %v3169_v16  ;;  %v3306_v2 = vld [vmem:[#allocation10 + $0x24] sm:$0xf0] }
 0x26f   : > { %v4842_v50 = vadd.f32 %v2053_v59, %v2025_v21  ;;  %v2026_v13 = vpop.f32.mrf.mxu2  ;;  %v3103_v21 = vld [vmem:[#allocation10 + $0x40] sm:$0xf]  ;;  %v3326_v59 = vld [vmem:[#allocation10 + $0xc4] sm:$0xf0]  ;;  %2469 = vmatpush.bf16.msra.mxu2 %v3100_v60 }
 0x270   : > { %v1997_v19 = vpop.f32.mrf.mxu1  ;;  %v2027_v62 = vadd.f32 %v2026_v13, %v4796_v44  ;;  %v3104_v40 = vor.u32 %v3310_v1, %v3103_v21  ;;  %v3168_v7 = vor.u32 %v3326_v59, %v3167_v12  ;;  %2497 = vmatpush.bf16.msra.mxu3 %v3172_v3  ;;  %v3088_v21 = vor.u32 %v3306_v2, %v3087_v11  ;;  %v3151_v1 = vld [vmem:[#allocation10 + $0xa0] sm:$0xf]  ;;  %v3322_v12 = vld [vmem:[#allocation10 + $0xa4] sm:$0xf0]  ;;  %v3079_v3 = vld [vmem:[#allocation10 + $0x10] sm:$0xf] }
 0x271   : > { %v2072_v57 = vmul.f32 %v4842_v50, %v4842_v50  ;;  %v4849_v34 = vadd.f32 %v1997_v19, %v1969_v25  ;;  %v1971_v43 = vpop.f32.mrf.mxu0  ;;  %v3152_v59 = vor.u32 %v3322_v12, %v3151_v1 }
 0x272   : > { %v1972_v49 = vadd.f32 %v1971_v43, %v4794_v15  ;;  %2410 = vmatpush.bf16.msra.mxu0 %v3104_v40  ;;  %2439 = vmatpush.bf16.msra.mxu1 %v3168_v7  ;;  %v3321_v43 = vld [vmem:[#allocation10 + $0xa4] sm:$0xf]  ;;  %v3304_v40 = vld [vmem:[#allocation10 + $0x14] sm:$0xf0] }
 0x273   : > { %v2091_v10 = vadd.f32 %v2072_v57, %v2071_v42  ;;  %v2073_v41 = vmul.f32 %v4849_v34, %v4849_v34  ;;  %v3156_v16 = vor.u32 %v3321_v43, %v3153_v63 }
 0x275   : > { %2092 = vadd.xlane.f32.xlu2 %v2091_v10 }
 0x276   : > { %v2055_v28 = vpop.f32.mrf.mxu3  ;;  %2411 = vmatpush.bf16.msra.mxu0 %v3096_v27 }
 0x277   : > { %v4852_v45 = vadd.f32 %v2055_v28, %v2027_v62  ;;  %v2029_v22 = vpop.f32.mrf.mxu2  ;;  %v3324_v62 = vld [vmem:[#allocation10 + $0xb4] sm:$0xf0]  ;;  %v3092_v28 = vor.u32 %v3305_v58, %v3089_v17 }
 0x278   : > { %v2000_v4 = vpop.f32.mrf.mxu1  ;;  %v2030_v8 = vadd.f32 %v2029_v22, %v4796_v44  ;;  %v3160_v18 = vor.u32 %v3324_v62, %v3159_v20  ;;  %v3081_v22 = vld [vmem:[#allocation10 + $0x18] sm:$0xf0] }
 0x279   : > { %v2074_v13 = vmul.f32 %v4852_v45, %v4852_v45  ;;  %v4859_v19 = vadd.f32 %v2000_v4, %v1972_v49  ;;  %v1973_v31 = vpop.f32.mrf.mxu0  ;;  %2470 = vmatpush.bf16.msra.mxu2 %v3092_v28  ;;  %v3303_v4 = vld [vmem:[#allocation10 + $0x14] sm:$0xf]  ;;  %v3080_v49 = vor.u32 %v3304_v40, %v3079_v3 }
 0x27a   : > { %v1974_v47 = vadd.f32 %v1973_v31, %v4794_v15  ;;  %v3323_v15 = vld [vmem:[#allocation10 + $0xb4] sm:$0xf]  ;;  %2440 = vmatpush.bf16.msra.mxu1 %v3160_v18  ;;  %2412 = vmatpush.bf16.msra.mxu0 %v3088_v21  ;;  %v3301_v31 = vld [vmem:[#allocation10 + $0x4] sm:$0xf] }
 0x27b   : > { %v2094_v6 = vadd.f32 %v2074_v13, %v2073_v41  ;;  %v2075_v42 = vmul.f32 %v4859_v19, %v4859_v19  ;;  %v3084_v41 = vor.u32 %v3303_v4, %v3081_v22  ;;  %v3145_v13 = vld [vmem:[#allocation10 + $0x98] sm:$0xf0] }
 0x27c   : > { %v3148_v7 = vor.u32 %v3319_v48, %v3145_v13 }
 0x27d   : > { %2095 = vadd.xlane.f32.xlu2 %v2094_v6  ;;  %v3143_v6 = vld [vmem:[#allocation10 + $0x90] sm:$0xf]  ;;  %2471 = vmatpush.bf16.msra.mxu2 %v3084_v41 }
 0x27e   : > { %v2058_v61 = vpop.f32.mrf.mxu3  ;;  %2441 = vmatpush.bf16.msra.mxu1 %v3152_v59  ;;  %2413 = vmatpush.bf16.msra.mxu0 %v3080_v49 }
 0x27f   : > { %v4862_v29 = vadd.f32 %v2058_v61, %v2030_v8  ;;  %v2031_v39 = vpop.f32.mrf.mxu2  ;;  %v3320_v8 = vld [vmem:[#allocation10 + $0x94] sm:$0xf0] }
 0x280   : > { %v2002_v36 = vpop.f32.mrf.mxu1  ;;  %v2032_v26 = vadd.f32 %v2031_v39, %v4796_v44  ;;  %v3164_v44 = vor.u32 %v3323_v15, %v3161_v46  ;;  %v3144_v61 = vor.u32 %v3320_v8, %v3143_v6  ;;  %v3137_v39 = vld [vmem:[#allocation10 + $0x88] sm:$0xf0] }
 0x281   : > { %v2076_v57 = vmul.f32 %v4862_v29, %v4862_v29  ;;  %v4869_v9 = vadd.f32 %v2002_v36, %v1974_v47  ;;  %v3071_v47 = vld [vmem:[#allocation10] sm:$0xf] }
 0x282   : > { %2498 = vmatpush.bf16.msra.mxu3 %v3164_v44  ;;  %2442 = vmatpush.bf16.msra.mxu1 %v3144_v61 }
 0x283   : > { %v2097_v55 = vadd.f32 %v2076_v57, %v2075_v42  ;;  %v2077_v51 = vmul.f32 %v4869_v9, %v4869_v9  ;;  %v3073_v42 = vld [vmem:[#allocation10 + $0x8] sm:$0xf0]  ;;  %v3317_v57 = vld [vmem:[#allocation10 + $0x84] sm:$0xf] }
 0x284   : > { %v3076_v36 = vor.u32 %v3301_v31, %v3073_v42 }
 0x285   : > { %2098 = vadd.xlane.f32.xlu0 %v2097_v55  ;;  %v3302_v55 = vld [vmem:[#allocation10 + $0x4] sm:$0xf0] }
 0x286   : > { %v2060_v30 = vpop.f32.mrf.mxu3  ;;  %2499 = vmatpush.bf16.msra.mxu3 %v3156_v16  ;;  %2472 = vmatpush.bf16.msra.mxu2 %v3076_v36 }
 0x287   : > { %v4872_v53 = vadd.f32 %v2060_v30, %v2032_v26  ;;  %v3140_v26 = vor.u32 %v3317_v57, %v3137_v39  ;;  %v3072_v30 = vor.u32 %v3302_v55, %v3071_v47 }
 0x289   : > { %v2078_v25 = vmul.f32 %v4872_v53, %v4872_v53  ;;  %2414 = vmatpush.bf16.msra.mxu0 %v3072_v30 }
 0x28a   : > { %2500 = vmatpush.bf16.msra.mxu3 %v3148_v7 }
 0x28b   : > { %v2100_v10 = vadd.f32 %v2078_v25, %v2077_v51  ;;  %v3135_v51 = vld [vmem:[#allocation10 + $0x80] sm:$0xf]  ;;  %v3318_v25 = vld [vmem:[#allocation10 + $0x84] sm:$0xf0] }
 0x28c   : > { %v3136_v52 = vor.u32 %v3318_v25, %v3135_v51 }
 0x28d   : > { %2101 = vadd.xlane.f32.xlu1 %v2100_v10 }
 0x28e   : > { %2501 = vmatpush.bf16.msra.mxu3 %v3140_v26  ;;  %2443 = vmatpush.bf16.msra.mxu1 %v3136_v52 }
 0x2c8   : > { %v2081_v10 = vpop.xlane.xlu0 %2080 }
 0x2c9   : > { %v2103_v37 = vadd.f32 1e-12, %v2081_v10 }
 0x2cb   : > { %3554 = vrsqrt.f32 %v2103_v37  ;;  %vm2117_vm1 = vweird.f32 %v2103_v37 }
 0x2d0   : > { %v2084_v15 = vpop.xlane.xlu0 %2083 }
 0x2d1   : > { %v3555_v60 = vpop.eup %3554  ;;  %v2104_v46 = vadd.f32 1e-12, %v2084_v15 }
 0x2d2   : > { %v2112_v24 = vmul.f32 %v3555_v60, %v2103_v37  ;;  %vm2118_vm0 = vweird.f32 %v3555_v60 }
 0x2d3   : > { %3556 = vrsqrt.f32 %v2104_v46  ;;  %vm2119_vm3 = vmor %vm2117_vm1, %vm2118_vm0  ;;  %vm2127_vm4 = vweird.f32 %v2104_v46 }
 0x2d4   : > { %v2113_v0 = vmul.f32 %v3555_v60, %v2112_v24 }
 0x2d6   : > { %v2114_v44 = vmul.f32 0.5, %v2113_v0 }
 0x2d8   : > { %v2087_v27 = vpop.xlane.xlu1 %2086  ;;  %v2115_v18 = vsub.f32 1.5, %v2114_v44 }
 0x2d9   : > { %v3557_v20 = vpop.eup %3556  ;;  %v2105_v62 = vadd.f32 1e-12, %v2087_v27 }
 0x2da   : > { %v2122_v58 = vmul.f32 %v3557_v20, %v2104_v46  ;;  %v2116_v43 = vmul.f32 %v3555_v60, %v2115_v18  ;;  %vm2128_vm2 = vweird.f32 %v3557_v20 }
 0x2db   : > { %3558 = vrsqrt.f32 %v2105_v62  ;;  %vm2129_vm5 = vmor %vm2127_vm4, %vm2128_vm2  ;;  %vm2137_vm7 = vweird.f32 %v2105_v62 }
 0x2dc   : > { %v2123_v17 = vmul.f32 %v3557_v20, %v2122_v58  ;;  %v2120_v21 = vsel %vm2119_vm3, %v3555_v60, %v2116_v43 }
 0x2dd   : > { %v2191_v22 = vmul.f32 %v2120_v21, %v4799_v32  ;;  %v2192_v48 = vmul.f32 %v2120_v21, %v4802_v23 }
 0x2de   : > { %v2124_v28 = vmul.f32 0.5, %v2123_v17 }
 0x2e0   : > { %v2125_v63 = vsub.f32 1.5, %v2124_v28  ;;  %v2090_v11 = vpop.xlane.xlu1 %2089 }
 0x2e1   : > { %v3559_v2 = vpop.eup %3558  ;;  %v2106_v16 = vadd.f32 1e-12, %v2090_v11 }
 0x2e2   : > { %v2126_v1 = vmul.f32 %v3557_v20, %v2125_v63  ;;  %v2132_v12 = vmul.f32 %v3559_v2, %v2105_v62  ;;  %vm2138_vm6 = vweird.f32 %v3559_v2 }
 0x2e3   : > { %3560 = vrsqrt.f32 %v2106_v16  ;;  %vm2139_vm9 = vmor %vm2137_vm7, %vm2138_vm6  ;;  %vm2147_vm10 = vweird.f32 %v2106_v16 }
 0x2e4   : > { %v2130_v59 = vsel %vm2129_vm5, %v3557_v20, %v2126_v1  ;;  %v2133_v4 = vmul.f32 %v3559_v2, %v2132_v12 }
 0x2e5   : > { %v2193_v41 = vmul.f32 %v2130_v59, %v4809_v33  ;;  %v2194_v13 = vmul.f32 %v2130_v59, %v4812_v56 }
 0x2e6   : > { %v2134_v3 = vmul.f32 0.5, %v2133_v4 }
 0x2e7   : > { %v2207_v40 = vpack.c.bf16 %v2193_v41, %v2191_v22  ;;  %v2208_v7 = vpack.c.bf16 %v2194_v13, %v2192_v48 }
 0x2e8   : > { %v2093_v49 = vpop.xlane.xlu2 %2092  ;;  %v2135_v61 = vsub.f32 1.5, %v2134_v3 }
 0x2e9   : > { %v3561_v6 = vpop.eup %3560  ;;  %v2107_v8 = vadd.f32 1e-12, %v2093_v49  ;;  %2415 = vmatmul.bf16.vlgmr.msra.gmra.mxu0 %v2207_v40  ;;  %2444 = vmatmul.bf16.vlgmr.msra.gmra.mxu1 %v2208_v7 }
 0x2ea   : > { %v2142_v31 = vmul.f32 %v3561_v6, %v2106_v16  ;;  %2473 = vmatmul.bf16.vlgmr.msra.gmra.mxu2 %v2207_v40  ;;  %2502 = vmatmul.bf16.vlgmr.msra.gmra.mxu3 %v2208_v7  ;;  %v2136_v42 = vmul.f32 %v3559_v2, %v2135_v61  ;;  %vm2148_vm8 = vweird.f32 %v3561_v6 }
 0x2eb   : > { %3562 = vrsqrt.f32 %v2107_v8  ;;  %vm2149_vm11 = vmor %vm2147_vm10, %vm2148_vm8  ;;  %vm2157_vm13 = vweird.f32 %v2107_v8 }
 0x2ec   : > { %v2143_v32 = vmul.f32 %v3561_v6, %v2142_v31  ;;  %v2140_v55 = vsel %vm2139_vm9, %v3559_v2, %v2136_v42 }
 0x2ed   : > { %v2195_v51 = vmul.f32 %v2140_v55, %v4819_v35  ;;  %v2196_v10 = vmul.f32 %v2140_v55, %v4822_v38 }
 0x2ee   : > { %v2144_v23 = vmul.f32 0.5, %v2143_v32 }
 0x2f0   : > { %v2145_v33 = vsub.f32 1.5, %v2144_v23  ;;  %v2096_v56 = vpop.xlane.xlu2 %2095 }
 0x2f1   : > { %v3563_v57 = vpop.eup %3562  ;;  %v2108_v36 = vadd.f32 1e-12, %v2096_v56 }
 0x2f2   : > { %v2146_v39 = vmul.f32 %v3561_v6, %v2145_v33  ;;  %v2152_v47 = vmul.f32 %v3563_v57, %v2107_v8  ;;  %vm2158_vm12 = vweird.f32 %v3563_v57 }
 0x2f3   : > { %3564 = vrsqrt.f32 %v2108_v36  ;;  %vm2159_vm15 = vmor %vm2157_vm13, %vm2158_vm12  ;;  %vm2167_vm0 = vweird.f32 %v2108_v36 }
 0x2f4   : > { %v2153_v26 = vmul.f32 %v3563_v57, %v2152_v47  ;;  %v2150_v30 = vsel %vm2149_vm11, %v3561_v6, %v2146_v39 }
 0x2f5   : > { %v2197_v25 = vmul.f32 %v2150_v30, %v4829_v5  ;;  %v2198_v52 = vmul.f32 %v2150_v30, %v4832_v14 }
 0x2f6   : > { %v2154_v37 = vmul.f32 0.5, %v2153_v26 }
 0x2f7   : > { %v2209_v15 = vpack.c.bf16 %v2197_v25, %v2195_v51  ;;  %v2210_v60 = vpack.c.bf16 %v2198_v52, %v2196_v10 }
 0x2f8   : > { %v2099_v46 = vpop.xlane.xlu0 %2098  ;;  %v2155_v44 = vsub.f32 1.5, %v2154_v37 }
 0x2f9   : > { %v3565_v24 = vpop.eup %3564  ;;  %v2109_v0 = vadd.f32 1e-12, %v2099_v46  ;;  %2420 = vmatmul.bf16.gmra.mxu0 %v2209_v15  ;;  %2449 = vmatmul.bf16.gmra.mxu1 %v2210_v60 }
 0x2fa   : > { %v2162_v27 = vmul.f32 %v3565_v24, %v2108_v36  ;;  %2478 = vmatmul.bf16.gmra.mxu2 %v2209_v15  ;;  %2507 = vmatmul.bf16.gmra.mxu3 %v2210_v60  ;;  %v2156_v20 = vmul.f32 %v3563_v57, %v2155_v44  ;;  %vm2168_vm14 = vweird.f32 %v3565_v24 }
 0x2fb   : > { %3566 = vrsqrt.f32 %v2109_v0  ;;  %vm2169_vm1 = vmor %vm2167_vm0, %vm2168_vm14  ;;  %vm2177_vm3 = vweird.f32 %v2109_v0 }
 0x2fc   : > { %v2163_v35 = vmul.f32 %v3565_v24, %v2162_v27  ;;  %v2160_v43 = vsel %vm2159_vm15, %v3563_v57, %v2156_v20 }
 0x2fd   : > { %v2199_v11 = vmul.f32 %v2160_v43, %v4839_v54  ;;  %v2200_v16 = vmul.f32 %v2160_v43, %v4842_v50 }
 0x2fe   : > { %v2164_v5 = vmul.f32 0.5, %v2163_v35 }
 0x300   : > { %v2165_v38 = vsub.f32 1.5, %v2164_v5  ;;  %v2102_v14 = vpop.xlane.xlu1 %2101 }
 0x301   : > { %v3567_v62 = vpop.eup %3566  ;;  %v2110_v18 = vadd.f32 1e-12, %v2102_v14 }
 0x302   : > { %v2166_v58 = vmul.f32 %v3565_v24, %v2165_v38  ;;  %v2172_v17 = vmul.f32 %v3567_v62, %v2109_v0  ;;  %vm2178_vm2 = vweird.f32 %v3567_v62 }
 0x303   : > { %3568 = vrsqrt.f32 %v2110_v18  ;;  %vm2179_vm5 = vmor %vm2177_vm3, %vm2178_vm2  ;;  %vm2187_vm6 = vweird.f32 %v2110_v18 }
 0x304   : > { %v2173_v28 = vmul.f32 %v3567_v62, %v2172_v17  ;;  %v2170_v63 = vsel %vm2169_vm1, %v3565_v24, %v2166_v58 }
 0x305   : > { %v2201_v2 = vmul.f32 %v2170_v63, %v4849_v34  ;;  %v2202_v21 = vmul.f32 %v2170_v63, %v4852_v45 }
 0x306   : > { %v2174_v1 = vmul.f32 0.5, %v2173_v28 }
 0x307   : > { %v2211_v12 = vpack.c.bf16 %v2201_v2, %v2199_v11  ;;  %v2212_v59 = vpack.c.bf16 %v2202_v21, %v2200_v16 }
 0x308   : > { %v2175_v22 = vsub.f32 1.5, %v2174_v1 }
 0x309   : > { %v3569_v4 = vpop.eup %3568  ;;  %2425 = vmatmul.bf16.gmra.mxu0 %v2211_v12  ;;  %2454 = vmatmul.bf16.gmra.mxu1 %v2212_v59 }
 0x30a   : > { %v2182_v48 = vmul.f32 %v3569_v4, %v2110_v18  ;;  %2483 = vmatmul.bf16.gmra.mxu2 %v2211_v12  ;;  %2512 = vmatmul.bf16.gmra.mxu3 %v2212_v59  ;;  %v2176_v13 = vmul.f32 %v3567_v62, %v2175_v22  ;;  %vm2188_vm4 = vweird.f32 %v3569_v4 }
 0x30b   : > { %vm2189_vm7 = vmor %vm2187_vm6, %vm2188_vm4 }
 0x30c   : > { %v2183_v41 = vmul.f32 %v3569_v4, %v2182_v48  ;;  %v2180_v45 = vsel %vm2179_vm5, %v3567_v62, %v2176_v13 }
 0x30d   : > { %v2203_v40 = vmul.f32 %v2180_v45, %v4859_v19  ;;  %v2204_v49 = vmul.f32 %v2180_v45, %v4862_v29 }
 0x30e   : > { %v2184_v54 = vmul.f32 0.5, %v2183_v41 }
 0x310   : > { %v2185_v34 = vsub.f32 1.5, %v2184_v54 }
 0x312   : > { %v2186_v50 = vmul.f32 %v3569_v4, %v2185_v34 }
 0x314   : > { %v2190_v3 = vsel %vm2189_vm7, %v3569_v4, %v2186_v50 }
 0x315   : > { %v2205_v7 = vmul.f32 %v2190_v3, %v4869_v9  ;;  %v2206_v6 = vmul.f32 %v2190_v3, %v4872_v53 }
 0x317   : > { %v2213_v8 = vpack.c.bf16 %v2205_v7, %v2203_v40  ;;  %v2214_v61 = vpack.c.bf16 %v2206_v6, %v2204_v49 }
 0x319   : > { %2430 = vmatmul.bf16.gmra.mxu0 %v2213_v8  ;;  %2459 = vmatmul.bf16.gmra.mxu1 %v2214_v61 }
 0x31a   : > { %2488 = vmatmul.bf16.gmra.mxu2 %v2213_v8  ;;  %2517 = vmatmul.bf16.gmra.mxu3 %v2214_v61 }
 0x366   : > { %v2416_v31 = vpop.f32.mrf.mxu0  ;;  %v2445_v32 = vpop.f32.mrf.mxu1 }
 0x367   : > { %v2446_v42 = vadd.f32 %v2445_v32, %v2416_v31 }
 0x369   : > { %2523 = vst [vmem:[%s4895_s13] sm:$0xff] %v2446_v42 }
 0x36d   : > { %v2474_v19 = vpop.f32.mrf.mxu2  ;;  %v2503_v29 = vpop.f32.mrf.mxu3 }
 0x36e   : > { %v2504_v9 = vadd.f32 %v2503_v29, %v2474_v19  ;;  %v2418_v53 = vpop.f32.mrf.mxu0  ;;  %v2447_v23 = vpop.f32.mrf.mxu1 }
 0x36f   : > { %v2448_v33 = vadd.f32 %v2447_v23, %v2418_v53 }
 0x370   : > { %2524 = vst [vmem:[%s4895_s13 + $0x8] sm:$0xff] %v2504_v9 }
 0x371   : > { %2525 = vst [vmem:[%s4895_s13 + $0x10] sm:$0xff] %v2448_v33 }
 0x375   : > { %v2476_v56 = vpop.f32.mrf.mxu2  ;;  %v2505_v57 = vpop.f32.mrf.mxu3 }
 0x376   : > { %v2506_v36 = vadd.f32 %v2505_v57, %v2476_v56  ;;  %v2421_v39 = vpop.f32.mrf.mxu0  ;;  %v2450_v47 = vpop.f32.mrf.mxu1 }
 0x377   : > { %v2451_v55 = vadd.f32 %v2450_v47, %v2421_v39 }
 0x378   : > { %2526 = vst [vmem:[%s4895_s13 + $0x18] sm:$0xff] %v2506_v36 }
 0x379   : > { %2527 = vst [vmem:[%s4895_s13 + $0x20] sm:$0xff] %v2451_v55 }
 0x37d   : > { %v2479_v26 = vpop.f32.mrf.mxu2  ;;  %v2508_v30 = vpop.f32.mrf.mxu3 }
 0x37e   : > { %v2509_v51 = vadd.f32 %v2508_v30, %v2479_v26  ;;  %v2423_v25 = vpop.f32.mrf.mxu0  ;;  %v2452_v10 = vpop.f32.mrf.mxu1 }
 0x37f   : > { %v2453_v52 = vadd.f32 %v2452_v10, %v2423_v25 }
 0x380   : > { %2528 = vst [vmem:[%s4895_s13 + $0x28] sm:$0xff] %v2509_v51 }
 0x381   : > { %2529 = vst [vmem:[%s4895_s13 + $0x30] sm:$0xff] %v2453_v52 }
 0x385   : > { %v2481_v37 = vpop.f32.mrf.mxu2  ;;  %v2510_v15 = vpop.f32.mrf.mxu3 }
 0x386   : > { %v2511_v60 = vadd.f32 %v2510_v15, %v2481_v37  ;;  %v2426_v46 = vpop.f32.mrf.mxu0  ;;  %v2455_v24 = vpop.f32.mrf.mxu1 }
 0x387   : > { %v2456_v0 = vadd.f32 %v2455_v24, %v2426_v46 }
 0x388   : > { %2530 = vst [vmem:[%s4895_s13 + $0x38] sm:$0xff] %v2511_v60 }
 0x389   : > { %2531 = vst [vmem:[%s4895_s13 + $0x40] sm:$0xff] %v2456_v0 }
 0x38d   : > { %v2484_v44 = vpop.f32.mrf.mxu2  ;;  %v2513_v27 = vpop.f32.mrf.mxu3 }
 0x38e   : > { %v2514_v35 = vadd.f32 %v2513_v27, %v2484_v44  ;;  %v2428_v20 = vpop.f32.mrf.mxu0  ;;  %v2457_v5 = vpop.f32.mrf.mxu1 }
 0x38f   : > { %v2458_v38 = vadd.f32 %v2457_v5, %v2428_v20 }
 0x390   : > { %2532 = vst [vmem:[%s4895_s13 + $0x48] sm:$0xff] %v2514_v35 }
 0x391   : > { %2533 = vst [vmem:[%s4895_s13 + $0x50] sm:$0xff] %v2458_v38 }
 0x395   : > { %v2486_v14 = vpop.f32.mrf.mxu2  ;;  %v2515_v62 = vpop.f32.mrf.mxu3 }
 0x396   : > { %v2516_v18 = vadd.f32 %v2515_v62, %v2486_v14  ;;  %v2431_v58 = vpop.f32.mrf.mxu0  ;;  %v2460_v17 = vpop.f32.mrf.mxu1 }
 0x397   : > { %v2461_v43 = vadd.f32 %v2460_v17, %v2431_v58 }
 0x398   : > { %2534 = vst [vmem:[%s4895_s13 + $0x58] sm:$0xff] %v2516_v18 }
 0x399   : > { %2535 = vst [vmem:[%s4895_s13 + $0x60] sm:$0xff] %v2461_v43 }
 0x39d   : > { %v2489_v28 = vpop.f32.mrf.mxu2  ;;  %v2518_v63 = vpop.f32.mrf.mxu3 }
 0x39e   : > { %v2519_v11 = vadd.f32 %v2518_v63, %v2489_v28  ;;  %v2433_v2 = vpop.f32.mrf.mxu0  ;;  %v2462_v16 = vpop.f32.mrf.mxu1 }
 0x39f   : > { %v2463_v21 = vadd.f32 %v2462_v16, %v2433_v2 }
 0x3a0   : > { %2536 = vst [vmem:[%s4895_s13 + $0x68] sm:$0xff] %v2519_v11 }
 0x3a1   : > { %2537 = vst [vmem:[%s4895_s13 + $0x70] sm:$0xff] %v2463_v21 }
 0x3a5   : > { %v2491_v1 = vpop.f32.mrf.mxu2  ;;  %v2520_v12 = vpop.f32.mrf.mxu3 }
 0x3a6   : > { %v2521_v59 = vadd.f32 %v2520_v12, %v2491_v1 }
 0x3a8   : > { %2538 = vst [vmem:[%s4895_s13 + $0x78] sm:$0xff] %v2521_v59 }
 0x3a9   : > { %3747 = shalt.err (!%p3744_p10)
}
 0x3aa   : > { %s3802_s29 = smov 256   ;;  %s3803_s13 = smov 16  }
 0x3ab   : > { %3353 = dma.vmem_to_hbm [thread:$0]  (%p3932_p3), %s2554_s9, 2048, %s2556_s11, %s2540_s25, %s3802_s29, %s3802_s29, %s3803_s13  }
 0x3ac PF: > { %s2570_s18 = sand.u32 1, %s3782_s21   ;;  %p4974_p12 = scmp.ge.s32.totalorder %s3794_s24, 2 }
 0x3ad   : > { %s2571_s17 = scalar_lea.sflag [#allocation4], %s2570_s18 }
 0x3ae   : > { %p3373_p13 = pnand %p4974_p12, %p3874_p6 }
 0x3b0   : > { %p3374_p0 = pneg %p3373_p13 }
 0x3b2   : > { %3777 = dma.done.wait (%p3374_p0), %s2571_s17, 2048  }
 0x3b3   : > { %3779 = vsyncadd (%p3374_p0), %s2571_s17, 4294965248  ;;  %p21_p5 = scmp.ge.s32.totalorder %s3922_s14, 4   ;;  %s4975_s21 = smov %s3786_s22 }
 0x3b4   : > { %s4976_s22 = smov %s3790_s23  ;;  %s4977_s23 = smov %s3938_s20 }
 0x3b5   : > { %s4978_s24 = smov %s3922_s14  ;;  %23 = sbr.rel (!%p21_p5) target bundleno = 7 (0x7), region = 105 }
 0x3ba   :  { %2577 = vsyncpa [#allocation3], 1 }
 0x3bb   :  { %2579 = vsyncpa [#allocation3 + $0x1], 1 }
 0x3bc   :  { %2580 = vsyncpa [#allocation6], 1 }
 0x3bd   :  { %2581 = vsyncpa [#allocation9], 1 }
 0x3be   :  { %2582 = vsyncpa [#allocation4], 1 }
 0x3bf   :  { %2584 = vsyncpa [#allocation4 + $0x1], 1 }

// kernel: tpu_custom_call.1
= control target key start
LH: loop header
LB: loop body
LE: loop exit
PB: predicated region body
PF: predicated region fallthrough
CT: control target
= control target key end

     0   :  { %11 = vsyncpa [#allocation3], 0  ;;  %s4947_s0 = inlined_call_operand.hbm [shape: bf16[512,256], index: 0, kind: input, shape index: {}]   ;;  %s4948_s1 = inlined_call_operand.hbm [shape: bf16[256,256], index: 1, kind: input, shape index: {}]   ;;  %s4949_s2 = inlined_call_operand.hbm [shape: f32[1,256], index: 2, kind: input, shape index: {}]   ;;  %s4950_s3 = inlined_call_operand.hbm [shape: bf16[256,256], index: 3, kind: input, shape index: {}]   ;;  %s4951_s4 = inlined_call_operand.vmem [shape: f32[1,256], index: 4, kind: input, shape index: {}]   ;;  %s4952_s5 = inlined_call_operand.hbm [shape: bf16[256,256], index: 5, kind: input, shape index: {}]   ;;  %s4953_s6 = inlined_call_operand.hbm [shape: f32[128,256], index: 6, kind: output, shape index: {}]  }
   0x1   :  { %13 = vsyncpa [#allocation3 + $0x1], 0 }
   0x2   :  { %14 = vsyncpa [#allocation6], 0 }
   0x3   :  { %15 = vsyncpa [#allocation9], 0 }
   0x4   :  { %16 = vsyncpa [#allocation4], 0 }
   0x5   :  { %18 = vsyncpa [#allocation4 + $0x1], 0  ;;  %s3839_s21 = smov 0   ;;  %s3841_s22 = smov 0  }
   0x6   :  { %s3843_s23 = smov 0   ;;  %s3845_s24 = smov 0  }
   0x7 LB: > { %s3860_s25 = sadd.s32 4294967295, %s3794_s24   ;;  %s2667_s26 = sadd.s32 4294967294, %s3794_s24   ;;  %s3794_s24 = sphi %s3845_s24, %s4978_s24   ;;  %s3790_s23 = sphi %s3843_s23, %s4977_s23   ;;  %s3786_s22 = sphi %s3841_s22, %s4976_s22   ;;  %s3782_s21 = sphi %s3839_s21, %s4975_s21  }
   0x8   : > { %p44_p0 = scmp.ne.s32.totalorder %s3786_s22, %s3782_s21  ;;  %p45_p1 = scmp.eq.s32.totalorder %s3860_s25, 0 }
   0x9   : > { %p173_p2 = scmp.eq.s32.totalorder %s3860_s25, 1  ;;  %p179_p3 = scmp.eq.s32.totalorder %s2667_s26, 1 }
   0xa   : > { %p3869_p4 = por %p45_p1, %p44_p0  ;;  %p2668_p5 = scmp.ge.s32.totalorder %s3794_s24, 1 }
   0xb   : > { %p3874_p6 = por %p179_p3, %p44_p0  ;;  %p186_p7 = scmp.lt.s32.totalorder %s3794_s24, 3 }
   0xc   : > { %s197_s7 = sshll.u32 %s4948_s1, 4  ;;  %s3796_s9 = smov [#allocation5]   ;;  %s198_s7 = int_to_ptr.hbm [resolvable:$true] %s197_s7 }
   0xd   : > { %p3882_p8 = pnand %p2668_p5, %p186_p7  ;;  %s199_s10 = sshll.u32 %s3796_s9, 4  ;;  %s200_s10 = int_to_ptr.vmem [resolvable:$true] %s199_s10 }
   0xe   : > { %s223_s14 = sshll.u32 %s4950_s3, 4  ;;  %s4954_s15 = smov 128   ;;  %s224_s14 = int_to_ptr.hbm [resolvable:$true] %s223_s14 }
   0xf   : > { %p3355_p9 = pneg %p3882_p8  ;;  %s4955_s16 = smov 8  }
  0x10   : > { %s3799_s17 = smov [#allocation8]   ;;  %s212_s26 = sshll.u32 %s4949_s2, 4  ;;  %s213_s26 = int_to_ptr.hbm [resolvable:$true] %s212_s26 }
  0x11   : > { %p3890_p10 = pnand %p3355_p9, %p45_p1  ;;  %s225_s18 = sshll.u32 %s3799_s17, 4  ;;  %s226_s18 = int_to_ptr.vmem [resolvable:$true] %s225_s18 }
  0x12   : > { %s3800_s9 = smov [#allocation7]   ;;  %s3801_s12 = smov [#allocation10]  }
  0x13   : > { %3358 = dma.hbm_to_vmem [thread:$0]  (!%p3890_p10), %s198_s7, 4096, %s200_s10, [#allocation6], %s4954_s15, %s4954_s15, %s4955_s16  }
  0x14   : > { %3364 = dma.hbm_to_vmem [thread:$0]  (!%p3890_p10), %s224_s14, 4096, %s226_s18, [#allocation9], %s4954_s15, %s4954_s15, %s4955_s16  }
  0x15   : > { %s240_s7 = sshll.u32 %s4952_s5, 4  ;;  %s214_s10 = sshll.u32 %s3800_s9, 4  ;;  %s241_s7 = int_to_ptr.hbm [resolvable:$true] %s240_s7  ;;  %s215_s10 = int_to_ptr.vmem [resolvable:$true] %s214_s10 }
  0x16   : > { %3361 = dma.hbm_to_vmem [thread:$0]  (!%p3890_p10), %s213_s26, 32, %s215_s10, [#allocation6]  }
  0x17   : > { %s242_s13 = sshll.u32 %s3801_s12, 4  ;;  %s3922_s14 = sadd.s32 1, %s3794_s24   ;;  %s243_s13 = int_to_ptr.vmem [resolvable:$true] %s242_s13 }
  0x18   : > { %3367 = dma.hbm_to_vmem [thread:$0]  (!%p3890_p10), %s241_s7, 4096, %s243_s13, [#allocation9], %s4954_s15, %s4954_s15, %s4955_s16  }
  0x19   : > { %s31_s17 = sadd.s32 1, %s3790_s23  ;;  %s28_s18 = ssub.s32 %s3794_s24, %s3922_s14 }
  0x1a   : > { %p38_p12 = scmp.ne.s32.totalorder %s3790_s23, %s3786_s22  ;;  %p29_p13 = scmp.eq.s32.totalorder %s28_s18, 0 }
  0x1b   : > { %p39_p0 = scmp.eq.s32.totalorder %s3794_s24, 0  ;;  %p3380_p5 = scmp.lt.s32.totalorder %s3794_s24, 2 }
  0x1c   : > { %p3932_p3 = por %p173_p2, %p38_p12  ;;  %s256_s11 = sand.u32 1, %s3790_s23  }
  0x1d   : > { %s3938_s20 = scalar_select %p29_p13, %s3790_s23, %s31_s17  }
  0x1e   : > { %p40_p7 = por %p39_p0, %p38_p12  ;;  %s2674_s26 = sshll.u32 %s256_s11, 8 }
  0x1f   : > { %s3204_s29 = sshll.u32 %s3794_s24, 8  ;;  %s260_s10 = scalar_lea.vmem [#allocation2], %s2674_s26 }
  0x20   : > { %s266_s9 = scalar_lea.hbm %s4947_s0, %s3204_s29  ;;  %s269_s12 = sshll.u32 %s260_s10, 4  ;;  %s270_s12 = int_to_ptr.vmem [resolvable:$true] %s269_s12 }
  0x21   : > { %s267_s13 = sshll.u32 %s266_s9, 4  ;;  %p3945_p2 = pnand %p3380_p5, %p40_p7  ;;  %s268_s13 = int_to_ptr.hbm [resolvable:$true] %s267_s13 }
  0x22   : > { %s257_s17 = scalar_lea.sflag [#allocation3], %s256_s11  ;;  %s3690_s15 = sshra.s32 %s268_s13, 4  ;;  %s3691_s15 = int_to_ptr.hbm [resolvable:$true] %s3690_s15 }
  0x23   : > { %s3692_s16 = scalar_lea.hbm %s3691_s15, 256  ;;  %p3694_p10 = pneg %p3945_p2 }
  0x24   : > { %p3693_p9 = scmp.ne.s32.totalorder %s3691_s15, %s3692_s16  ;;  %s3697_s30 = scalar_lea.hbm %s4947_s0, 512 }
  0x25   : > { %p3698_p0 = scmp.lt.s32.totalorder %s3691_s15, %s4947_s0  ;;  %p3699_p5 = scmp.lt.s32.totalorder %s3697_s30, %s3692_s16 }
  0x26   : > { %p3695_p12 = pnand %p3694_p10, %p3693_p9 }
  0x27   : > { %p3700_p7 = por %p3699_p5, %p3698_p0 }
  0x28   : > { %p3696_p13 = pneg %p3695_p12 }
  0x2a   : > { %p3701_p11 = pnand %p3700_p7, %p3696_p13 }
  0x2c   : > { %3704 = shalt.err (!%p3701_p11)
}
  0x2d   : > { %s4964_s11 = smov 8   ;;  %s4965_s10 = smov 128  }
  0x2e   : > { %3371 = dma.hbm_to_vmem [thread:$0]  (!%p3945_p2), %s268_s13, 4096, %s270_s12, %s257_s17, %s4965_s10, %s4965_s10, %s4964_s11  }
  0x2f   : > { %281 = sbr.rel (%p3882_p8) target bundleno = 940 (0x3ac), region = 44 }
  0x34   : > { %s3965_s29 = sand.u32 1, %s3786_s22  }
  0x35   : > { %s2679_s15 = sshll.u32 %s3965_s29, 8  ;;  %s284_s16 = scalar_lea.sflag [#allocation3], %s3965_s29 }
  0x36   : > { %s3969_s26 = scalar_lea.vmem [#allocation2], %s2679_s15 }
  0x37   : > { %3765 = dma.done.wait (%p3869_p4), %s284_s16, 4096  }
  0x38   : > { %3767 = vsyncadd (%p3869_p4), %s284_s16, 4294963200 }
  0x39   : > { %3769 = dma.done.wait (%p45_p1), [#allocation6], 4128  }
  0x3a   : > { %3771 = vsyncadd (%p45_p1), [#allocation6], 4294963168 }
  0x3b   : > { %3773 = dma.done.wait (%p45_p1), [#allocation9], 8192  }
  0x3c   : > { %3775 = vsyncadd (%p45_p1), [#allocation9], 4294959104  ;;  %v2871_v0 = vld [vmem:[#allocation5 + $0x70] sm:$0xf]  ;;  %v3252_v1 = vld [vmem:[#allocation5 + $0x74] sm:$0xf0] }
  0x3d   : > { %v2935_v2 = vld [vmem:[#allocation5 + $0xf0] sm:$0xf]  ;;  %v2872_v3 = vor.u32 %v3252_v1, %v2871_v0  ;;  %v3268_v4 = vld [vmem:[#allocation5 + $0xf4] sm:$0xf0]  ;;  %v3251_v5 = vld [vmem:[#allocation5 + $0x74] sm:$0xf] }
  0x3e   : > { %v2873_v6 = vld [vmem:[#allocation5 + $0x78] sm:$0xf0]  ;;  %v2936_v7 = vor.u32 %v3268_v4, %v2935_v2  ;;  %v3267_v9 = vld [vmem:[#allocation5 + $0xf4] sm:$0xf]  ;;  %v2863_v11 = vld [vmem:[#allocation5 + $0x60] sm:$0xf] }
  0x3f   : > { %v2876_v8 = vor.u32 %v3251_v5, %v2873_v6  ;;  %v2937_v10 = vld [vmem:[#allocation5 + $0xf8] sm:$0xf0]  ;;  %729 = vmatpush.bf16.msra.mxu0 %v2872_v3  ;;  %v3250_v13 = vld [vmem:[#allocation5 + $0x64] sm:$0xf0]  ;;  %v2927_v14 = vld [vmem:[#allocation5 + $0xe0] sm:$0xf] }
  0x40   : > { %v2940_v12 = vor.u32 %v3267_v9, %v2937_v10  ;;  %v3266_v15 = vld [vmem:[#allocation5 + $0xe4] sm:$0xf0]  ;;  %818 = vmatpush.bf16.msra.mxu1 %v2936_v7  ;;  %v2864_v16 = vor.u32 %v3250_v13, %v2863_v11  ;;  %v3249_v18 = vld [vmem:[#allocation5 + $0x64] sm:$0xf]  ;;  %v2865_v19 = vld [vmem:[#allocation5 + $0x68] sm:$0xf0] }
  0x41   : > { %907 = vmatpush.bf16.msra.mxu2 %v2876_v8  ;;  %v2928_v17 = vor.u32 %v3266_v15, %v2927_v14  ;;  %v3265_v20 = vld [vmem:[#allocation5 + $0xe4] sm:$0xf]  ;;  %v2868_v21 = vor.u32 %v3249_v18, %v2865_v19  ;;  %v2929_v22 = vld [vmem:[#allocation5 + $0xe8] sm:$0xf0]  ;;  %v2855_v23 = vld [vmem:[#allocation5 + $0x50] sm:$0xf] }
  0x42   : > { %996 = vmatpush.bf16.msra.mxu3 %v2940_v12  ;;  %v3248_v24 = vld [vmem:[#allocation5 + $0x54] sm:$0xf0]  ;;  %v2932_v25 = vor.u32 %v3265_v20, %v2929_v22  ;;  %v2919_v26 = vld [vmem:[#allocation5 + $0xd0] sm:$0xf]  ;;  %v3247_v28 = vld [vmem:[#allocation5 + $0x54] sm:$0xf] }
  0x43   : > { %v3264_v27 = vld [vmem:[#allocation5 + $0xd4] sm:$0xf0]  ;;  %730 = vmatpush.bf16.msra.mxu0 %v2864_v16  ;;  %v2856_v29 = vor.u32 %v3248_v24, %v2855_v23  ;;  %v2857_v30 = vld [vmem:[#allocation5 + $0x58] sm:$0xf0]  ;;  %v3263_v31 = vld [vmem:[#allocation5 + $0xd4] sm:$0xf] }
  0x44   : > { %v2921_v32 = vld [vmem:[#allocation5 + $0xd8] sm:$0xf0]  ;;  %819 = vmatpush.bf16.msra.mxu1 %v2928_v17  ;;  %v2920_v33 = vor.u32 %v3264_v27, %v2919_v26  ;;  %v2860_v34 = vor.u32 %v3247_v28, %v2857_v30  ;;  %v2847_v35 = vld [vmem:[#allocation5 + $0x40] sm:$0xf]  ;;  %v3246_v36 = vld [vmem:[#allocation5 + $0x44] sm:$0xf0] }
  0x45   : > { %908 = vmatpush.bf16.msra.mxu2 %v2868_v21  ;;  %v2911_v37 = vld [vmem:[#allocation5 + $0xc0] sm:$0xf]  ;;  %v2924_v38 = vor.u32 %v3263_v31, %v2921_v32  ;;  %v3262_v39 = vld [vmem:[#allocation5 + $0xc4] sm:$0xf0]  ;;  %v3245_v40 = vld [vmem:[#allocation5 + $0x44] sm:$0xf]  ;;  %v2848_v44 = vor.u32 %v3246_v36, %v2847_v35 }
  0x46   : > { %997 = vmatpush.bf16.msra.mxu3 %v2932_v25  ;;  %v2849_v41 = vld [vmem:[#allocation5 + $0x48] sm:$0xf0]  ;;  %v3261_v42 = vld [vmem:[#allocation5 + $0xc4] sm:$0xf]  ;;  %v2912_v45 = vor.u32 %v3262_v39, %v2911_v37  ;;  %v2839_v47 = vld [vmem:[#allocation5 + $0x30] sm:$0xf] }
  0x47   : > { %v2913_v43 = vld [vmem:[#allocation5 + $0xc8] sm:$0xf0]  ;;  %731 = vmatpush.bf16.msra.mxu0 %v2856_v29  ;;  %v2852_v46 = vor.u32 %v3245_v40, %v2849_v41  ;;  %v3244_v48 = vld [vmem:[#allocation5 + $0x34] sm:$0xf0]  ;;  %v2903_v49 = vld [vmem:[#allocation5 + $0xb0] sm:$0xf] }
  0x48   : > { %820 = vmatpush.bf16.msra.mxu1 %v2920_v33  ;;  %v2916_v50 = vor.u32 %v3261_v42, %v2913_v43  ;;  %v3260_v51 = vld [vmem:[#allocation5 + $0xb4] sm:$0xf0]  ;;  %v3243_v52 = vld [vmem:[#allocation5 + $0x34] sm:$0xf]  ;;  %v2841_v53 = vld [vmem:[#allocation5 + $0x38] sm:$0xf0]  ;;  %v2840_v56 = vor.u32 %v3244_v48, %v2839_v47 }
  0x49   : > { %909 = vmatpush.bf16.msra.mxu2 %v2860_v34  ;;  %v3259_v54 = vld [vmem:[#allocation5 + $0xb4] sm:$0xf]  ;;  %v2905_v55 = vld [vmem:[#allocation5 + $0xb8] sm:$0xf0]  ;;  %v2904_v57 = vor.u32 %v3260_v51, %v2903_v49  ;;  %v2844_v58 = vor.u32 %v3243_v52, %v2841_v53  ;;  %v2831_v59 = vld [vmem:[#allocation5 + $0x20] sm:$0xf] }
  0x4a   : > { %998 = vmatpush.bf16.msra.mxu3 %v2924_v38  ;;  %v3242_v60 = vld [vmem:[#allocation5 + $0x24] sm:$0xf0]  ;;  %v2895_v61 = vld [vmem:[#allocation5 + $0xa0] sm:$0xf]  ;;  %v2908_v62 = vor.u32 %v3259_v54, %v2905_v55  ;;  %v3241_v0 = vld [vmem:[#allocation5 + $0x24] sm:$0xf] }
  0x4b   : > { %732 = vmatpush.bf16.msra.mxu0 %v2848_v44  ;;  %v3258_v63 = vld [vmem:[#allocation5 + $0xa4] sm:$0xf0]  ;;  %v2833_v1 = vld [vmem:[#allocation5 + $0x28] sm:$0xf0]  ;;  %v3257_v2 = vld [vmem:[#allocation5 + $0xa4] sm:$0xf]  ;;  %v2832_v4 = vor.u32 %v3242_v60, %v2831_v59 }
  0x4c   : > { %821 = vmatpush.bf16.msra.mxu1 %v2912_v45  ;;  %v2897_v3 = vld [vmem:[#allocation5 + $0xa8] sm:$0xf0]  ;;  %v2896_v5 = vor.u32 %v3258_v63, %v2895_v61  ;;  %v2836_v6 = vor.u32 %v3241_v0, %v2833_v1  ;;  %v2823_v7 = vld [vmem:[#allocation5 + $0x10] sm:$0xf]  ;;  %v3240_v8 = vld [vmem:[#allocation5 + $0x14] sm:$0xf0] }
  0x4d   : > { %910 = vmatpush.bf16.msra.mxu2 %v2852_v46  ;;  %v2887_v9 = vld [vmem:[#allocation5 + $0x90] sm:$0xf]  ;;  %v2900_v10 = vor.u32 %v3257_v2, %v2897_v3  ;;  %v3256_v11 = vld [vmem:[#allocation5 + $0x94] sm:$0xf0]  ;;  %v3239_v12 = vld [vmem:[#allocation5 + $0x14] sm:$0xf]  ;;  %v2824_v16 = vor.u32 %v3240_v8, %v2823_v7 }
  0x4e   : > { %999 = vmatpush.bf16.msra.mxu3 %v2916_v50  ;;  %v2825_v13 = vld [vmem:[#allocation5 + $0x18] sm:$0xf0]  ;;  %v3255_v14 = vld [vmem:[#allocation5 + $0x94] sm:$0xf]  ;;  %v2888_v17 = vor.u32 %v3256_v11, %v2887_v9  ;;  %v2815_v19 = vld [vmem:[#allocation5] sm:$0xf] }
  0x4f   : > { %733 = vmatpush.bf16.msra.mxu0 %v2840_v56  ;;  %v2889_v15 = vld [vmem:[#allocation5 + $0x98] sm:$0xf0]  ;;  %v2828_v18 = vor.u32 %v3239_v12, %v2825_v13  ;;  %v3238_v20 = vld [vmem:[#allocation5 + $0x4] sm:$0xf0]  ;;  %v2879_v21 = vld [vmem:[#allocation5 + $0x80] sm:$0xf] }
  0x50   : > { %822 = vmatpush.bf16.msra.mxu1 %v2904_v57  ;;  %v2892_v22 = vor.u32 %v3255_v14, %v2889_v15  ;;  %v3254_v23 = vld [vmem:[#allocation5 + $0x84] sm:$0xf0]  ;;  %v3237_v24 = vld [vmem:[#allocation5 + $0x4] sm:$0xf]  ;;  %v2817_v25 = vld [vmem:[#allocation5 + $0x8] sm:$0xf0]  ;;  %v2816_v28 = vor.u32 %v3238_v20, %v2815_v19 }
  0x51   : > { %911 = vmatpush.bf16.msra.mxu2 %v2844_v58  ;;  %v3253_v26 = vld [vmem:[#allocation5 + $0x84] sm:$0xf]  ;;  %v2881_v27 = vld [vmem:[#allocation5 + $0x88] sm:$0xf0]  ;;  %v2687_v29 = vld [vmem:[%s3969_s26] sm:$0xf]  ;;  %v2880_v31 = vor.u32 %v3254_v23, %v2879_v21  ;;  %v2820_v32 = vor.u32 %v3237_v24, %v2817_v25 }
  0x52   : > { %1000 = vmatpush.bf16.msra.mxu3 %v2908_v62  ;;  %v3206_v30 = vld [vmem:[%s3969_s26 + $0x4] sm:$0xf0]  ;;  %v3205_v33 = vld [vmem:[%s3969_s26 + $0x4] sm:$0xf]  ;;  %v2689_v34 = vld [vmem:[%s3969_s26 + $0x8] sm:$0xf0]  ;;  %v2884_v35 = vor.u32 %v3253_v26, %v2881_v27 }
  0x53   : > { %734 = vmatpush.bf16.msra.mxu0 %v2832_v4  ;;  %v2688_v36 = vor.u32 %v3206_v30, %v2687_v29  ;;  %v2692_v37 = vor.u32 %v3205_v33, %v2689_v34  ;;  %v2695_v38 = vld [vmem:[%s3969_s26 + $0x10] sm:$0xf]  ;;  %v3208_v39 = vld [vmem:[%s3969_s26 + $0x14] sm:$0xf0]  ;;  %v3207_v40 = vld [vmem:[%s3969_s26 + $0x14] sm:$0xf] }
  0x54   : > { %823 = vmatpush.bf16.msra.mxu1 %v2896_v5  ;;  %v2697_v41 = vld [vmem:[%s3969_s26 + $0x18] sm:$0xf0]  ;;  %v2696_v42 = vor.u32 %v3208_v39, %v2695_v38  ;;  %v2703_v44 = vld [vmem:[%s3969_s26 + $0x20] sm:$0xf]  ;;  %v3210_v45 = vld [vmem:[%s3969_s26 + $0x24] sm:$0xf0] }
  0x55   : > { %912 = vmatpush.bf16.msra.mxu2 %v2836_v6  ;;  %v2700_v43 = vor.u32 %v3207_v40, %v2697_v41  ;;  %v3209_v46 = vld [vmem:[%s3969_s26 + $0x24] sm:$0xf]  ;;  %v2705_v47 = vld [vmem:[%s3969_s26 + $0x28] sm:$0xf0]  ;;  %v2704_v48 = vor.u32 %v3210_v45, %v2703_v44  ;;  %v2711_v50 = vld [vmem:[%s3969_s26 + $0x30] sm:$0xf] }
  0x56   : > { %1001 = vmatpush.bf16.msra.mxu3 %v2900_v10  ;;  %v2708_v49 = vor.u32 %v3209_v46, %v2705_v47  ;;  %v3212_v51 = vld [vmem:[%s3969_s26 + $0x34] sm:$0xf0]  ;;  %v3211_v52 = vld [vmem:[%s3969_s26 + $0x34] sm:$0xf]  ;;  %v2713_v53 = vld [vmem:[%s3969_s26 + $0x38] sm:$0xf0] }
  0x57   : > { %735 = vmatpush.bf16.msra.mxu0 %v2824_v16  ;;  %v2712_v54 = vor.u32 %v3212_v51, %v2711_v50  ;;  %v2716_v55 = vor.u32 %v3211_v52, %v2713_v53  ;;  %v2719_v56 = vld [vmem:[%s3969_s26 + $0x40] sm:$0xf]  ;;  %v3214_v57 = vld [vmem:[%s3969_s26 + $0x44] sm:$0xf0]  ;;  %v3213_v58 = vld [vmem:[%s3969_s26 + $0x44] sm:$0xf] }
  0x58   : > { %824 = vmatpush.bf16.msra.mxu1 %v2888_v17  ;;  %v2721_v59 = vld [vmem:[%s3969_s26 + $0x48] sm:$0xf0]  ;;  %v2720_v60 = vor.u32 %v3214_v57, %v2719_v56  ;;  %v3283_v62 = vld [vmem:[#allocation8 + $0x74] sm:$0xf]  ;;  %v3001_v63 = vld [vmem:[#allocation8 + $0x78] sm:$0xf0] }
  0x59   : > { %913 = vmatpush.bf16.msra.mxu2 %v2828_v18  ;;  %v2724_v61 = vor.u32 %v3213_v58, %v2721_v59  ;;  %v3299_v0 = vld [vmem:[#allocation8 + $0xf4] sm:$0xf]  ;;  %v3004_v1 = vor.u32 %v3283_v62, %v3001_v63  ;;  %v3065_v2 = vld [vmem:[#allocation8 + $0xf8] sm:$0xf0]  ;;  %v2999_v3 = vld [vmem:[#allocation8 + $0x70] sm:$0xf] }
  0x5a   : > { %1002 = vmatpush.bf16.msra.mxu3 %v2892_v22  ;;  %v3284_v4 = vld [vmem:[#allocation8 + $0x74] sm:$0xf0]  ;;  %v3068_v5 = vor.u32 %v3299_v0, %v3065_v2  ;;  %v2727_v7 = vld [vmem:[%s3969_s26 + $0x50] sm:$0xf]  ;;  %v3215_v9 = vld [vmem:[%s3969_s26 + $0x54] sm:$0xf] }
  0x5b   : > { %736 = vmatpush.bf16.msra.mxu0 %v2816_v28  ;;  %v3000_v6 = vor.u32 %v3284_v4, %v2999_v3  ;;  %v3216_v8 = vld [vmem:[%s3969_s26 + $0x54] sm:$0xf0]  ;;  %v2729_v10 = vld [vmem:[%s3969_s26 + $0x58] sm:$0xf0]  ;;  %v3063_v13 = vld [vmem:[#allocation8 + $0xf0] sm:$0xf] }
  0x5c   : > { %825 = vmatpush.bf16.msra.mxu1 %v2880_v31  ;;  %v2728_v11 = vor.u32 %v3216_v8, %v2727_v7  ;;  %v2732_v12 = vor.u32 %v3215_v9, %v2729_v10  ;;  %v3300_v14 = vld [vmem:[#allocation8 + $0xf4] sm:$0xf0]  ;;  %v2735_v16 = vld [vmem:[%s3969_s26 + $0x60] sm:$0xf]  ;;  %v3218_v17 = vld [vmem:[%s3969_s26 + $0x64] sm:$0xf0] }
  0x5d   : > { %914 = vmatpush.bf16.msra.mxu2 %v2820_v32  ;;  %v3064_v15 = vor.u32 %v3300_v14, %v3063_v13  ;;  %v3217_v18 = vld [vmem:[%s3969_s26 + $0x64] sm:$0xf]  ;;  %v2737_v19 = vld [vmem:[%s3969_s26 + $0x68] sm:$0xf0]  ;;  %v2736_v20 = vor.u32 %v3218_v17, %v2735_v16  ;;  %v2743_v22 = vld [vmem:[%s3969_s26 + $0x70] sm:$0xf] }
  0x5e   : > { %1003 = vmatpush.bf16.msra.mxu3 %v2884_v35  ;;  %737 = vmatmul.bf16.vlgmr.msra.gmra.mxu0 %v2688_v36  ;;  %v2740_v21 = vor.u32 %v3217_v18, %v2737_v19  ;;  %v3220_v23 = vld [vmem:[%s3969_s26 + $0x74] sm:$0xf0]  ;;  %v3219_v24 = vld [vmem:[%s3969_s26 + $0x74] sm:$0xf]  ;;  %v2745_v25 = vld [vmem:[%s3969_s26 + $0x78] sm:$0xf0] }
  0x5f   : > { %826 = vmatmul.bf16.vlgmr.msra.gmra.mxu1 %v2692_v37  ;;  %1947 = vmatpush.bf16.msrb.mxu0 %v3000_v6  ;;  %v2744_v26 = vor.u32 %v3220_v23, %v2743_v22  ;;  %v2748_v27 = vor.u32 %v3219_v24, %v2745_v25  ;;  %v403_v28 = vld [vmem:[#allocation7] sm:$0x3]  ;;  %v3222_v30 = vld [vmem:[%s3969_s26 + $0x84] sm:$0xf0]  ;;  %v3221_v32 = vld [vmem:[%s3969_s26 + $0x84] sm:$0xf] }
  0x60   : > { %915 = vmatmul.bf16.vlgmr.msra.gmra.mxu2 %v2688_v36  ;;  %1976 = vmatpush.bf16.msrb.mxu1 %v3064_v15  ;;  %v2751_v29 = vld [vmem:[%s3969_s26 + $0x80] sm:$0xf]  ;;  %v4017_v31 = vperm.slane %v403_v28, 0  ;;  %v2753_v33 = vld [vmem:[%s3969_s26 + $0x88] sm:$0xf0]  ;;  %s2684_s12 = sshll.u32 %s3965_s29, 7 }
  0x61   : > { %1004 = vmatmul.bf16.vlgmr.msra.gmra.mxu3 %v2692_v37  ;;  %2005 = vmatpush.bf16.msrb.mxu2 %v3004_v1  ;;  %v2752_v34 = vor.u32 %v3222_v30, %v2751_v29  ;;  %v3281_v35 = vld [vmem:[#allocation8 + $0x64] sm:$0xf]  ;;  %v2993_v36 = vld [vmem:[#allocation8 + $0x68] sm:$0xf0]  ;;  %v2756_v38 = vor.u32 %v3221_v32, %v2753_v33  ;;  %v2991_v46 = vld [vmem:[#allocation8 + $0x60] sm:$0xf] }
  0x62   : > { %2034 = vmatpush.bf16.msrb.mxu3 %v3068_v5  ;;  %v2996_v39 = vor.u32 %v3281_v35, %v2993_v36  ;;  %v3297_v44 = vld [vmem:[#allocation8 + $0xe4] sm:$0xf]  ;;  %v3057_v45 = vld [vmem:[#allocation8 + $0xe8] sm:$0xf0]  ;;  %v3282_v47 = vld [vmem:[#allocation8 + $0x64] sm:$0xf0] }
  0x63   : > { %v2992_v50 = vor.u32 %v3282_v47, %v2991_v46  ;;  %v3055_v51 = vld [vmem:[#allocation8 + $0xe0] sm:$0xf]  ;;  %v3298_v52 = vld [vmem:[#allocation8 + $0xe4] sm:$0xf0]  ;;  %v3224_v62 = vld [vmem:[%s3969_s26 + $0x94] sm:$0xf0] }
  0x64   : > { %v3056_v56 = vor.u32 %v3298_v52, %v3055_v51  ;;  %v3223_v63 = vld [vmem:[%s3969_s26 + $0x94] sm:$0xf]  ;;  %v2761_v0 = vld [vmem:[%s3969_s26 + $0x98] sm:$0xf0]  ;;  %v2767_v22 = vld [vmem:[%s3969_s26 + $0xa0] sm:$0xf] }
  0x65   : > { %2006 = vmatpush.bf16.msrb.mxu2 %v2996_v39  ;;  %1948 = vmatpush.bf16.msrb.mxu0 %v2992_v50  ;;  %v2764_v6 = vor.u32 %v3223_v63, %v2761_v0  ;;  %v2985_v13 = vld [vmem:[#allocation8 + $0x58] sm:$0xf0]  ;;  %v3226_v23 = vld [vmem:[%s3969_s26 + $0xa4] sm:$0xf0]  ;;  %v3225_v24 = vld [vmem:[%s3969_s26 + $0xa4] sm:$0xf] }
  0x66   : > { %1977 = vmatpush.bf16.msrb.mxu1 %v3056_v56  ;;  %v2769_v25 = vld [vmem:[%s3969_s26 + $0xa8] sm:$0xf0]  ;;  %v2768_v29 = vor.u32 %v3226_v23, %v2767_v22  ;;  %v2983_v32 = vld [vmem:[#allocation8 + $0x50] sm:$0xf]  ;;  %v3280_v33 = vld [vmem:[#allocation8 + $0x54] sm:$0xf0] }
  0x67   : > { %v2984_v39 = vor.u32 %v3280_v33, %v2983_v32  ;;  %v2775_v56 = vld [vmem:[%s3969_s26 + $0xb0] sm:$0xf]  ;;  %v2783_v23 = vld [vmem:[%s3969_s26 + $0xc0] sm:$0xf]  ;;  %v3277_v32 = vld [vmem:[#allocation8 + $0x44] sm:$0xf] }
  0x68   : > { %v2977_v33 = vld [vmem:[#allocation8 + $0x48] sm:$0xf0]  ;;  %s4895_s13 = scalar_lea.vmem [#allocation11], %s2684_s12  ;;  %s3334_s18 = sshll.u32 %s3860_s25, 7 }
  0x69   : > { %1949 = vmatpush.bf16.msrb.mxu0 %v2984_v39  ;;  %s2552_s7 = scalar_lea.hbm %s4953_s6, %s3334_s18  ;;  %s2553_s9 = sshll.u32 %s4895_s13, 4  ;;  %s2554_s9 = int_to_ptr.vmem [resolvable:$true] %s2553_s9 }
  0x6a   : > { %s2555_s11 = sshll.u32 %s2552_s7, 4  ;;  %s2540_s25 = scalar_lea.sflag [#allocation4], %s3965_s29  ;;  %s2556_s11 = int_to_ptr.hbm [resolvable:$true] %s2555_s11 }
  0x6b   : > { %s3734_s10 = sshra.s32 %s2556_s11, 4  ;;  %s3740_s27 = scalar_lea.hbm %s4953_s6, 256  ;;  %s3735_s10 = int_to_ptr.hbm [resolvable:$true] %s3734_s10 }
  0x6c   : > { %s3736_s15 = scalar_lea.hbm %s3735_s10, 128  ;;  %p3741_p11 = scmp.lt.s32.totalorder %s3735_s10, %s4953_s6 }
  0x6d   : > { %p3737_p1 = scmp.ne.s32.totalorder %s3735_s10, %s3736_s15  ;;  %p3742_p2 = scmp.lt.s32.totalorder %s3740_s27, %s3736_s15 }
  0x6e   : > { %742 = vmatmul.bf16.gmra.mxu0 %v2696_v42 }
  0x6f   : > { %831 = vmatmul.bf16.gmra.mxu1 %v2700_v43  ;;  %p3738_p4 = pnand %p3737_p1, %p3932_p3  ;;  %p3743_p9 = por %p3742_p2, %p3741_p11 }
  0x70   : > { %920 = vmatmul.bf16.gmra.mxu2 %v2696_v42 }
  0x71   : > { %1009 = vmatmul.bf16.gmra.mxu3 %v2700_v43  ;;  %v4024_v43 = vperm.slane %v403_v28, 1  ;;  %p3739_p8 = pneg %p3738_p4 }
  0x73   : > { %p3744_p10 = pnand %p3743_p9, %p3739_p8 }
  0x7e   : > { %747 = vmatmul.bf16.gmra.mxu0 %v2704_v48 }
  0x7f   : > { %836 = vmatmul.bf16.gmra.mxu1 %v2708_v49 }
  0x80   : > { %925 = vmatmul.bf16.gmra.mxu2 %v2704_v48 }
  0x81   : > { %1014 = vmatmul.bf16.gmra.mxu3 %v2708_v49  ;;  %v3060_v49 = vor.u32 %v3297_v44, %v3057_v45 }
  0x83   : > { %2035 = vmatpush.bf16.msrb.mxu3 %v3060_v49 }
  0x8e   : > { %752 = vmatmul.bf16.gmra.mxu0 %v2712_v54 }
  0x8f   : > { %841 = vmatmul.bf16.gmra.mxu1 %v2716_v55 }
  0x90   : > { %930 = vmatmul.bf16.gmra.mxu2 %v2712_v54 }
  0x91   : > { %1019 = vmatmul.bf16.gmra.mxu3 %v2716_v55 }
  0x9e   : > { %757 = vmatmul.bf16.gmra.mxu0 %v2720_v60 }
  0x9f   : > { %846 = vmatmul.bf16.gmra.mxu1 %v2724_v61 }
  0xa0   : > { %935 = vmatmul.bf16.gmra.mxu2 %v2720_v60 }
  0xa1   : > { %1024 = vmatmul.bf16.gmra.mxu3 %v2724_v61  ;;  %v2759_v61 = vld [vmem:[%s3969_s26 + $0x90] sm:$0xf] }
  0xa2   : > { %v2760_v2 = vor.u32 %v3224_v62, %v2759_v61  ;;  %v2777_v61 = vld [vmem:[%s3969_s26 + $0xb8] sm:$0xf0] }
  0xae   : > { %762 = vmatmul.bf16.gmra.mxu0 %v2728_v11 }
  0xaf   : > { %851 = vmatmul.bf16.gmra.mxu1 %v2732_v12 }
  0xb0   : > { %940 = vmatmul.bf16.gmra.mxu2 %v2728_v11 }
  0xb1   : > { %1029 = vmatmul.bf16.gmra.mxu3 %v2732_v12  ;;  %v3279_v12 = vld [vmem:[#allocation8 + $0x54] sm:$0xf] }
  0xb2   : > { %v2988_v17 = vor.u32 %v3279_v12, %v2985_v13 }
  0xb4   : > { %2007 = vmatpush.bf16.msrb.mxu2 %v2988_v17 }
  0xbe   : > { %767 = vmatmul.bf16.gmra.mxu0 %v2736_v20 }
  0xbf   : > { %856 = vmatmul.bf16.gmra.mxu1 %v2740_v21 }
  0xc0   : > { %945 = vmatmul.bf16.gmra.mxu2 %v2736_v20 }
  0xc1   : > { %1034 = vmatmul.bf16.gmra.mxu3 %v2740_v21 }
  0xce   : > { %772 = vmatmul.bf16.gmra.mxu0 %v2744_v26 }
  0xcf   : > { %861 = vmatmul.bf16.gmra.mxu1 %v2748_v27 }
  0xd0   : > { %950 = vmatmul.bf16.gmra.mxu2 %v2744_v26  ;;  %v3295_v26 = vld [vmem:[#allocation8 + $0xd4] sm:$0xf] }
  0xd1   : > { %1039 = vmatmul.bf16.gmra.mxu3 %v2748_v27  ;;  %v3049_v27 = vld [vmem:[#allocation8 + $0xd8] sm:$0xf0] }
  0xd2   : > { %v3052_v30 = vor.u32 %v3295_v26, %v3049_v27  ;;  %v3229_v26 = vld [vmem:[%s3969_s26 + $0xc4] sm:$0xf]  ;;  %v2785_v27 = vld [vmem:[%s3969_s26 + $0xc8] sm:$0xf0] }
  0xd4   : > { %2036 = vmatpush.bf16.msrb.mxu3 %v3052_v30 }
  0xdb   : > { %v738_v37 = vpop.f32.mrf.mxu0 }
  0xdc   : > { %v739_v40 = vadd.f32 %v738_v37, %v4017_v31  ;;  %v827_v41 = vpop.f32.mrf.mxu1 }
  0xde   : > { %v4022_v42 = vadd.f32 %v827_v41, %v739_v40  ;;  %777 = vmatmul.bf16.gmra.mxu0 %v2752_v34  ;;  %v3296_v40 = vld [vmem:[#allocation8 + $0xd4] sm:$0xf0] }
  0xdf   : > { %866 = vmatmul.bf16.gmra.mxu1 %v2756_v38 }
  0xe0   : > { %955 = vmatmul.bf16.gmra.mxu2 %v2752_v34  ;;  %v3047_v34 = vld [vmem:[#allocation8 + $0xd0] sm:$0xf] }
  0xe1   : > { %1044 = vmatmul.bf16.gmra.mxu3 %v2756_v38  ;;  %v2772_v38 = vor.u32 %v3225_v24, %v2769_v25  ;;  %v3048_v45 = vor.u32 %v3296_v40, %v3047_v34  ;;  %v3230_v24 = vld [vmem:[%s3969_s26 + $0xc4] sm:$0xf0] }
  0xe2   : > { %v2784_v30 = vor.u32 %v3230_v24, %v2783_v23  ;;  %v2791_v23 = vld [vmem:[%s3969_s26 + $0xd0] sm:$0xf]  ;;  %v3232_v24 = vld [vmem:[%s3969_s26 + $0xd4] sm:$0xf0] }
  0xe3   : > { %v916_v48 = vpop.f32.mrf.mxu2  ;;  %v740_v55 = vpop.f32.mrf.mxu0  ;;  %1978 = vmatpush.bf16.msrb.mxu1 %v3048_v45 }
  0xe4   : > { %v917_v53 = vadd.f32 %v916_v48, %v4024_v43  ;;  %v1005_v54 = vpop.f32.mrf.mxu3  ;;  %v741_v57 = vadd.f32 %v740_v55, %v4017_v31  ;;  %v829_v58 = vpop.f32.mrf.mxu1 }
  0xe6   : > { %v4028_v59 = vadd.f32 %v1005_v54, %v917_v53  ;;  %v4030_v60 = vadd.f32 %v829_v58, %v741_v57  ;;  %v3228_v57 = vld [vmem:[%s3969_s26 + $0xb4] sm:$0xf0]  ;;  %v3227_v58 = vld [vmem:[%s3969_s26 + $0xb4] sm:$0xf] }
  0xe7   : > { %v2776_v63 = vor.u32 %v3228_v57, %v2775_v56  ;;  %v2975_v56 = vld [vmem:[#allocation8 + $0x40] sm:$0xf] }
  0xeb   : > { %v918_v1 = vpop.f32.mrf.mxu2  ;;  %v743_v5 = vpop.f32.mrf.mxu0 }
  0xec   : > { %v919_v3 = vadd.f32 %v918_v1, %v4024_v43  ;;  %v1007_v4 = vpop.f32.mrf.mxu3  ;;  %v744_v7 = vadd.f32 %v743_v5, %v4017_v31  ;;  %v832_v8 = vpop.f32.mrf.mxu1 }
  0xee   : > { %v4038_v9 = vadd.f32 %v1007_v4, %v919_v3  ;;  %v4040_v10 = vadd.f32 %v832_v8, %v744_v7  ;;  %782 = vmatmul.bf16.gmra.mxu0 %v2760_v2  ;;  %v2780_v3 = vor.u32 %v3227_v58, %v2777_v61  ;;  %v1149_v8 = vmul.f32 0.044715, %v4022_v42 }
  0xef   : > { %871 = vmatmul.bf16.gmra.mxu1 %v2764_v6 }
  0xf0   : > { %960 = vmatmul.bf16.gmra.mxu2 %v2760_v2 }
  0xf1   : > { %1049 = vmatmul.bf16.gmra.mxu3 %v2764_v6 }
  0xf3   : > { %v921_v11 = vpop.f32.mrf.mxu2  ;;  %v745_v16 = vpop.f32.mrf.mxu0 }
  0xf4   : > { %v922_v14 = vadd.f32 %v921_v11, %v4024_v43  ;;  %v1010_v15 = vpop.f32.mrf.mxu3  ;;  %v746_v18 = vadd.f32 %v745_v16, %v4017_v31  ;;  %v834_v19 = vpop.f32.mrf.mxu1 }
  0xf6   : > { %v4044_v20 = vadd.f32 %v1010_v15, %v922_v14  ;;  %v4046_v21 = vadd.f32 %v834_v19, %v746_v18  ;;  %v1213_v15 = vmul.f32 %v1149_v8, %v4022_v42  ;;  %v1150_v19 = vmul.f32 0.044715, %v4028_v59 }
  0xf8   : > { %v1277_v25 = vmul.f32 %v1213_v15, %v4022_v42 }
  0xfa   : > { %v1341_v39 = vadd.f32 %v1277_v25, %v4022_v42 }
  0xfb   : > { %v923_v28 = vpop.f32.mrf.mxu2  ;;  %v748_v37 = vpop.f32.mrf.mxu0 }
  0xfc   : > { %v924_v35 = vadd.f32 %v923_v28, %v4024_v43  ;;  %v1012_v36 = vpop.f32.mrf.mxu3  ;;  %v749_v41 = vadd.f32 %v748_v37, %v4017_v31  ;;  %v837_v44 = vpop.f32.mrf.mxu1  ;;  %v1214_v28 = vmul.f32 %v1150_v19, %v4028_v59  ;;  %v2788_v37 = vor.u32 %v3229_v26, %v2785_v27  ;;  %v3231_v26 = vld [vmem:[%s3969_s26 + $0xd4] sm:$0xf]  ;;  %v2793_v27 = vld [vmem:[%s3969_s26 + $0xd8] sm:$0xf0] }
  0xfe   : > { %v4054_v46 = vadd.f32 %v1012_v36, %v924_v35  ;;  %v4056_v47 = vadd.f32 %v837_v44, %v749_v41  ;;  %787 = vmatmul.bf16.gmra.mxu0 %v2768_v29  ;;  %v1278_v45 = vmul.f32 %v1214_v28, %v4028_v59 }
  0xff   : > { %876 = vmatmul.bf16.gmra.mxu1 %v2772_v38 }
 0x100   : > { %965 = vmatmul.bf16.gmra.mxu2 %v2768_v29  ;;  %v1342_v57 = vadd.f32 %v1278_v45, %v4028_v59 }
 0x101   : > { %1054 = vmatmul.bf16.gmra.mxu3 %v2772_v38  ;;  %v2980_v38 = vor.u32 %v3277_v32, %v2977_v33  ;;  %v2792_v33 = vor.u32 %v3232_v24, %v2791_v23 }
 0x103   : > { %v926_v48 = vpop.f32.mrf.mxu2  ;;  %v750_v51 = vpop.f32.mrf.mxu0  ;;  %2008 = vmatpush.bf16.msrb.mxu2 %v2980_v38  ;;  %v2796_v38 = vor.u32 %v3231_v26, %v2793_v27  ;;  %v1086_v27 = vmul.f32 0.5, %v4028_v59 }
 0x104   : > { %v927_v49 = vadd.f32 %v926_v48, %v4024_v43  ;;  %v1015_v50 = vpop.f32.mrf.mxu3  ;;  %v751_v52 = vadd.f32 %v750_v51, %v4017_v31  ;;  %v839_v53 = vpop.f32.mrf.mxu1 }
 0x106   : > { %v4060_v54 = vadd.f32 %v1015_v50, %v927_v49  ;;  %v4062_v55 = vadd.f32 %v839_v53, %v751_v52  ;;  %v1405_v49 = vmul.f32 0.7978846, %v1341_v39  ;;  %v1153_v50 = vmul.f32 0.044715, %v4040_v10  ;;  %v3293_v52 = vld [vmem:[#allocation8 + $0xc4] sm:$0xf] }
 0x107   : > { %v3041_v53 = vld [vmem:[#allocation8 + $0xc8] sm:$0xf0] }
 0x108   : > { %3426 = vtanh.f32 %v1405_v49  ;;  %v1217_v15 = vmul.f32 %v1153_v50, %v4040_v10  ;;  %v1158_v59 = vmul.f32 0.044715, %v4060_v54 }
 0x10b   : > { %v928_v62 = vpop.f32.mrf.mxu2  ;;  %v753_v2 = vpop.f32.mrf.mxu0 }
 0x10c   : > { %v929_v0 = vadd.f32 %v928_v62, %v4024_v43  ;;  %v1017_v1 = vpop.f32.mrf.mxu3  ;;  %v754_v4 = vadd.f32 %v753_v2, %v4017_v31  ;;  %v842_v5 = vpop.f32.mrf.mxu1  ;;  %v3044_v62 = vor.u32 %v3293_v52, %v3041_v53 }
 0x10e   : > { %v4070_v6 = vadd.f32 %v1017_v1, %v929_v0  ;;  %v4072_v7 = vadd.f32 %v842_v5, %v754_v4  ;;  %792 = vmatmul.bf16.gmra.mxu0 %v2776_v63  ;;  %v3039_v0 = vld [vmem:[#allocation8 + $0xc0] sm:$0xf]  ;;  %v3294_v1 = vld [vmem:[#allocation8 + $0xc4] sm:$0xf0]  ;;  %2037 = vmatpush.bf16.msrb.mxu3 %v3044_v62 }
 0x10f   : > { %881 = vmatmul.bf16.gmra.mxu1 %v2780_v3  ;;  %v3040_v8 = vor.u32 %v3294_v1, %v3039_v0 }
 0x110   : > { %970 = vmatmul.bf16.gmra.mxu2 %v2776_v63  ;;  %v3278_v63 = vld [vmem:[#allocation8 + $0x44] sm:$0xf0] }
 0x111   : > { %1059 = vmatmul.bf16.gmra.mxu3 %v2780_v3  ;;  %v2976_v5 = vor.u32 %v3278_v63, %v2975_v56  ;;  %1979 = vmatpush.bf16.msrb.mxu1 %v3040_v8  ;;  %v1085_v56 = vmul.f32 0.5, %v4022_v42  ;;  %v2969_v8 = vld [vmem:[#allocation8 + $0x38] sm:$0xf0] }
 0x113   : > { %v931_v11 = vpop.f32.mrf.mxu2  ;;  %v755_v14 = vpop.f32.mrf.mxu0  ;;  %1950 = vmatpush.bf16.msrb.mxu0 %v2976_v5  ;;  %v3275_v5 = vld [vmem:[#allocation8 + $0x34] sm:$0xf] }
 0x114   : > { %v932_v12 = vadd.f32 %v931_v11, %v4024_v43  ;;  %v1020_v13 = vpop.f32.mrf.mxu3  ;;  %v756_v16 = vadd.f32 %v755_v14, %v4017_v31  ;;  %v844_v17 = vpop.f32.mrf.mxu1  ;;  %v1406_v14 = vmul.f32 0.7978846, %v1342_v57 }
 0x116   : > { %v4078_v18 = vadd.f32 %v1020_v13, %v932_v12  ;;  %v4081_v22 = vadd.f32 %v844_v17, %v756_v16  ;;  %v1154_v16 = vmul.f32 0.044715, %v4044_v20 }
 0x118   : > { %4966 = vst [vmem:[#allocation16_spill] sm:$0xff] %v4081_v22 }
 0x11b   : > { %v933_v29 = vpop.f32.mrf.mxu2  ;;  %v758_v36 = vpop.f32.mrf.mxu0 }
 0x11c   : > { %v934_v34 = vadd.f32 %v933_v29, %v4024_v43  ;;  %v1022_v35 = vpop.f32.mrf.mxu3  ;;  %v759_v40 = vadd.f32 %v758_v36, %v4017_v31  ;;  %v847_v41 = vpop.f32.mrf.mxu1  ;;  %v1281_v29 = vmul.f32 %v1217_v15, %v4040_v10 }
 0x11e   : > { %v4092_v44 = vadd.f32 %v1022_v35, %v934_v34  ;;  %v4095_v48 = vadd.f32 %v847_v41, %v759_v40  ;;  %797 = vmatmul.bf16.gmra.mxu0 %v2784_v30  ;;  %v3427_v34 = vpop.eup %3426  ;;  %v1345_v45 = vadd.f32 %v1281_v29, %v4040_v10 }
 0x11f   : > { %886 = vmatmul.bf16.gmra.mxu1 %v2788_v37 }
 0x120   : > { %4967 = vst [vmem:[#allocation17_spill] sm:$0xff] %v4092_v44  ;;  %975 = vmatmul.bf16.gmra.mxu2 %v2784_v30  ;;  %v1165_v51 = vmul.f32 0.044715, %v4095_v48  ;;  %v1218_v30 = vmul.f32 %v1154_v16, %v4044_v20  ;;  %v1409_v0 = vmul.f32 0.7978846, %v1345_v45 }
 0x121   : > { %1064 = vmatmul.bf16.gmra.mxu3 %v2788_v37 }
 0x122   : > { %v1229_v58 = vmul.f32 %v1165_v51, %v4095_v48  ;;  %v1282_v49 = vmul.f32 %v1218_v30, %v4044_v20  ;;  %v1533_v51 = vadd.f32 1.0, %v3427_v34  ;;  %v2799_v30 = vld [vmem:[%s3969_s26 + $0xe0] sm:$0xf] }
 0x123   : > { %v936_v61 = vpop.f32.mrf.mxu2  ;;  %v4102_v4 = vpop.f32.mrf.mxu0 }
 0x124   : > { %v937_v2 = vadd.f32 %v936_v61, %v4024_v43  ;;  %v1025_v3 = vpop.f32.mrf.mxu3  ;;  %v1293_v11 = vmul.f32 %v1229_v58, %v4095_v48  ;;  %v4105_v12 = vpop.f32.mrf.mxu1  ;;  %v1157_v58 = vmul.f32 0.044715, %v4056_v47  ;;  %v1101_v61 = vmul.f32 0.5, %v4095_v48 }
 0x125   : > { %v1346_v1 = vadd.f32 %v1282_v49, %v4044_v20 }
 0x126   : > { %v4107_v13 = vadd.f32 %v1025_v3, %v937_v2  ;;  %v1357_v17 = vadd.f32 %v1293_v11, %v4095_v48  ;;  %v1597_v11 = vmul.f32 %v1533_v51, %v1085_v56  ;;  %v2972_v48 = vor.u32 %v3275_v5, %v2969_v8  ;;  %v3292_v8 = vld [vmem:[#allocation8 + $0xb4] sm:$0xf0] }
 0x127   : > { %v1221_v24 = vmul.f32 %v1157_v58, %v4056_v47 }
 0x128   : > { %v1166_v19 = vmul.f32 0.044715, %v4107_v13  ;;  %v1421_v25 = vmul.f32 0.7978846, %v1357_v17  ;;  %2009 = vmatpush.bf16.msrb.mxu2 %v2972_v48 }
 0x129   : > { %v1285_v49 = vmul.f32 %v1221_v24, %v4056_v47 }
 0x12a   : > { %v1230_v28 = vmul.f32 %v1166_v19, %v4107_v13  ;;  %3428 = vtanh.f32 %v1421_v25 }
 0x12b   : > { %v4120_v32 = vpop.f32.mrf.mxu2  ;;  %v763_v37 = vpop.f32.mrf.mxu0  ;;  %3430 = vtanh.f32 %v1406_v14  ;;  %v1349_v24 = vadd.f32 %v1285_v49, %v4056_v47 }
 0x12c   : > { %v1294_v35 = vmul.f32 %v1230_v28, %v4107_v13  ;;  %v4123_v36 = vpop.f32.mrf.mxu3  ;;  %v764_v39 = vadd.f32 %v763_v37, %v4017_v31  ;;  %v852_v40 = vpop.f32.mrf.mxu1  ;;  %v1410_v28 = vmul.f32 0.7978846, %v1346_v1  ;;  %v3233_v37 = vld [vmem:[%s3969_s26 + $0xe4] sm:$0xf] }
 0x12e   : > { %v1358_v41 = vadd.f32 %v1294_v35, %v4107_v13  ;;  %v4129_v50 = vadd.f32 %v852_v40, %v764_v39  ;;  %802 = vmatmul.bf16.gmra.mxu0 %v2792_v33  ;;  %v3234_v35 = vld [vmem:[%s3969_s26 + $0xe4] sm:$0xf0] }
 0x12f   : > { %891 = vmatmul.bf16.gmra.mxu1 %v2796_v38  ;;  %v2800_v58 = vor.u32 %v3234_v35, %v2799_v30 }
 0x130   : > { %v1422_v52 = vmul.f32 0.7978846, %v1358_v41  ;;  %980 = vmatmul.bf16.gmra.mxu2 %v2792_v33  ;;  %v3429_v53 = vpop.eup %3428  ;;  %v1169_v57 = vmul.f32 0.044715, %v4129_v50  ;;  %v2801_v41 = vld [vmem:[%s3969_s26 + $0xe8] sm:$0xf0] }
 0x131   : > { %1069 = vmatmul.bf16.gmra.mxu3 %v2796_v38  ;;  %v1549_v62 = vadd.f32 1.0, %v3429_v53  ;;  %v3431_v63 = vpop.eup %3430  ;;  %v1102_v38 = vmul.f32 0.5, %v4107_v13  ;;  %v3033_v53 = vld [vmem:[#allocation8 + $0xb8] sm:$0xf0]  ;;  %v3276_v13 = vld [vmem:[#allocation8 + $0x34] sm:$0xf0] }
 0x132   : > { %3432 = vtanh.f32 %v1422_v52  ;;  %v1233_v2 = vmul.f32 %v1169_v57, %v4129_v50  ;;  %v1534_v23 = vadd.f32 1.0, %v3431_v63  ;;  %v3291_v52 = vld [vmem:[#allocation8 + $0xb4] sm:$0xf]  ;;  %v3031_v63 = vld [vmem:[#allocation8 + $0xb0] sm:$0xf] }
 0x133   : > { %v941_v3 = vpop.f32.mrf.mxu2  ;;  %v1613_v42 = vmul.f32 %v1549_v62, %v1101_v61  ;;  %v4138_v16 = vpop.f32.mrf.mxu0  ;;  %3434 = vtanh.f32 %v1409_v0  ;;  %v3036_v61 = vor.u32 %v3291_v52, %v3033_v53  ;;  %v2967_v62 = vld [vmem:[#allocation8 + $0x30] sm:$0xf] }
 0x134   : > { %v942_v14 = vadd.f32 %v941_v3, %v4024_v43  ;;  %v1030_v15 = vpop.f32.mrf.mxu3  ;;  %v1297_v17 = vmul.f32 %v1233_v2, %v4129_v50  ;;  %v4141_v19 = vpop.f32.mrf.mxu1  ;;  %v1598_v45 = vmul.f32 %v1534_v23, %v1086_v27  ;;  %v2804_v3 = vor.u32 %v3233_v37, %v2801_v41 }
 0x135   : > { %v4146_v26 = vadd.f32 %v1613_v42, %v1597_v11  ;;  %v2968_v5 = vor.u32 %v3276_v13, %v2967_v62  ;;  %2038 = vmatpush.bf16.msrb.mxu3 %v3036_v61  ;;  %v1105_v37 = vmul.f32 0.5, %v4129_v50  ;;  %v1161_v41 = vmul.f32 0.044715, %v4072_v7 }
 0x136   : > { %v4144_v25 = vadd.f32 %v1030_v15, %v942_v14  ;;  %v1361_v29 = vadd.f32 %v1297_v17, %v4129_v50  ;;  %v3032_v15 = vor.u32 %v3292_v8, %v3031_v63  ;;  %v1222_v17 = vmul.f32 %v1158_v59, %v4060_v54  ;;  %v2807_v8 = vld [vmem:[%s3969_s26 + $0xf0] sm:$0xf] }
 0x137   : > { %1951 = vmatpush.bf16.msrb.mxu0 %v2968_v5  ;;  %v1151_v59 = vmul.f32 0.044715, %v4030_v60  ;;  %v1152_v50 = vmul.f32 0.044715, %v4038_v9  ;;  %v1162_v5 = vmul.f32 0.044715, %v4078_v18 }
 0x138   : > { %v3433_v33 = vpop.eup %3432  ;;  %v1170_v34 = vmul.f32 0.044715, %v4144_v25  ;;  %v1425_v40 = vmul.f32 0.7978846, %v1361_v29  ;;  %1980 = vmatpush.bf16.msrb.mxu1 %v3032_v15  ;;  %v1286_v35 = vmul.f32 %v1222_v17, %v4060_v54  ;;  %v3236_v15 = vld [vmem:[%s3969_s26 + $0xf4] sm:$0xf0] }
 0x139   : > { %v1550_v39 = vadd.f32 1.0, %v3433_v33  ;;  %v3435_v11 = vpop.eup %3434  ;;  %v1089_v33 = vmul.f32 0.5, %v4040_v10  ;;  %v3235_v17 = vld [vmem:[%s3969_s26 + $0xf4] sm:$0xf] }
 0x13a   : > { %v1234_v51 = vmul.f32 %v1170_v34, %v4144_v25  ;;  %3436 = vtanh.f32 %v1425_v40  ;;  %v1413_v40 = vmul.f32 0.7978846, %v1349_v24  ;;  %v1350_v13 = vadd.f32 %v1286_v35, %v4060_v54 }
 0x13b   : > { %v1614_v56 = vmul.f32 %v1550_v39, %v1102_v38  ;;  %v4159_v57 = vpop.f32.mrf.mxu2  ;;  %v768_v2 = vpop.f32.mrf.mxu0  ;;  %3438 = vtanh.f32 %v1410_v28  ;;  %v1537_v28 = vadd.f32 1.0, %v3435_v11  ;;  %v1106_v24 = vmul.f32 0.5, %v4144_v25 }
 0x13c   : > { %v1298_v0 = vmul.f32 %v1234_v51, %v4144_v25  ;;  %v4162_v1 = vpop.f32.mrf.mxu3  ;;  %v769_v42 = vadd.f32 %v768_v2, %v4017_v31  ;;  %v857_v14 = vpop.f32.mrf.mxu1 }
 0x13d   : > { %v4165_v48 = vadd.f32 %v1614_v56, %v1598_v45  ;;  %v1601_v53 = vmul.f32 %v1537_v28, %v1089_v33  ;;  %v2809_v28 = vld [vmem:[%s3969_s26 + $0xf8] sm:$0xf0]  ;;  %v1414_v33 = vmul.f32 0.7978846, %v1350_v13  ;;  %v1155_v13 = vmul.f32 0.044715, %v4046_v21 }
 0x13e   : > { %v1362_v23 = vadd.f32 %v1298_v0, %v4144_v25  ;;  %v4170_v27 = vadd.f32 %v857_v14, %v769_v42  ;;  %807 = vmatmul.bf16.gmra.mxu0 %v2800_v58  ;;  %v1215_v42 = vmul.f32 %v1151_v59, %v4030_v60  ;;  %v2812_v59 = vor.u32 %v3235_v17, %v2809_v28 }
 0x13f   : > { %896 = vmatmul.bf16.gmra.mxu1 %v2804_v3  ;;  %v1093_v17 = vmul.f32 0.5, %v4056_v47 }
 0x140   : > { %v1426_v29 = vmul.f32 0.7978846, %v1362_v23  ;;  %985 = vmatmul.bf16.gmra.mxu2 %v2800_v58  ;;  %v3437_v30 = vpop.eup %3436  ;;  %v1173_v34 = vmul.f32 0.044715, %v4170_v27  ;;  %v1090_v58 = vmul.f32 0.5, %v4044_v20  ;;  %v1216_v23 = vmul.f32 %v1152_v50, %v4038_v9 }
 0x141   : > { %1074 = vmatmul.bf16.gmra.mxu3 %v2804_v3  ;;  %v1553_v38 = vadd.f32 1.0, %v3437_v30  ;;  %v3439_v39 = vpop.eup %3438  ;;  %v1225_v3 = vmul.f32 %v1161_v41, %v4072_v7  ;;  %v1279_v41 = vmul.f32 %v1215_v42, %v4030_v60 }
 0x142   : > { %3440 = vtanh.f32 %v1426_v29  ;;  %v1237_v45 = vmul.f32 %v1173_v34, %v4170_v27  ;;  %v1538_v2 = vadd.f32 1.0, %v3439_v39  ;;  %v2808_v39 = vor.u32 %v3236_v15, %v2807_v8 }
 0x143   : > { %v946_v49 = vpop.f32.mrf.mxu2  ;;  %v4180_v52 = vpop.f32.mrf.mxu0  ;;  %v1617_v56 = vmul.f32 %v1553_v38, %v1105_v37  ;;  %3442 = vtanh.f32 %v1413_v40  ;;  %v1289_v37 = vmul.f32 %v1225_v3, %v4072_v7 }
 0x144   : > { %v947_v10 = vadd.f32 %v946_v49, %v4024_v43  ;;  %v1035_v51 = vpop.f32.mrf.mxu3  ;;  %v1301_v61 = vmul.f32 %v1237_v45, %v4170_v27  ;;  %v4185_v62 = vpop.f32.mrf.mxu1  ;;  %v1602_v35 = vmul.f32 %v1538_v2, %v1090_v58 }
 0x145   : > { %v4190_v0 = vadd.f32 %v1617_v56, %v1601_v53  ;;  %v1226_v53 = vmul.f32 %v1162_v5, %v4078_v18  ;;  %v1353_v2 = vadd.f32 %v1289_v37, %v4072_v7 }
 0x146   : > { %v4188_v63 = vadd.f32 %v1035_v51, %v947_v10  ;;  %v1365_v20 = vadd.f32 %v1301_v61, %v4170_v27  ;;  %v1280_v51 = vmul.f32 %v1216_v23, %v4038_v9  ;;  %v1109_v23 = vmul.f32 0.5, %v4170_v27 }
 0x147   : > { %v1417_v28 = vmul.f32 0.7978846, %v1353_v2  ;;  %v1159_v2 = vmul.f32 0.044715, %v4062_v55 }
 0x148   : > { %v3441_v11 = vpop.eup %3440  ;;  %v1174_v14 = vmul.f32 0.044715, %v4188_v63  ;;  %v1429_v29 = vmul.f32 0.7978846, %v1365_v20  ;;  %v1344_v42 = vadd.f32 %v1280_v51, %v4038_v9 }
 0x149   : > { %v1554_v30 = vadd.f32 1.0, %v3441_v11  ;;  %v3443_v10 = vpop.eup %3442  ;;  %v1343_v11 = vadd.f32 %v1279_v41, %v4030_v60 }
 0x14a   : > { %v1238_v34 = vmul.f32 %v1174_v14, %v4188_v63  ;;  %3444 = vtanh.f32 %v1429_v29  ;;  %v1541_v8 = vadd.f32 1.0, %v3443_v10  ;;  %v1290_v14 = vmul.f32 %v1226_v53, %v4078_v18 }
 0x14b   : > { %v4205_v38 = vpop.f32.mrf.mxu2  ;;  %v1618_v40 = vmul.f32 %v1554_v30, %v1106_v24  ;;  %v773_v25 = vpop.f32.mrf.mxu0  ;;  %3446 = vtanh.f32 %v1414_v33  ;;  %v1219_v29 = vmul.f32 %v1155_v13, %v4046_v21  ;;  %v1094_v13 = vmul.f32 0.5, %v4060_v54 }
 0x14c   : > { %v1302_v45 = vmul.f32 %v1238_v34, %v4188_v63  ;;  %v4209_v49 = vpop.f32.mrf.mxu3  ;;  %v774_v56 = vadd.f32 %v773_v25, %v4017_v31  ;;  %v862_v50 = vpop.f32.mrf.mxu1  ;;  %v1354_v47 = vadd.f32 %v1290_v14, %v4078_v18  ;;  %v1407_v25 = vmul.f32 0.7978846, %v1343_v11 }
 0x14d   : > { %v4214_v58 = vadd.f32 %v1618_v40, %v1602_v35  ;;  %v1283_v53 = vmul.f32 %v1219_v29, %v4046_v21  ;;  %v1110_v11 = vmul.f32 0.5, %v4188_v63 }
 0x14e   : > { %v1366_v61 = vadd.f32 %v1302_v45, %v4188_v63  ;;  %v4219_v3 = vadd.f32 %v862_v50, %v774_v56  ;;  %812 = vmatmul.bf16.gmra.mxu0 %v2808_v39  ;;  %v1156_v56 = vmul.f32 0.044715, %v4054_v46 }
 0x14f   : > { %901 = vmatmul.bf16.gmra.mxu1 %v2812_v59  ;;  %v1347_v29 = vadd.f32 %v1283_v53, %v4046_v21 }
 0x150   : > { %v1430_v20 = vmul.f32 0.7978846, %v1366_v61  ;;  %990 = vmatmul.bf16.gmra.mxu2 %v2808_v39  ;;  %v3445_v5 = vpop.eup %3444  ;;  %v1177_v15 = vmul.f32 0.044715, %v4219_v3  ;;  %v1605_v39 = vmul.f32 %v1541_v8, %v1093_v17  ;;  %v3273_v17 = vld [vmem:[#allocation8 + $0x24] sm:$0xf]  ;;  %v1220_v53 = vmul.f32 %v1156_v56, %v4054_v46 }
 0x151   : > { %1079 = vmatmul.bf16.gmra.mxu3 %v2812_v59  ;;  %v1557_v24 = vadd.f32 1.0, %v3445_v5  ;;  %v3447_v41 = vpop.eup %3446  ;;  %v1408_v59 = vmul.f32 0.7978846, %v1344_v42  ;;  %v1418_v5 = vmul.f32 0.7978846, %v1354_v47 }
 0x152   : > { %3448 = vtanh.f32 %v1430_v20  ;;  %v1241_v30 = vmul.f32 %v1177_v15, %v4219_v3  ;;  %v1542_v8 = vadd.f32 1.0, %v3447_v41  ;;  %v1160_v56 = vmul.f32 0.044715, %v4070_v6 }
 0x153   : > { %v951_v33 = vpop.f32.mrf.mxu2  ;;  %v4230_v37 = vpop.f32.mrf.mxu0  ;;  %v1621_v40 = vmul.f32 %v1557_v24, %v1109_v23  ;;  %3450 = vtanh.f32 %v1417_v28  ;;  %v2961_v23 = vld [vmem:[#allocation8 + $0x28] sm:$0xf0]  ;;  %v3289_v24 = vld [vmem:[#allocation8 + $0xa4] sm:$0xf] }
 0x154   : > { %v952_v34 = vadd.f32 %v951_v33, %v4024_v43  ;;  %v1040_v35 = vpop.f32.mrf.mxu3  ;;  %v1305_v27 = vmul.f32 %v1241_v30, %v4219_v3  ;;  %v4234_v45 = vpop.f32.mrf.mxu1  ;;  %3452 = vtanh.f32 %v1407_v25  ;;  %v2964_v28 = vor.u32 %v3273_v17, %v2961_v23  ;;  %v3025_v30 = vld [vmem:[#allocation8 + $0xa8] sm:$0xf0]  ;;  %v2959_v33 = vld [vmem:[#allocation8 + $0x20] sm:$0xf]  ;;  %v3290_v25 = vld [vmem:[#allocation8 + $0xa4] sm:$0xf0] }
 0x155   : > { %v4238_v51 = vadd.f32 %v1621_v40, %v1605_v39  ;;  %v3028_v41 = vor.u32 %v3289_v24, %v3025_v30  ;;  %v1411_v23 = vmul.f32 0.7978846, %v1347_v29  ;;  %v1097_v29 = vmul.f32 0.5, %v4072_v7 }
 0x156   : > { %v4236_v10 = vadd.f32 %v1040_v35, %v952_v34  ;;  %v1369_v50 = vadd.f32 %v1305_v27, %v4219_v3  ;;  %v3274_v34 = vld [vmem:[#allocation8 + $0x24] sm:$0xf0]  ;;  %v3023_v27 = vld [vmem:[#allocation8 + $0xa0] sm:$0xf]  ;;  %2010 = vmatpush.bf16.msrb.mxu2 %v2964_v28  ;;  %v1284_v28 = vmul.f32 %v1220_v53, %v4054_v46 }
 0x157   : > { %v2960_v47 = vor.u32 %v3274_v34, %v2959_v33  ;;  %2039 = vmatpush.bf16.msrb.mxu3 %v3028_v41  ;;  %v761_v33 = vadd.f32 %v4102_v4, %v4017_v31 }
 0x158   : > { %v3449_v61 = vpop.eup %3448  ;;  %v1178_v20 = vmul.f32 0.044715, %v4236_v10  ;;  %v1433_v42 = vmul.f32 0.7978846, %v1369_v50  ;;  %v1606_v50 = vmul.f32 %v1542_v8, %v1094_v13 }
 0x159   : > { %v1558_v14 = vadd.f32 1.0, %v3449_v61  ;;  %v3451_v61 = vpop.eup %3450  ;;  %1952 = vmatpush.bf16.msrb.mxu0 %v2960_v47 }
 0x15a   : > { %v1242_v15 = vmul.f32 %v1178_v20, %v4236_v10  ;;  %3454 = vtanh.f32 %v1433_v42  ;;  %v1223_v20 = vmul.f32 %v1159_v2, %v4062_v55  ;;  %v3453_v13 = vpop.eup %3452  ;;  %v1545_v8 = vadd.f32 1.0, %v3451_v61 }
 0x15b   : > { %v4249_v54 = vpop.f32.mrf.mxu2  ;;  %v1622_v35 = vmul.f32 %v1558_v14, %v1110_v11  ;;  %v778_v40 = vpop.f32.mrf.mxu0  ;;  %v3024_v11 = vor.u32 %v3290_v25, %v3023_v27  ;;  %3456 = vtanh.f32 %v1418_v5  ;;  %v1224_v25 = vmul.f32 %v1160_v56, %v4070_v6 }
 0x15c   : > { %v1306_v63 = vmul.f32 %v1242_v15, %v4236_v10  ;;  %v4252_v39 = vpop.f32.mrf.mxu3  ;;  %v779_v42 = vadd.f32 %v778_v40, %v4017_v31  ;;  %v867_v17 = vpop.f32.mrf.mxu1  ;;  %3458 = vtanh.f32 %v1408_v59  ;;  %v1287_v5 = vmul.f32 %v1223_v20, %v4062_v55 }
 0x15d   : > { %v4258_v15 = vadd.f32 %v1622_v35, %v1606_v50  ;;  %1981 = vmatpush.bf16.msrb.mxu1 %v3024_v11  ;;  %v1113_v35 = vmul.f32 0.5, %v4219_v3  ;;  %v1535_v40 = vadd.f32 1.0, %v3453_v13  ;;  %v1609_v7 = vmul.f32 %v1545_v8, %v1097_v29 }
 0x15e   : > { %v1370_v14 = vadd.f32 %v1306_v63, %v4236_v10  ;;  %v4260_v24 = vadd.f32 %v867_v17, %v779_v42  ;;  %v1087_v63 = vmul.f32 0.5, %v4030_v60  ;;  %v1088_v3 = vmul.f32 0.5, %v4038_v9 }
 0x15f   : > { %v1091_v20 = vmul.f32 0.5, %v4046_v21  ;;  %v4279_v60 = vadd.f32 %v4105_v12, %v761_v33  ;;  %v4291_v9 = vmul.f32 0.5, %v4054_v46  ;;  %v1098_v33 = vmul.f32 0.5, %v4078_v18 }
 0x160   : > { %v1434_v2 = vmul.f32 0.7978846, %v1370_v14  ;;  %v3455_v30 = vpop.eup %3454  ;;  %v1181_v34 = vmul.f32 0.044715, %v4260_v24  ;;  %v1348_v14 = vadd.f32 %v1284_v28, %v4054_v46  ;;  %v4294_v12 = vmul.f32 %v1535_v40, %v1087_v63 }
 0x161   : > { %v1561_v59 = vadd.f32 1.0, %v3455_v30  ;;  %v3457_v27 = vpop.eup %3456  ;;  %v1288_v30 = vmul.f32 %v1224_v25, %v4070_v6  ;;  %v1163_v28 = vmul.f32 0.044715, %v4081_v22  ;;  %v1167_v29 = vmul.f32 0.044715, %v4279_v60 }
 0x162   : > { %3460 = vtanh.f32 %v1434_v2  ;;  %v1245_v41 = vmul.f32 %v1181_v34, %v4260_v24  ;;  %v3459_v11 = vpop.eup %3458  ;;  %v1546_v2 = vadd.f32 1.0, %v3457_v27  ;;  %v1114_v46 = vmul.f32 0.5, %v4236_v10 }
 0x163   : > { %3462 = vtanh.f32 %v1411_v23  ;;  %v956_v47 = vpop.f32.mrf.mxu2  ;;  %v4274_v61 = vpop.f32.mrf.mxu0  ;;  %v1625_v53 = vmul.f32 %v1561_v59, %v1113_v35  ;;  %v1351_v23 = vadd.f32 %v1287_v5, %v4062_v55  ;;  %v1412_v63 = vmul.f32 0.7978846, %v1348_v14 }
 0x164   : > { %v957_v4 = vadd.f32 %v956_v47, %v4024_v43  ;;  %v1045_v50 = vpop.f32.mrf.mxu3  ;;  %v1309_v42 = vmul.f32 %v1245_v41, %v4260_v24  ;;  %v4282_v17 = vpop.f32.mrf.mxu1  ;;  %v1536_v41 = vadd.f32 1.0, %v3459_v11  ;;  %v939_v27 = vadd.f32 %v4120_v32, %v4024_v43 }
 0x165   : > { %v4288_v56 = vadd.f32 %v1625_v53, %v1609_v7  ;;  %v1415_v40 = vmul.f32 0.7978846, %v1351_v23  ;;  %v1610_v25 = vmul.f32 %v1546_v2, %v1098_v33  ;;  %v1227_v7 = vmul.f32 %v1163_v28, %v4081_v22 }
 0x166   : > { %v4286_v13 = vadd.f32 %v1045_v50, %v957_v4  ;;  %v1373_v21 = vadd.f32 %v1309_v42, %v4260_v24  ;;  %v1352_v50 = vadd.f32 %v1288_v30, %v4070_v6  ;;  %v1231_v14 = vmul.f32 %v1167_v29, %v4279_v60 }
 0x167   : > { %v766_v32 = vadd.f32 %v4138_v16, %v4017_v31  ;;  %v4322_v33 = vmul.f32 %v1536_v41, %v1088_v3  ;;  %v4325_v28 = vadd.f32 %v4123_v36, %v939_v27  ;;  %v944_v16 = vadd.f32 %v4159_v57, %v4024_v43 }
 0x168   : > { %v3461_v8 = vpop.eup %3460  ;;  %v1182_v5 = vmul.f32 0.044715, %v4286_v13  ;;  %v1437_v35 = vmul.f32 0.7978846, %v1373_v21  ;;  %v1164_v29 = vmul.f32 0.044715, %v4092_v44  ;;  %v1295_v3 = vmul.f32 %v1231_v14, %v4279_v60 }
 0x169   : > { %v3463_v34 = vpop.eup %3462  ;;  %v1562_v59 = vadd.f32 1.0, %v3461_v8  ;;  %v4319_v8 = vmul.f32 0.5, %v4062_v55  ;;  %v4337_v41 = vadd.f32 %v4141_v19, %v766_v32  ;;  %v771_v57 = vadd.f32 %v4180_v52, %v4017_v31 }
 0x16a   : > { %v1246_v47 = vmul.f32 %v1182_v5, %v4286_v13  ;;  %3464 = vtanh.f32 %v1437_v35  ;;  %v1539_v11 = vadd.f32 1.0, %v3463_v34  ;;  %v1416_v34 = vmul.f32 0.7978846, %v1352_v50 }
 0x16b   : > { %v4305_v18 = vpop.f32.mrf.mxu2  ;;  %v1626_v4 = vmul.f32 %v1562_v59, %v1114_v46  ;;  %v783_v42 = vpop.f32.mrf.mxu0  ;;  %3466 = vtanh.f32 %v1412_v63  ;;  %v1291_v59 = vmul.f32 %v1227_v7, %v4081_v22  ;;  %v1117_v63 = vmul.f32 0.5, %v4260_v24 }
 0x16c   : > { %v1310_v10 = vmul.f32 %v1246_v47, %v4286_v13  ;;  %v4310_v53 = vpop.f32.mrf.mxu3  ;;  %v784_v23 = vadd.f32 %v783_v42, %v4017_v31  ;;  %v872_v21 = vpop.f32.mrf.mxu1  ;;  %3468 = vtanh.f32 %v1415_v40  ;;  %v4332_v35 = vmul.f32 %v1539_v11, %v1091_v20  ;;  %v3271_v47 = vld [vmem:[#allocation8 + $0x14] sm:$0xf]  ;;  %v2953_v20 = vld [vmem:[#allocation8 + $0x18] sm:$0xf0] }
 0x16d   : > { %v4316_v2 = vadd.f32 %v1626_v4, %v1610_v25  ;;  %v1168_v27 = vmul.f32 0.044715, %v4325_v28  ;;  %v4345_v25 = vadd.f32 %v4162_v1, %v944_v16  ;;  %v2956_v50 = vor.u32 %v3271_v47, %v2953_v20 }
 0x16e   : > { %v1374_v30 = vadd.f32 %v1310_v10, %v4286_v13  ;;  %v4329_v5 = vadd.f32 %v872_v21, %v784_v23  ;;  %v4349_v10 = vmul.f32 0.5, %v4070_v6  ;;  %v1228_v52 = vmul.f32 %v1164_v29, %v4092_v44 }
 0x16f   : > { %v1355_v1 = vadd.f32 %v1291_v59, %v4081_v22  ;;  %v1171_v23 = vmul.f32 0.044715, %v4337_v41  ;;  %2011 = vmatpush.bf16.msrb.mxu2 %v2956_v50  ;;  %v1359_v6 = vadd.f32 %v1295_v3, %v4279_v60  ;;  %v4362_v16 = vadd.f32 %v4185_v62, %v771_v57 }
 0x170   : > { %v1438_v46 = vmul.f32 0.7978846, %v1374_v30  ;;  %v3465_v55 = vpop.eup %3464  ;;  %v1185_v36 = vmul.f32 0.044715, %v4329_v5  ;;  %v1232_v59 = vmul.f32 %v1168_v27, %v4325_v28  ;;  %v1292_v3 = vmul.f32 %v1228_v52, %v4092_v44 }
 0x171   : > { %v1565_v40 = vadd.f32 1.0, %v3465_v55  ;;  %v3467_v7 = vpop.eup %3466  ;;  %v3017_v55 = vld [vmem:[#allocation8 + $0x98] sm:$0xf0]  ;;  %v1419_v27 = vmul.f32 0.7978846, %v1355_v1  ;;  %v949_v1 = vadd.f32 %v4205_v38, %v4024_v43 }
 0x172   : > { %3470 = vtanh.f32 %v1438_v46  ;;  %v1249_v4 = vmul.f32 %v1185_v36, %v4329_v5  ;;  %v3469_v32 = vpop.eup %3468  ;;  %v3287_v46 = vld [vmem:[#allocation8 + $0x94] sm:$0xf]  ;;  %v1172_v36 = vmul.f32 0.044715, %v4345_v25  ;;  %v1540_v57 = vadd.f32 1.0, %v3467_v7 }
 0x173   : > { %v961_v19 = vpop.f32.mrf.mxu2  ;;  %v4353_v11 = vpop.f32.mrf.mxu0  ;;  %v1629_v14 = vmul.f32 %v1565_v40, %v1117_v63  ;;  %3472 = vtanh.f32 %v1416_v34  ;;  %v3020_v40 = vor.u32 %v3287_v46, %v3017_v55  ;;  %v1543_v20 = vadd.f32 1.0, %v3469_v32  ;;  %v2951_v32 = vld [vmem:[#allocation8 + $0x10] sm:$0xf] }
 0x174   : > { %v962_v24 = vadd.f32 %v961_v19, %v4024_v43  ;;  %v1050_v42 = vpop.f32.mrf.mxu3  ;;  %v1313_v21 = vmul.f32 %v1249_v4, %v4329_v5  ;;  %v4358_v30 = vpop.f32.mrf.mxu1  ;;  %v1235_v4 = vmul.f32 %v1171_v23, %v4337_v41  ;;  %v1118_v19 = vmul.f32 0.5, %v4286_v13  ;;  %v3272_v23 = vld [vmem:[#allocation8 + $0x14] sm:$0xf0]  ;;  %v3015_v13 = vld [vmem:[#allocation8 + $0x90] sm:$0xf] }
 0x175   : > { %v4367_v34 = vadd.f32 %v4146_v26, %v1629_v14  ;;  %2040 = vmatpush.bf16.msrb.mxu3 %v3020_v40  ;;  %v1296_v52 = vmul.f32 %v1232_v59, %v4325_v28  ;;  %v1236_v46 = vmul.f32 %v1172_v36, %v4345_v25  ;;  %v2952_v59 = vor.u32 %v3272_v23, %v2951_v32 }
 0x176   : > { %v4364_v29 = vadd.f32 %v1050_v42, %v962_v24  ;;  %v1377_v63 = vadd.f32 %v1313_v21, %v4329_v5  ;;  %v1423_v24 = vmul.f32 0.7978846, %v1359_v6  ;;  %v1175_v42 = vmul.f32 0.044715, %v4362_v16 }
 0x177   : > { %4968 = vst [vmem:[#allocation18_spill] sm:$0xff] %v4367_v34  ;;  %v1299_v36 = vmul.f32 %v1235_v4, %v4337_v41  ;;  %1953 = vmatpush.bf16.msrb.mxu0 %v2952_v59  ;;  %v1300_v4 = vmul.f32 %v1236_v46, %v4345_v25  ;;  %v781_v32 = vadd.f32 %v4274_v61, %v4017_v31 }
 0x178   : > { %v3471_v47 = vpop.eup %3470  ;;  %v1186_v62 = vmul.f32 0.044715, %v4364_v29  ;;  %v1441_v50 = vmul.f32 0.7978846, %v1377_v63  ;;  %v1356_v63 = vadd.f32 %v1292_v3, %v4092_v44  ;;  %v1239_v3 = vmul.f32 %v1175_v42, %v4362_v16 }
 0x179   : > { %v1566_v26 = vadd.f32 1.0, %v3471_v47  ;;  %v3473_v21 = vpop.eup %3472  ;;  %v4408_v42 = vmul.f32 %v1543_v20, %v4319_v8  ;;  %v4416_v8 = vadd.f32 %v4282_v17, %v781_v32 }
 0x17a   : > { %v1250_v14 = vmul.f32 %v1186_v62, %v4364_v29  ;;  %3474 = vtanh.f32 %v1441_v50  ;;  %v3288_v62 = vld [vmem:[#allocation8 + $0x94] sm:$0xf0]  ;;  %v1303_v61 = vmul.f32 %v1239_v3, %v4362_v16 }
 0x17b   : > { %v4380_v7 = vpop.f32.mrf.mxu2  ;;  %v1630_v55 = vmul.f32 %v1566_v26, %v1118_v19  ;;  %v788_v47 = vpop.f32.mrf.mxu0  ;;  %v3016_v34 = vor.u32 %v3288_v62, %v3015_v13  ;;  %3476 = vtanh.f32 %v1423_v24  ;;  %v4396_v26 = vmul.f32 %v1540_v57, %v4291_v9 }
 0x17c   : > { %v1314_v6 = vmul.f32 %v1250_v14, %v4364_v29  ;;  %v4386_v40 = vpop.f32.mrf.mxu3  ;;  %v789_v50 = vadd.f32 %v788_v47, %v4017_v31  ;;  %v877_v22 = vpop.f32.mrf.mxu1  ;;  %v1360_v14 = vadd.f32 %v1296_v52, %v4325_v28  ;;  %v1544_v13 = vadd.f32 1.0, %v3473_v21 }
 0x17d   : > { %v4391_v19 = vadd.f32 %v4165_v48, %v1630_v55  ;;  %1982 = vmatpush.bf16.msrb.mxu1 %v3016_v34  ;;  %v4405_v48 = vadd.f32 %v4209_v49, %v949_v1  ;;  %3478 = vtanh.f32 %v1419_v27  ;;  %v1420_v57 = vmul.f32 0.7978846, %v1356_v63 }
 0x17e   : > { %v1378_v38 = vadd.f32 %v1314_v6, %v4364_v29  ;;  %v4402_v23 = vadd.f32 %v877_v22, %v789_v50  ;;  %v1363_v52 = vadd.f32 %v1299_v36, %v4337_v41  ;;  %v1121_v22 = vmul.f32 0.5, %v4329_v5 }
 0x17f   : > { %v1424_v49 = vmul.f32 0.7978846, %v1360_v14  ;;  %v1364_v55 = vadd.f32 %v1300_v4, %v4345_v25  ;;  %v1176_v63 = vmul.f32 0.044715, %v4405_v48  ;;  %v959_v1 = vadd.f32 %v4305_v18, %v4024_v43 }
 0x180   : > { %v1442_v24 = vmul.f32 0.7978846, %v1378_v38  ;;  %v3475_v9 = vpop.eup %3474  ;;  %v1189_v46 = vmul.f32 0.044715, %v4402_v23  ;;  %v1103_v62 = vmul.f32 0.5, %v4279_v60  ;;  %v4430_v50 = vmul.f32 %v1544_v13, %v4349_v10 }
 0x181   : > { %v1569_v34 = vadd.f32 1.0, %v3475_v9  ;;  %v3477_v21 = vpop.eup %3476  ;;  %v1427_v3 = vmul.f32 0.7978846, %v1363_v52  ;;  %v1367_v38 = vadd.f32 %v1303_v61, %v4362_v16  ;;  %v1183_v60 = vmul.f32 0.044715, %v4416_v8 }
 0x182   : > { %3480 = vtanh.f32 %v1442_v24  ;;  %v1253_v20 = vmul.f32 %v1189_v46, %v4402_v23  ;;  %v1551_v32 = vadd.f32 1.0, %v3477_v21  ;;  %v1240_v10 = vmul.f32 %v1176_v63, %v4405_v48 }
 0x183   : > { %v966_v27 = vpop.f32.mrf.mxu2  ;;  %v4423_v5 = vpop.f32.mrf.mxu0  ;;  %v1633_v59 = vmul.f32 %v1569_v34, %v1121_v22  ;;  %3482 = vtanh.f32 %v1420_v57  ;;  %v1428_v57 = vmul.f32 0.7978846, %v1364_v55  ;;  %v4442_v13 = vadd.f32 %v4310_v53, %v959_v1 }
 0x184   : > { %v967_v6 = vadd.f32 %v966_v27, %v4024_v43  ;;  %v1055_v47 = vpop.f32.mrf.mxu3  ;;  %v1317_v17 = vmul.f32 %v1253_v20, %v4402_v23  ;;  %v4427_v36 = vpop.f32.mrf.mxu1  ;;  %3484 = vtanh.f32 %v1424_v49  ;;  %v1122_v61 = vmul.f32 0.5, %v4364_v29 }
 0x185   : > { %v4436_v14 = vadd.f32 %v4190_v0, %v1633_v59  ;;  %v3479_v4 = vpop.eup %3478  ;;  %v786_v0 = vadd.f32 %v4353_v11, %v4017_v31  ;;  %3486 = vtanh.f32 %v1427_v3  ;;  %v1431_v34 = vmul.f32 0.7978846, %v1367_v38 }
 0x186   : > { %v4433_v18 = vadd.f32 %v1055_v47, %v967_v6  ;;  %v1381_v24 = vadd.f32 %v1317_v17, %v4402_v23  ;;  %v4449_v20 = vadd.f32 1.0, %v3479_v4  ;;  %v776_v53 = vadd.f32 %v4230_v37, %v4017_v31 }
 0x187   : > { %v1247_v27 = vmul.f32 %v1183_v60, %v4416_v8  ;;  %v1184_v29 = vmul.f32 0.044715, %v4442_v13  ;;  %v1615_v47 = vmul.f32 %v1551_v32, %v1103_v62  ;;  %v1304_v17 = vmul.f32 %v1240_v10, %v4405_v48 }
 0x188   : > { %v3481_v9 = vpop.eup %3480  ;;  %v1190_v52 = vmul.f32 0.044715, %v4433_v18  ;;  %v1445_v46 = vmul.f32 0.7978846, %v1381_v24  ;;  %v4464_v37 = vadd.f32 %v4358_v30, %v786_v0  ;;  %v1104_v60 = vmul.f32 0.5, %v4325_v28 }
 0x189   : > { %v1570_v22 = vadd.f32 1.0, %v3481_v9  ;;  %v4451_v55 = vpop.eup %3482  ;;  %v964_v24 = vadd.f32 %v4380_v7, %v4024_v43  ;;  %v1107_v32 = vmul.f32 0.5, %v4337_v41  ;;  %v4476_v9 = vadd.f32 %v4234_v45, %v776_v53 }
 0x18a   : > { %v1254_v49 = vmul.f32 %v1190_v52, %v4433_v18  ;;  %4969 = vst [vmem:[#allocation19_spill] sm:$0xff] %v4451_v55  ;;  %3488 = vtanh.f32 %v1445_v46  ;;  %v3485_v59 = vpop.eup %3484  ;;  %v1311_v30 = vmul.f32 %v1247_v27, %v4416_v8  ;;  %v1248_v28 = vmul.f32 %v1184_v29, %v4442_v13 }
 0x18b   : > { %v4456_v21 = vpop.f32.mrf.mxu2  ;;  %v1634_v11 = vmul.f32 %v1570_v22, %v1122_v61  ;;  %3490 = vtanh.f32 %v1428_v57  ;;  %v793_v6 = vpop.f32.mrf.mxu0  ;;  %v4486_v7 = vadd.f32 %v1615_v47, %v4294_v12  ;;  %v1552_v46 = vadd.f32 1.0, %v3485_v59 }
 0x18c   : > { %v1318_v63 = vmul.f32 %v1254_v49, %v4433_v18  ;;  %v4460_v1 = vpop.f32.mrf.mxu3  ;;  %v794_v3 = vadd.f32 %v793_v6, %v4017_v31  ;;  %v882_v38 = vpop.f32.mrf.mxu1  ;;  %3492 = vtanh.f32 %v1431_v34  ;;  %v1368_v41 = vadd.f32 %v1304_v17, %v4405_v48  ;;  %v2945_v6 = vld [vmem:[#allocation8 + $0x8] sm:$0xf0] }
 0x18d   : > { %v4468_v4 = vadd.f32 %v4214_v58, %v1634_v11  ;;  %v3487_v10 = vpop.eup %3486  ;;  %v4482_v58 = vmul.f32 0.5, %v4345_v25  ;;  %v1187_v45 = vmul.f32 0.044715, %v4464_v37  ;;  %v4492_v34 = vadd.f32 %v4386_v40, %v964_v24 }
 0x18e   : > { %v1382_v62 = vadd.f32 %v1318_v63, %v4433_v18  ;;  %v4479_v57 = vadd.f32 %v882_v38, %v794_v3  ;;  %v1125_v25 = vmul.f32 0.5, %v4402_v23  ;;  %v1179_v53 = vmul.f32 0.044715, %v4476_v9  ;;  %v3269_v63 = vld [vmem:[#allocation8 + $0x4] sm:$0xf] }
 0x18f   : > { %v954_v12 = vadd.f32 %v4249_v54, %v4024_v43  ;;  %v1375_v27 = vadd.f32 %v1311_v30, %v4416_v8  ;;  %v1312_v40 = vmul.f32 %v1248_v28, %v4442_v13  ;;  %v2948_v3 = vor.u32 %v3269_v63, %v2945_v6 }
 0x190   : > { %v1446_v52 = vmul.f32 0.7978846, %v1382_v62  ;;  %v3489_v0 = vpop.eup %3488  ;;  %v1193_v61 = vmul.f32 0.044715, %v4479_v57  ;;  %v1251_v24 = vmul.f32 %v1187_v45, %v4464_v37  ;;  %v1616_v30 = vmul.f32 %v1552_v46, %v1104_v60 }
 0x191   : > { %v3491_v22 = vpop.eup %3490  ;;  %v1573_v49 = vadd.f32 1.0, %v3489_v0  ;;  %v1432_v0 = vmul.f32 0.7978846, %v1368_v41  ;;  %2012 = vmatpush.bf16.msrb.mxu2 %v2948_v3  ;;  %v4517_v63 = vadd.f32 %v4252_v39, %v954_v12  ;;  %v1439_v60 = vmul.f32 0.7978846, %v1375_v27 }
 0x192   : > { %3494 = vtanh.f32 %v1446_v52  ;;  %v1257_v11 = vmul.f32 %v1193_v61, %v4479_v57  ;;  %v3493_v47 = vpop.eup %3492  ;;  %v1555_v52 = vadd.f32 1.0, %v3487_v10  ;;  %v1188_v61 = vmul.f32 0.044715, %v4492_v34  ;;  %v2943_v39 = vld [vmem:[#allocation8] sm:$0xf] }
 0x193   : > { %v971_v29 = vpop.f32.mrf.mxu2  ;;  %v4502_v23 = vpop.f32.mrf.mxu0  ;;  %v1637_v38 = vmul.f32 %v1573_v49, %v1125_v25  ;;  %v1556_v45 = vadd.f32 1.0, %v3491_v22  ;;  %v1559_v49 = vadd.f32 1.0, %v3493_v47  ;;  %v1376_v10 = vadd.f32 %v1312_v40, %v4442_v13  ;;  %v3285_v47 = vld [vmem:[#allocation8 + $0x84] sm:$0xf] }
 0x194   : > { %v972_v59 = vadd.f32 %v971_v29, %v4024_v43  ;;  %v1060_v17 = vpop.f32.mrf.mxu3  ;;  %v1321_v54 = vmul.f32 %v1257_v11, %v4479_v57  ;;  %v4506_v62 = vpop.f32.mrf.mxu1  ;;  %v1243_v29 = vmul.f32 %v1179_v53, %v4476_v9  ;;  %v1315_v41 = vmul.f32 %v1251_v24, %v4464_v37  ;;  %v3007_v24 = vld [vmem:[#allocation8 + $0x80] sm:$0xf] }
 0x195   : > { %v4512_v28 = vadd.f32 %v4238_v51, %v1637_v38  ;;  %v1126_v51 = vmul.f32 0.5, %v4433_v18  ;;  %3496 = vtanh.f32 %v1432_v0  ;;  %v1252_v53 = vmul.f32 %v1188_v61, %v4492_v34  ;;  %v3270_v38 = vld [vmem:[#allocation8 + $0x4] sm:$0xf0] }
 0x196   : > { %v4509_v44 = vadd.f32 %v1060_v17, %v972_v59  ;;  %v1385_v25 = vadd.f32 %v1321_v54, %v4479_v57  ;;  %v3009_v17 = vld [vmem:[#allocation8 + $0x88] sm:$0xf0]  ;;  %v1619_v12 = vmul.f32 %v1555_v52, %v1107_v32  ;;  %v1307_v27 = vmul.f32 %v1243_v29, %v4476_v9  ;;  %v3286_v54 = vld [vmem:[#allocation8 + $0x84] sm:$0xf0] }
 0x197   : > { %v3012_v3 = vor.u32 %v3285_v47, %v3009_v17  ;;  %v1180_v0 = vmul.f32 0.044715, %v4517_v63  ;;  %v3008_v55 = vor.u32 %v3286_v54, %v3007_v24  ;;  %v1440_v32 = vmul.f32 0.7978846, %v1376_v10 }
 0x198   : > { %v3495_v11 = vpop.eup %3494  ;;  %v1194_v46 = vmul.f32 0.044715, %v4509_v44  ;;  %v1449_v6 = vmul.f32 0.7978846, %v1385_v25  ;;  %v1379_v52 = vadd.f32 %v1315_v41, %v4464_v37  ;;  %v4541_v17 = vadd.f32 %v1616_v30, %v4322_v33 }
 0x199   : > { %v1574_v59 = vadd.f32 1.0, %v3495_v11  ;;  %2041 = vmatpush.bf16.msrb.mxu3 %v3012_v3  ;;  %1983 = vmatpush.bf16.msrb.mxu1 %v3008_v55  ;;  %v1371_v10 = vadd.f32 %v1307_v27, %v4476_v9  ;;  %v791_v41 = vadd.f32 %v4423_v5, %v4017_v31  ;;  %v1620_v55 = vmul.f32 %v1556_v45, %v4482_v58 }
 0x19a   : > { %v1258_v22 = vmul.f32 %v1194_v46, %v4509_v44  ;;  %3498 = vtanh.f32 %v1449_v6  ;;  %v2944_v46 = vor.u32 %v3270_v38, %v2943_v39  ;;  %v1443_v30 = vmul.f32 0.7978846, %v1379_v52 }
 0x19b   : > { %v4526_v40 = vpop.f32.mrf.mxu2  ;;  %v1638_v18 = vmul.f32 %v1574_v59, %v1126_v51  ;;  %v798_v11 = vpop.f32.mrf.mxu0  ;;  %v1111_v51 = vmul.f32 0.5, %v4362_v16  ;;  %v1316_v59 = vmul.f32 %v1252_v53, %v4492_v34  ;;  %3500 = vtanh.f32 %v1439_v60 }
 0x19c   : > { %v1322_v61 = vmul.f32 %v1258_v22, %v4509_v44  ;;  %v4530_v25 = vpop.f32.mrf.mxu3  ;;  %v799_v29 = vadd.f32 %v798_v11, %v4017_v31  ;;  %v887_v6 = vpop.f32.mrf.mxu1  ;;  %1954 = vmatpush.bf16.msrb.mxu0 %v2944_v46  ;;  %v1244_v16 = vmul.f32 %v1180_v0, %v4517_v63  ;;  %v4550_v53 = vadd.f32 %v1619_v12, %v4332_v35 }
 0x19d   : > { %v4535_v47 = vadd.f32 %v4258_v15, %v1638_v18  ;;  %v3497_v15 = vpop.eup %3496  ;;  %3502 = vtanh.f32 %v1440_v32  ;;  %v1623_v60 = vmul.f32 %v1559_v49, %v1111_v51  ;;  %v1380_v27 = vadd.f32 %v1316_v59, %v4492_v34 }
 0x19e   : > { %v1386_v22 = vadd.f32 %v1322_v61, %v4509_v44  ;;  %v4546_v39 = vadd.f32 %v887_v6, %v799_v29  ;;  %v1129_v5 = vmul.f32 0.5, %v4479_v57  ;;  %v4557_v54 = vmul.f32 0.5, %v4405_v48 }
 0x19f   : > { %v1435_v18 = vmul.f32 0.7978846, %v1371_v10  ;;  %v4560_v35 = vadd.f32 %v4427_v36, %v791_v41  ;;  %v1308_v12 = vmul.f32 %v1244_v16, %v4517_v63  ;;  %v4566_v11 = vadd.f32 %v1620_v55, %v4396_v26 }
 0x1a0   : > { %v1450_v3 = vmul.f32 0.7978846, %v1386_v22  ;;  %v3499_v38 = vpop.eup %3498  ;;  %v1197_v33 = vmul.f32 0.044715, %v4546_v39  ;;  %v4571_v52 = vadd.f32 %v1623_v60, %v4408_v42  ;;  %v1444_v6 = vmul.f32 0.7978846, %v1380_v27 }
 0x1a1   : > { %v1577_v24 = vadd.f32 1.0, %v3499_v38  ;;  %v3501_v46 = vpop.eup %3500  ;;  %v1560_v51 = vadd.f32 1.0, %v3497_v15  ;;  %v1191_v22 = vmul.f32 0.044715, %v4560_v35  ;;  %v969_v42 = vadd.f32 %v4456_v21, %v4024_v43 }
 0x1a2   : > { %3504 = vtanh.f32 %v1450_v3  ;;  %v1261_v58 = vmul.f32 %v1197_v33, %v4546_v39  ;;  %v1372_v3 = vadd.f32 %v1308_v12, %v4517_v63  ;;  %v1567_v15 = vadd.f32 1.0, %v3501_v46 }
 0x1a3   : > { %v976_v45 = vpop.f32.mrf.mxu2  ;;  %v800_v61 = vpop.f32.mrf.mxu0  ;;  %v1641_v57 = vmul.f32 %v1577_v24, %v1129_v5  ;;  %3506 = vtanh.f32 %v1443_v30  ;;  %v1130_v33 = vmul.f32 0.5, %v4509_v44  ;;  %v1119_v60 = vmul.f32 0.5, %v4416_v8 }
 0x1a4   : > { %v977_v49 = vadd.f32 %v976_v45, %v4024_v43  ;;  %v1065_v0 = vpop.f32.mrf.mxu3  ;;  %v1325_v48 = vmul.f32 %v1261_v58, %v4546_v39  ;;  %v801_v32 = vadd.f32 %v800_v61, %v4017_v31  ;;  %v889_v36 = vpop.f32.mrf.mxu1  ;;  %3508 = vtanh.f32 %v1435_v18 }
 0x1a5   : > { %v4576_v59 = vadd.f32 %v4288_v56, %v1641_v57  ;;  %v3503_v26 = vpop.eup %3502  ;;  %3510 = vtanh.f32 %v1444_v6  ;;  %v1255_v18 = vmul.f32 %v1191_v22, %v4560_v35  ;;  %v1120_v12 = vmul.f32 0.5, %v4442_v13 }
 0x1a6   : > { %v4573_v29 = vadd.f32 %v1065_v0, %v977_v49  ;;  %v1389_v10 = vadd.f32 %v1325_v48, %v4546_v39  ;;  %v4580_v41 = vadd.f32 %v889_v36, %v801_v32  ;;  %v1568_v5 = vadd.f32 1.0, %v3503_v26 }
 0x1a7   : > { %v1631_v61 = vmul.f32 %v1567_v15, %v1119_v60  ;;  %v4598_v46 = vadd.f32 %v4460_v1, %v969_v42  ;;  %v4605_v13 = vmul.f32 0.7978846, %v1372_v3  ;;  %v4617_v3 = vmul.f32 %v1560_v51, %v4557_v54 }
 0x1a8   : > { %v3505_v16 = vpop.eup %3504  ;;  %v1198_v55 = vmul.f32 0.044715, %v4573_v29  ;;  %v1453_v38 = vmul.f32 0.7978846, %v1389_v10  ;;  %v1199_v56 = vmul.f32 0.044715, %v4580_v41 }
 0x1a9   : > { %v1578_v30 = vadd.f32 1.0, %v3505_v16  ;;  %v3507_v24 = vpop.eup %3506  ;;  %v1319_v16 = vmul.f32 %v1255_v18, %v4560_v35 }
 0x1aa   : > { %v1262_v27 = vmul.f32 %v1198_v55, %v4573_v29  ;;  %3512 = vtanh.f32 %v1453_v38  ;;  %v1263_v21 = vmul.f32 %v1199_v56, %v4580_v41  ;;  %v4595_v57 = vpop.eup %3508  ;;  %v1571_v10 = vadd.f32 1.0, %v3507_v24 }
 0x1ab   : > { %v978_v58 = vpop.f32.mrf.mxu2  ;;  %v1642_v45 = vmul.f32 %v1578_v30, %v1130_v33  ;;  %v803_v8 = vpop.f32.mrf.mxu0  ;;  %v1632_v55 = vmul.f32 %v1568_v5, %v1120_v12  ;;  %v1192_v30 = vmul.f32 0.044715, %v4598_v46  ;;  %v1695_v24 = vadd.f32 %v4486_v7, %v1631_v61 }
 0x1ac   : > { %v1326_v49 = vmul.f32 %v1262_v27, %v4573_v29  ;;  %v979_v44 = vadd.f32 %v978_v58, %v4024_v43  ;;  %v1067_v0 = vpop.f32.mrf.mxu3  ;;  %v1327_v48 = vmul.f32 %v1263_v21, %v4580_v41  ;;  %v804_v32 = vadd.f32 %v803_v8, %v4017_v31  ;;  %v892_v36 = vpop.f32.mrf.mxu1 }
 0x1ad   : > { %v4603_v6 = vadd.f32 %v4316_v2, %v1642_v45  ;;  %v3511_v15 = vpop.eup %3510  ;;  %v1123_v2 = vmul.f32 0.5, %v4464_v37  ;;  %v1124_v21 = vmul.f32 0.5, %v4492_v34  ;;  %v1383_v58 = vadd.f32 %v1319_v16, %v4560_v35 }
 0x1ae   : > { %v1390_v26 = vadd.f32 %v1326_v49, %v4573_v29  ;;  %v4608_v22 = vadd.f32 %v1067_v0, %v979_v44  ;;  %v1391_v1 = vadd.f32 %v1327_v48, %v4580_v41  ;;  %v4612_v42 = vadd.f32 %v892_v36, %v804_v32 }
 0x1af   : > { %v1635_v18 = vmul.f32 %v1571_v10, %v1123_v2  ;;  %v4627_v51 = vadd.f32 %v4541_v17, %v1632_v55  ;;  %v1572_v0 = vadd.f32 1.0, %v3511_v15  ;;  %v1256_v8 = vmul.f32 %v1192_v30, %v4598_v46 }
 0x1b0   : > { %v1454_v38 = vmul.f32 0.7978846, %v1390_v26  ;;  %v1200_v56 = vmul.f32 0.044715, %v4608_v22  ;;  %v3513_v33 = vpop.eup %3512  ;;  %v1455_v60 = vmul.f32 0.7978846, %v1391_v1 }
 0x1b1   : > { %v1201_v27 = vmul.f32 0.044715, %v4612_v42  ;;  %v1581_v44 = vadd.f32 1.0, %v3513_v33  ;;  %v4635_v32 = vmul.f32 0.5, %v4560_v35  ;;  %v1133_v17 = vmul.f32 0.5, %v4546_v39 }
 0x1b2   : > { %3514 = vtanh.f32 %v1454_v38  ;;  %v1264_v5 = vmul.f32 %v1200_v56, %v4608_v22  ;;  %v4642_v10 = vadd.f32 %v4550_v53, %v1635_v18  ;;  %v1447_v55 = vmul.f32 0.7978846, %v1383_v58 }
 0x1b3   : > { %3516 = vtanh.f32 %v1455_v60  ;;  %v1265_v37 = vmul.f32 %v1201_v27, %v4612_v42  ;;  %v981_v54 = vpop.f32.mrf.mxu2  ;;  %v805_v49 = vpop.f32.mrf.mxu0  ;;  %v4648_v15 = vmul.f32 0.5, %v4598_v46  ;;  %v1645_v39 = vmul.f32 %v1581_v44, %v1133_v17 }
 0x1b4   : > { %v1328_v45 = vmul.f32 %v1264_v5, %v4608_v22  ;;  %v982_v12 = vadd.f32 %v981_v54, %v4024_v43  ;;  %v1070_v7 = vpop.f32.mrf.mxu3  ;;  %v806_v61 = vadd.f32 %v805_v49, %v4017_v31  ;;  %v894_v48 = vpop.f32.mrf.mxu1  ;;  %v4651_v2 = vmul.f32 %v1572_v0, %v1124_v21  ;;  %v4970_v0 = vld [vmem:[#allocation18_spill] sm:$0xff] }
 0x1b5   : > { %v1329_v34 = vmul.f32 %v1265_v37, %v4612_v42  ;;  %v1320_v30 = vmul.f32 %v1256_v8, %v4598_v46  ;;  %v1135_v53 = vmul.f32 0.5, %v4580_v41  ;;  %v796_v37 = vadd.f32 %v4502_v23, %v4017_v31 }
 0x1b6   : > { %v1392_v36 = vadd.f32 %v1328_v45, %v4608_v22  ;;  %v4639_v26 = vadd.f32 %v1070_v7, %v982_v12  ;;  %v4645_v1 = vadd.f32 %v894_v48, %v806_v61  ;;  %v1134_v54 = vmul.f32 0.5, %v4573_v29 }
 0x1b7   : > { %v1393_v16 = vadd.f32 %v1329_v34, %v4612_v42  ;;  %v1709_v8 = vadd.f32 %v4970_v0, %v1645_v39  ;;  %v1384_v34 = vadd.f32 %v1320_v30, %v4598_v46 }
 0x1b8   : > { %v3515_v38 = vpop.eup %3514  ;;  %v1456_v35 = vmul.f32 0.7978846, %v1392_v36  ;;  %v1202_v56 = vmul.f32 0.044715, %v4639_v26  ;;  %v1203_v60 = vmul.f32 0.044715, %v4645_v1 }
 0x1b9   : > { %v3517_v33 = vpop.eup %3516  ;;  %v1457_v27 = vmul.f32 0.7978846, %v1393_v16  ;;  %v1582_v58 = vadd.f32 1.0, %v3515_v38  ;;  %v4671_v38 = vadd.f32 %v4506_v62, %v796_v37 }
 0x1ba   : > { %3518 = vtanh.f32 %v1456_v35  ;;  %v1266_v5 = vmul.f32 %v1202_v56, %v4639_v26  ;;  %v1583_v18 = vadd.f32 1.0, %v3517_v33  ;;  %v1267_v21 = vmul.f32 %v1203_v60, %v4645_v1 }
 0x1bb   : > { %v983_v45 = vpop.f32.mrf.mxu2  ;;  %3520 = vtanh.f32 %v1457_v27  ;;  %v808_v49 = vpop.f32.mrf.mxu0  ;;  %v1646_v16 = vmul.f32 %v1582_v58, %v1134_v54  ;;  %v974_v35 = vadd.f32 %v4526_v40, %v4024_v43 }
 0x1bc   : > { %v1330_v12 = vmul.f32 %v1266_v5, %v4639_v26  ;;  %v984_v41 = vadd.f32 %v983_v45, %v4024_v43  ;;  %v1072_v7 = vpop.f32.mrf.mxu3  ;;  %v1647_v44 = vmul.f32 %v1583_v18, %v1135_v53  ;;  %v1331_v61 = vmul.f32 %v1267_v21, %v4645_v1  ;;  %v897_v29 = vpop.f32.mrf.mxu1 }
 0x1bd   : > { %v809_v23 = vadd.f32 %v808_v49, %v4017_v31  ;;  %3522 = vtanh.f32 %v1447_v55  ;;  %v1725_v55 = vmul.f32 0.25, %v1709_v8  ;;  %v1710_v58 = vadd.f32 %v4391_v19, %v1646_v16 }
 0x1be   : > { %v1394_v48 = vadd.f32 %v1330_v12, %v4639_v26  ;;  %v4668_v17 = vadd.f32 %v1072_v7, %v984_v41  ;;  %v1711_v36 = vadd.f32 %v1695_v24, %v1647_v44  ;;  %v1395_v46 = vadd.f32 %v1331_v61, %v4645_v1 }
 0x1bf   : > { %v4676_v56 = vadd.f32 %v897_v29, %v809_v23  ;;  %v1136_v24 = vmul.f32 0.5, %v4608_v22  ;;  %v1195_v22 = vmul.f32 0.044715, %v4671_v38  ;;  %v1448_v19 = vmul.f32 0.7978846, %v1384_v34 }
 0x1c0   : > { %v3519_v39 = vpop.eup %3518  ;;  %v1204_v33 = vmul.f32 0.044715, %v4668_v17  ;;  %v1727_v30 = vmul.f32 0.25, %v1711_v36  ;;  %v1458_v53 = vmul.f32 0.7978846, %v1394_v48  ;;  %v1137_v29 = vmul.f32 0.5, %v4612_v42 }
 0x1c1   : > { %v3521_v60 = vpop.eup %3520  ;;  %v1205_v27 = vmul.f32 0.044715, %v4676_v56  ;;  %v1584_v62 = vadd.f32 1.0, %v3519_v39  ;;  %v1459_v5 = vmul.f32 0.7978846, %v1395_v46  ;;  %v4694_v48 = vadd.f32 %v4530_v25, %v974_v35 }
 0x1c2   : > { %v1268_v18 = vmul.f32 %v1204_v33, %v4668_v17  ;;  %v1741_v40 = vpack.c.bf16 %v1727_v30, %v1725_v55  ;;  %3524 = vtanh.f32 %v1458_v53  ;;  %v1585_v12 = vadd.f32 1.0, %v3521_v60 }
 0x1c3   : > { %v4683_v37 = vpop.eup %3522  ;;  %v1269_v54 = vmul.f32 %v1205_v27, %v4676_v56  ;;  %v986_v21 = vpop.f32.mrf.mxu2  ;;  %v1648_v45 = vmul.f32 %v1584_v62, %v1136_v24  ;;  %3526 = vtanh.f32 %v1459_v5  ;;  %v1726_v46 = vmul.f32 0.25, %v1710_v58 }
 0x1c4   : > { %v1332_v41 = vmul.f32 %v1268_v18, %v4668_v17  ;;  %v987_v7 = vadd.f32 %v986_v21, %v4024_v43  ;;  %v1075_v49 = vpop.f32.mrf.mxu3  ;;  %v810_v44 = vpop.f32.mrf.mxu0  ;;  %1955 = vmatmul.bf16.vlgmr.msrb.gmra.mxu0 %v1741_v40  ;;  %2013 = vmatmul.bf16.vlgmr.msrb.gmra.mxu2 %v1741_v40  ;;  %v1649_v55 = vmul.f32 %v1585_v12, %v1137_v29  ;;  %3528 = vtanh.f32 %v1448_v19 }
 0x1c5   : > { %v1333_v0 = vmul.f32 %v1269_v54, %v4676_v56  ;;  %v811_v8 = vadd.f32 %v810_v44, %v4017_v31  ;;  %v899_v61 = vpop.f32.mrf.mxu1  ;;  %v1712_v23 = vadd.f32 %v4627_v51, %v1648_v45  ;;  %v4705_v42 = vadd.f32 %v4566_v11, %v4651_v2 }
 0x1c6   : > { %v1396_v36 = vadd.f32 %v1332_v41, %v4668_v17  ;;  %v4697_v16 = vadd.f32 %v1075_v49, %v987_v7  ;;  %v1259_v35 = vmul.f32 %v1195_v22, %v4671_v38  ;;  %v1139_v27 = vmul.f32 0.5, %v4645_v1 }
 0x1c7   : > { %v1397_v39 = vadd.f32 %v1333_v0, %v4676_v56  ;;  %v4700_v34 = vadd.f32 %v899_v61, %v811_v8  ;;  %v1728_v33 = vmul.f32 0.25, %v1712_v23  ;;  %v1196_v40 = vmul.f32 0.044715, %v4694_v48 }
 0x1c8   : > { %v3525_v30 = vpop.eup %3524  ;;  %v1206_v53 = vmul.f32 0.044715, %v4697_v16  ;;  %v1460_v51 = vmul.f32 0.7978846, %v1396_v36  ;;  %v1713_v2 = vadd.f32 %v4436_v14, %v1649_v55  ;;  %v1323_v41 = vmul.f32 %v1259_v35, %v4671_v38 }
 0x1c9   : > { %v3527_v25 = vpop.eup %3526  ;;  %v1207_v60 = vmul.f32 0.044715, %v4700_v34  ;;  %v1742_v24 = vpack.c.bf16 %v1728_v33, %v1726_v46  ;;  %v1461_v18 = vmul.f32 0.7978846, %v1397_v39  ;;  %v1586_v54 = vadd.f32 1.0, %v3525_v30 }
 0x1ca   : > { %v1270_v62 = vmul.f32 %v1206_v53, %v4697_v16  ;;  %v1587_v5 = vadd.f32 1.0, %v3527_v25  ;;  %3530 = vtanh.f32 %v1460_v51  ;;  %v1138_v19 = vmul.f32 0.5, %v4639_v26  ;;  %v3529_v0 = vpop.eup %3528 }
 0x1cb   : > { %v1271_v58 = vmul.f32 %v1207_v60, %v4700_v34  ;;  %v988_v11 = vpop.f32.mrf.mxu2  ;;  %1984 = vmatmul.bf16.vlgmr.msrb.gmra.mxu1 %v1742_v24  ;;  %2042 = vmatmul.bf16.vlgmr.msrb.gmra.mxu3 %v1742_v24  ;;  %3532 = vtanh.f32 %v1461_v18  ;;  %v1575_v23 = vadd.f32 1.0, %v4683_v37  ;;  %v1260_v29 = vmul.f32 %v1196_v40, %v4694_v48 }
 0x1cc   : > { %v1334_v21 = vmul.f32 %v1270_v62, %v4697_v16  ;;  %v989_v45 = vadd.f32 %v988_v11, %v4024_v43  ;;  %v1077_v1 = vpop.f32.mrf.mxu3  ;;  %v813_v12 = vpop.f32.mrf.mxu0  ;;  %v1651_v22 = vmul.f32 %v1587_v5, %v1139_v27  ;;  %v1650_v39 = vmul.f32 %v1586_v54, %v1138_v19 }
 0x1cd   : > { %v1335_v7 = vmul.f32 %v1271_v58, %v4700_v34  ;;  %v814_v49 = vadd.f32 %v813_v12, %v4017_v31  ;;  %v902_v44 = vpop.f32.mrf.mxu1  ;;  %v1729_v26 = vmul.f32 0.25, %v1713_v2  ;;  %v1140_v25 = vmul.f32 0.5, %v4668_v17 }
 0x1ce   : > { %v1398_v14 = vadd.f32 %v1334_v21, %v4697_v16  ;;  %v4721_v8 = vadd.f32 %v1077_v1, %v989_v45  ;;  %v1715_v61 = vadd.f32 %v4642_v10, %v1651_v22  ;;  %v1387_v60 = vadd.f32 %v1323_v41, %v4671_v38 }
 0x1cf   : > { %v1399_v36 = vadd.f32 %v1335_v7, %v4700_v34  ;;  %v4727_v46 = vadd.f32 %v902_v44, %v814_v49  ;;  %v1714_v40 = vadd.f32 %v4468_v4, %v1650_v39  ;;  %v1639_v21 = vmul.f32 %v1575_v23, %v4635_v32 }
 0x1d0   : > { %v3531_v33 = vpop.eup %3530  ;;  %v1208_v55 = vmul.f32 0.044715, %v4721_v8  ;;  %v1731_v30 = vmul.f32 0.25, %v1715_v61  ;;  %v1462_v53 = vmul.f32 0.7978846, %v1398_v14  ;;  %v1324_v45 = vmul.f32 %v1260_v29, %v4694_v48 }
 0x1d1   : > { %v1209_v51 = vmul.f32 0.044715, %v4727_v46  ;;  %v1588_v10 = vadd.f32 1.0, %v3531_v33  ;;  %v1463_v35 = vmul.f32 0.7978846, %v1399_v36  ;;  %v3533_v37 = vpop.eup %3532  ;;  %v1141_v49 = vmul.f32 0.5, %v4676_v56 }
 0x1d2   : > { %v1272_v24 = vmul.f32 %v1208_v55, %v4721_v8  ;;  %v1743_v27 = vpack.c.bf16 %v1731_v30, %v1729_v26  ;;  %3534 = vtanh.f32 %v1462_v53  ;;  %v1589_v54 = vadd.f32 1.0, %v3533_v37 }
 0x1d3   : > { %v1273_v62 = vmul.f32 %v1209_v51, %v4727_v46  ;;  %v991_v5 = vpop.f32.mrf.mxu2  ;;  %v1652_v18 = vmul.f32 %v1588_v10, %v1140_v25  ;;  %3536 = vtanh.f32 %v1463_v35  ;;  %v1451_v44 = vmul.f32 0.7978846, %v1387_v60 }
 0x1d4   : > { %v1336_v58 = vmul.f32 %v1272_v24, %v4721_v8  ;;  %v992_v17 = vadd.f32 %v991_v5, %v4024_v43  ;;  %v1080_v11 = vpop.f32.mrf.mxu3  ;;  %v815_v2 = vpop.f32.mrf.mxu0  ;;  %1960 = vmatmul.bf16.gmra.mxu0 %v1743_v27  ;;  %2018 = vmatmul.bf16.gmra.mxu2 %v1743_v27  ;;  %v1730_v32 = vmul.f32 0.25, %v1714_v40  ;;  %v1388_v33 = vadd.f32 %v1324_v45, %v4694_v48 }
 0x1d5   : > { %v1337_v1 = vmul.f32 %v1273_v62, %v4727_v46  ;;  %v816_v12 = vadd.f32 %v815_v2, %v4017_v31  ;;  %v1716_v4 = vadd.f32 %v4705_v42, %v1652_v18  ;;  %v904_v7 = vpop.f32.mrf.mxu1  ;;  %v1653_v31 = vmul.f32 %v1589_v54, %v1141_v49 }
 0x1d6   : > { %v1400_v22 = vadd.f32 %v1336_v58, %v4721_v8  ;;  %v4744_v41 = vadd.f32 %v1080_v11, %v992_v17  ;;  %v1703_v42 = vadd.f32 %v4571_v52, %v1639_v21  ;;  %v1576_v26 = vadd.f32 1.0, %v3529_v0 }
 0x1d7   : > { %v1401_v19 = vadd.f32 %v1337_v1, %v4727_v46  ;;  %v4748_v14 = vadd.f32 %v904_v7, %v816_v12  ;;  %v1732_v61 = vmul.f32 0.25, %v1716_v4  ;;  %v1143_v53 = vmul.f32 0.5, %v4700_v34 }
 0x1d8   : > { %v3535_v23 = vpop.eup %3534  ;;  %v1210_v29 = vmul.f32 0.044715, %v4744_v41  ;;  %v1464_v36 = vmul.f32 0.7978846, %v1400_v22  ;;  %v1717_v0 = vadd.f32 %v4512_v28, %v1653_v31  ;;  %v1142_v62 = vmul.f32 0.5, %v4697_v16 }
 0x1d9   : > { %v3537_v39 = vpop.eup %3536  ;;  %v1211_v55 = vmul.f32 0.044715, %v4748_v14  ;;  %v1744_v56 = vpack.c.bf16 %v1732_v61, %v1730_v32  ;;  %v1590_v52 = vadd.f32 1.0, %v3535_v23  ;;  %v1465_v35 = vmul.f32 0.7978846, %v1401_v19 }
 0x1da   : > { %v1274_v30 = vmul.f32 %v1210_v29, %v4744_v41  ;;  %v1591_v51 = vadd.f32 1.0, %v3537_v39  ;;  %3538 = vtanh.f32 %v1464_v36  ;;  %v1452_v5 = vmul.f32 0.7978846, %v1388_v33  ;;  %v4971_v29 = vld [vmem:[#allocation16_spill] sm:$0xff] }
 0x1db   : > { %v1275_v25 = vmul.f32 %v1211_v55, %v4748_v14  ;;  %v993_v10 = vpop.f32.mrf.mxu2  ;;  %1989 = vmatmul.bf16.gmra.mxu1 %v1744_v56  ;;  %2047 = vmatmul.bf16.gmra.mxu3 %v1744_v56  ;;  %3540 = vtanh.f32 %v1451_v44  ;;  %v1688_v17 = vadd.f32 %v4617_v3, %v4430_v50  ;;  %v1640_v28 = vmul.f32 %v1576_v26, %v4648_v15 }
 0x1dc   : > { %v1338_v37 = vmul.f32 %v1274_v30, %v4744_v41  ;;  %v994_v60 = vadd.f32 %v993_v10, %v4024_v43  ;;  %v1655_v24 = vmul.f32 %v1591_v51, %v1143_v53  ;;  %v1082_v34 = vpop.f32.mrf.mxu3  ;;  %3542 = vtanh.f32 %v1465_v35 }
 0x1dd   : > { %v1339_v27 = vmul.f32 %v1275_v25, %v4748_v14  ;;  %3544 = vtanh.f32 %v4605_v13  ;;  %v1654_v11 = vmul.f32 %v1590_v52, %v1142_v62  ;;  %v1733_v54 = vmul.f32 0.25, %v1717_v0 }
 0x1de   : > { %v1402_v18 = vadd.f32 %v1338_v37, %v4744_v41  ;;  %v4763_v40 = vadd.f32 %v1082_v34, %v994_v60  ;;  %v1719_v58 = vadd.f32 %v1703_v42, %v1655_v24  ;;  %v1144_v12 = vmul.f32 0.5, %v4721_v8 }
 0x1df   : > { %v1403_v43 = vadd.f32 %v1339_v27, %v4748_v14  ;;  %3546 = vtanh.f32 %v1452_v5  ;;  %v1563_v3 = vadd.f32 1.0, %v4595_v57  ;;  %v1704_v49 = vadd.f32 %v1688_v17, %v1640_v28  ;;  %v4973_v5 = vld [vmem:[#allocation17_spill] sm:$0xff] }
 0x1e0   : > { %v3539_v2 = vpop.eup %3538  ;;  %v1212_v16 = vmul.f32 0.044715, %v4763_v40  ;;  %v1735_v21 = vmul.f32 0.25, %v1719_v58  ;;  %v1466_v45 = vmul.f32 0.7978846, %v1402_v18  ;;  %v1718_v44 = vadd.f32 %v4535_v47, %v1654_v11 }
 0x1e1   : > { %v3541_v1 = vpop.eup %3540  ;;  %v1592_v4 = vadd.f32 1.0, %v3539_v2  ;;  %v1467_v22 = vmul.f32 0.7978846, %v1403_v43  ;;  %v1115_v19 = vmul.f32 0.5, %v4476_v9  ;;  %v1099_v31 = vmul.f32 0.5, %v4971_v29 }
 0x1e2   : > { %v1276_v50 = vmul.f32 %v1212_v16, %v4763_v40  ;;  %v1745_v13 = vpack.c.bf16 %v1735_v21, %v1733_v54  ;;  %3548 = vtanh.f32 %v1466_v45  ;;  %v3543_v15 = vpop.eup %3542  ;;  %v1579_v8 = vadd.f32 1.0, %v3541_v1 }
 0x1e3   : > { %v1656_v7 = vmul.f32 %v1592_v4, %v1144_v12  ;;  %3550 = vtanh.f32 %v1467_v22  ;;  %v1593_v61 = vadd.f32 1.0, %v3543_v15  ;;  %v3545_v23 = vpop.eup %3544  ;;  %v1131_v36 = vmul.f32 0.5, %v4671_v38 }
 0x1e4   : > { %v1340_v32 = vmul.f32 %v1276_v50, %v4763_v40  ;;  %1965 = vmatmul.bf16.gmra.mxu0 %v1745_v13  ;;  %2023 = vmatmul.bf16.gmra.mxu2 %v1745_v13  ;;  %v1145_v39 = vmul.f32 0.5, %v4727_v46  ;;  %v1627_v47 = vmul.f32 %v1563_v3, %v1115_v19  ;;  %v1734_v55 = vmul.f32 0.25, %v1718_v44  ;;  %v4972_v46 = vld [vmem:[#allocation19_spill] sm:$0xff] }
 0x1e5   : > { %v1720_v42 = vadd.f32 %v1704_v49, %v1656_v7  ;;  %v3547_v33 = vpop.eup %3546  ;;  %v1611_v26 = vmul.f32 %v4449_v20, %v1099_v31  ;;  %v1643_v30 = vmul.f32 %v1579_v8, %v1131_v36  ;;  %v1564_v52 = vadd.f32 1.0, %v3545_v23 }
 0x1e6   : > { %v1404_v57 = vadd.f32 %v1340_v32, %v4763_v40  ;;  %v1657_v53 = vmul.f32 %v1593_v61, %v1145_v39  ;;  %v1147_v35 = vmul.f32 0.5, %v4748_v14  ;;  %v1116_v38 = vmul.f32 0.5, %v4517_v63 }
 0x1e7   : > { %v1736_v9 = vmul.f32 0.25, %v1720_v42  ;;  %v1691_v60 = vadd.f32 %v1627_v47, %v1611_v26  ;;  %v1548_v24 = vadd.f32 1.0, %v4972_v46  ;;  %v1580_v0 = vadd.f32 1.0, %v3547_v33 }
 0x1e8   : > { %v3549_v56 = vpop.eup %3548  ;;  %v1468_v51 = vmul.f32 0.7978846, %v1404_v57  ;;  %v1721_v62 = vadd.f32 %v4576_v59, %v1657_v53  ;;  %v1100_v18 = vmul.f32 0.5, %v4973_v5  ;;  %v1132_v58 = vmul.f32 0.5, %v4694_v48 }
 0x1e9   : > { %v3551_v25 = vpop.eup %3550  ;;  %v1746_v10 = vpack.c.bf16 %v1736_v9, %v1734_v55  ;;  %v1594_v27 = vadd.f32 1.0, %v3549_v56  ;;  %v1707_v34 = vadd.f32 %v1691_v60, %v1643_v30  ;;  %v1146_v14 = vmul.f32 0.5, %v4744_v41 }
 0x1ea   : > { %v1595_v37 = vadd.f32 1.0, %v3551_v25  ;;  %3552 = vtanh.f32 %v1468_v51  ;;  %v1628_v17 = vmul.f32 %v1564_v52, %v1116_v38  ;;  %v1612_v28 = vmul.f32 %v1548_v24, %v1100_v18 }
 0x1eb   : > { %1994 = vmatmul.bf16.gmra.mxu1 %v1746_v10  ;;  %2052 = vmatmul.bf16.gmra.mxu3 %v1746_v10  ;;  %v1644_v63 = vmul.f32 %v1580_v0, %v1132_v58  ;;  %v1658_v11 = vmul.f32 %v1594_v27, %v1146_v14  ;;  %v1737_v16 = vmul.f32 0.25, %v1721_v62  ;;  %v1148_v21 = vmul.f32 0.5, %v4763_v40  ;;  %v1781_v40 = vld [vmem:[%s4951_s4] sm:$0x3] }
 0x1ec   : > { %v1659_v20 = vmul.f32 %v1595_v37, %v1147_v35  ;;  %v1692_v1 = vadd.f32 %v1628_v17, %v1612_v28  ;;  %v4794_v15 = vperm.slane %v1781_v40, 0  ;;  %v4796_v44 = vperm.slane %v1781_v40, 1 }
 0x1ed   : > { %v1722_v22 = vadd.f32 %v4603_v6, %v1658_v11 }
 0x1ee   : > { %v1723_v43 = vadd.f32 %v1707_v34, %v1659_v20  ;;  %v1708_v4 = vadd.f32 %v1692_v1, %v1644_v63  ;;  %v3129_v1 = vld [vmem:[#allocation10 + $0x78] sm:$0xf0] }
 0x1ef   : > { %v1738_v41 = vmul.f32 0.25, %v1722_v22  ;;  %v3193_v22 = vld [vmem:[#allocation10 + $0xf8] sm:$0xf0] }
 0x1f0   : > { %v3553_v2 = vpop.eup %3552  ;;  %v1739_v54 = vmul.f32 0.25, %v1723_v43 }
 0x1f1   : > { %v1596_v45 = vadd.f32 1.0, %v3553_v2 }
 0x1f2   : > { %v1747_v12 = vpack.c.bf16 %v1739_v54, %v1737_v16 }
 0x1f3   : > { %v1660_v59 = vmul.f32 %v1596_v45, %v1148_v21  ;;  %v3315_v45 = vld [vmem:[#allocation10 + $0x74] sm:$0xf] }
 0x1f4   : > { %1970 = vmatmul.bf16.gmra.mxu0 %v1747_v12  ;;  %2028 = vmatmul.bf16.gmra.mxu2 %v1747_v12  ;;  %v3331_v12 = vld [vmem:[#allocation10 + $0xf4] sm:$0xf] }
 0x1f5   : > { %v1724_v48 = vadd.f32 %v1708_v4, %v1660_v59  ;;  %v3132_v4 = vor.u32 %v3315_v45, %v3129_v1  ;;  %v3310_v1 = vld [vmem:[#allocation10 + $0x44] sm:$0xf0] }
 0x1f7   : > { %v1740_v50 = vmul.f32 0.25, %v1724_v48  ;;  %v3127_v48 = vld [vmem:[#allocation10 + $0x70] sm:$0xf]  ;;  %2465 = vmatpush.bf16.msra.mxu2 %v3132_v4 }
 0x1f9   : > { %v1748_v13 = vpack.c.bf16 %v1740_v50, %v1738_v41  ;;  %v3316_v41 = vld [vmem:[#allocation10 + $0x74] sm:$0xf0] }
 0x1fa   : > { %v3128_v40 = vor.u32 %v3316_v41, %v3127_v48 }
 0x1fb   : > { %1999 = vmatmul.bf16.gmra.mxu1 %v1748_v13  ;;  %2057 = vmatmul.bf16.gmra.mxu3 %v1748_v13 }
 0x1fc   : > { %2407 = vmatpush.bf16.msra.mxu0 %v3128_v40 }
 0x241   : > { %v1956_v3 = vpop.f32.mrf.mxu0 }
 0x242   : > { %v1957_v19 = vadd.f32 %v1956_v3, %v4794_v15  ;;  %v3196_v3 = vor.u32 %v3331_v12, %v3193_v22  ;;  %v3167_v12 = vld [vmem:[#allocation10 + $0xc0] sm:$0xf] }
 0x244   : > { %2494 = vmatpush.bf16.msra.mxu3 %v3196_v3 }
 0x247   : > { %v2014_v7 = vpop.f32.mrf.mxu2 }
 0x248   : > { %v1985_v49 = vpop.f32.mrf.mxu1  ;;  %v2015_v8 = vadd.f32 %v2014_v7, %v4796_v44  ;;  %v3191_v7 = vld [vmem:[#allocation10 + $0xf0] sm:$0xf] }
 0x249   : > { %v1958_v6 = vpop.f32.mrf.mxu0  ;;  %v4799_v32 = vadd.f32 %v1985_v49, %v1957_v19  ;;  %v3332_v49 = vld [vmem:[#allocation10 + $0xf4] sm:$0xf0] }
 0x24a   : > { %v1959_v39 = vadd.f32 %v1958_v6, %v4794_v15  ;;  %v3313_v6 = vld [vmem:[#allocation10 + $0x64] sm:$0xf] }
 0x24b   : > { %v2063_v57 = vmul.f32 %v4799_v32, %v4799_v32 }
 0x24e   : > { %v2043_v61 = vpop.f32.mrf.mxu3 }
 0x24f   : > { %v4802_v23 = vadd.f32 %v2043_v61, %v2015_v8  ;;  %v2016_v29 = vpop.f32.mrf.mxu2  ;;  %v3192_v8 = vor.u32 %v3332_v49, %v3191_v7  ;;  %v3121_v61 = vld [vmem:[#allocation10 + $0x68] sm:$0xf0] }
 0x250   : > { %v1987_v31 = vpop.f32.mrf.mxu1  ;;  %v2017_v55 = vadd.f32 %v2016_v29, %v4796_v44  ;;  %v3329_v29 = vld [vmem:[#allocation10 + $0xe4] sm:$0xf] }
 0x251   : > { %v1961_v42 = vpop.f32.mrf.mxu0  ;;  %v2064_v36 = vmul.f32 %v4802_v23, %v4802_v23  ;;  %v4809_v33 = vadd.f32 %v1987_v31, %v1959_v39  ;;  %v3185_v31 = vld [vmem:[#allocation10 + $0xe8] sm:$0xf0]  ;;  %v3119_v39 = vld [vmem:[#allocation10 + $0x60] sm:$0xf]  ;;  %2436 = vmatpush.bf16.msra.mxu1 %v3192_v8 }
 0x252   : > { %v1962_v10 = vadd.f32 %v1961_v42, %v4794_v15 }
 0x253   : > { %v2079_v47 = vadd.f32 %v2064_v36, %v2063_v57  ;;  %v2065_v53 = vmul.f32 %v4809_v33, %v4809_v33  ;;  %v3124_v36 = vor.u32 %v3313_v6, %v3121_v61 }
 0x255   : > { %2080 = vadd.xlane.f32.xlu0 %v2079_v47  ;;  %v3314_v47 = vld [vmem:[#allocation10 + $0x64] sm:$0xf0]  ;;  %2466 = vmatpush.bf16.msra.mxu2 %v3124_v36 }
 0x256   : > { %v2045_v9 = vpop.f32.mrf.mxu3 }
 0x257   : > { %v4812_v56 = vadd.f32 %v2045_v9, %v2017_v55  ;;  %v2019_v26 = vpop.f32.mrf.mxu2  ;;  %v3183_v55 = vld [vmem:[#allocation10 + $0xe0] sm:$0xf]  ;;  %v3188_v9 = vor.u32 %v3329_v29, %v3185_v31 }
 0x258   : > { %v1990_v30 = vpop.f32.mrf.mxu1  ;;  %v2020_v37 = vadd.f32 %v2019_v26, %v4796_v44  ;;  %v3120_v26 = vor.u32 %v3314_v47, %v3119_v39 }
 0x259   : > { %v2066_v51 = vmul.f32 %v4812_v56, %v4812_v56  ;;  %v1963_v25 = vpop.f32.mrf.mxu0  ;;  %v4819_v35 = vadd.f32 %v1990_v30, %v1962_v10  ;;  %v3330_v30 = vld [vmem:[#allocation10 + $0xe4] sm:$0xf0]  ;;  %2495 = vmatpush.bf16.msra.mxu3 %v3188_v9 }
 0x25a   : > { %v1964_v34 = vadd.f32 %v1963_v25, %v4794_v15  ;;  %2408 = vmatpush.bf16.msra.mxu0 %v3120_v26 }
 0x25b   : > { %v2082_v52 = vadd.f32 %v2066_v51, %v2065_v53  ;;  %v2067_v0 = vmul.f32 %v4819_v35, %v4819_v35  ;;  %v3311_v53 = vld [vmem:[#allocation10 + $0x54] sm:$0xf]  ;;  %v3113_v51 = vld [vmem:[#allocation10 + $0x58] sm:$0xf0] }
 0x25d   : > { %2083 = vadd.xlane.f32.xlu0 %v2082_v52  ;;  %v3184_v52 = vor.u32 %v3330_v30, %v3183_v55 }
 0x25e   : > { %v2048_v60 = vpop.f32.mrf.mxu3 }
 0x25f   : > { %v4822_v38 = vadd.f32 %v2048_v60, %v2020_v37  ;;  %v2021_v46 = vpop.f32.mrf.mxu2  ;;  %v3327_v37 = vld [vmem:[#allocation10 + $0xd4] sm:$0xf]  ;;  %v3177_v60 = vld [vmem:[#allocation10 + $0xd8] sm:$0xf0]  ;;  %2437 = vmatpush.bf16.msra.mxu1 %v3184_v52 }
 0x260   : > { %v1992_v24 = vpop.f32.mrf.mxu1  ;;  %v2022_v18 = vadd.f32 %v2021_v46, %v4796_v44  ;;  %v3111_v46 = vld [vmem:[#allocation10 + $0x50] sm:$0xf]  ;;  %v3307_v52 = vld [vmem:[#allocation10 + $0x34] sm:$0xf] }
 0x261   : > { %v2068_v27 = vmul.f32 %v4822_v38, %v4822_v38  ;;  %v1966_v20 = vpop.f32.mrf.mxu0  ;;  %v4829_v5 = vadd.f32 %v1992_v24, %v1964_v34  ;;  %v3116_v24 = vor.u32 %v3311_v53, %v3113_v51 }
 0x262   : > { %v1967_v11 = vadd.f32 %v1966_v20, %v4794_v15  ;;  %v3328_v20 = vld [vmem:[#allocation10 + $0xd4] sm:$0xf0] }
 0x263   : > { %v2085_v62 = vadd.f32 %v2068_v27, %v2067_v0  ;;  %v2069_v28 = vmul.f32 %v4829_v5, %v4829_v5  ;;  %v3312_v0 = vld [vmem:[#allocation10 + $0x54] sm:$0xf0]  ;;  %v3175_v27 = vld [vmem:[#allocation10 + $0xd0] sm:$0xf]  ;;  %2467 = vmatpush.bf16.msra.mxu2 %v3116_v24 }
 0x264   : > { %v3095_v24 = vld [vmem:[#allocation10 + $0x30] sm:$0xf] }
 0x265   : > { %2086 = vadd.xlane.f32.xlu1 %v2085_v62 }
 0x266   : > { %v2050_v58 = vpop.f32.mrf.mxu3 }
 0x267   : > { %v4832_v14 = vadd.f32 %v2050_v58, %v2022_v18  ;;  %v2024_v17 = vpop.f32.mrf.mxu2  ;;  %v3180_v18 = vor.u32 %v3327_v37, %v3177_v60  ;;  %v3309_v58 = vld [vmem:[#allocation10 + $0x44] sm:$0xf]  ;;  %v3097_v37 = vld [vmem:[#allocation10 + $0x38] sm:$0xf0] }
 0x268   : > { %v1995_v43 = vpop.f32.mrf.mxu1  ;;  %v2025_v21 = vadd.f32 %v2024_v17, %v4796_v44  ;;  %v3105_v17 = vld [vmem:[#allocation10 + $0x48] sm:$0xf0]  ;;  %v3100_v60 = vor.u32 %v3307_v52, %v3097_v37 }
 0x269   : > { %v2070_v63 = vmul.f32 %v4832_v14, %v4832_v14  ;;  %v1968_v16 = vpop.f32.mrf.mxu0  ;;  %v4839_v54 = vadd.f32 %v1995_v43, %v1967_v11  ;;  %v3176_v11 = vor.u32 %v3328_v20, %v3175_v27  ;;  %v3108_v48 = vor.u32 %v3309_v58, %v3105_v17  ;;  %2496 = vmatpush.bf16.msra.mxu3 %v3180_v18  ;;  %v3159_v20 = vld [vmem:[#allocation10 + $0xb0] sm:$0xf]  ;;  %v3305_v58 = vld [vmem:[#allocation10 + $0x24] sm:$0xf]  ;;  %v3089_v17 = vld [vmem:[#allocation10 + $0x28] sm:$0xf0] }
 0x26a   : > { %v1969_v25 = vadd.f32 %v1968_v16, %v4794_v15  ;;  %v3169_v16 = vld [vmem:[#allocation10 + $0xc8] sm:$0xf0] }
 0x26b   : > { %v2088_v2 = vadd.f32 %v2070_v63, %v2069_v28  ;;  %v2071_v42 = vmul.f32 %v4839_v54, %v4839_v54  ;;  %v3112_v63 = vor.u32 %v3312_v0, %v3111_v46  ;;  %2438 = vmatpush.bf16.msra.mxu1 %v3176_v11  ;;  %2468 = vmatpush.bf16.msra.mxu2 %v3108_v48  ;;  %v3161_v46 = vld [vmem:[#allocation10 + $0xb8] sm:$0xf0]  ;;  %v3308_v0 = vld [vmem:[#allocation10 + $0x34] sm:$0xf0]  ;;  %v3087_v11 = vld [vmem:[#allocation10 + $0x20] sm:$0xf] }
 0x26c   : > { %v3096_v27 = vor.u32 %v3308_v0, %v3095_v24  ;;  %v3319_v48 = vld [vmem:[#allocation10 + $0x94] sm:$0xf] }
 0x26d   : > { %2089 = vadd.xlane.f32.xlu1 %v2088_v2  ;;  %v3325_v2 = vld [vmem:[#allocation10 + $0xc4] sm:$0xf]  ;;  %2409 = vmatpush.bf16.msra.mxu0 %v3112_v63  ;;  %v3153_v63 = vld [vmem:[#allocation10 + $0xa8] sm:$0xf0] }
 0x26e   : > { %v2053_v59 = vpop.f32.mrf.mxu3  ;;  %v3172_v3 = vor.u32 %v3325_v2, %v3169_v16  ;;  %v3306_v2 = vld [vmem:[#allocation10 + $0x24] sm:$0xf0] }
 0x26f   : > { %v4842_v50 = vadd.f32 %v2053_v59, %v2025_v21  ;;  %v2026_v13 = vpop.f32.mrf.mxu2  ;;  %v3103_v21 = vld [vmem:[#allocation10 + $0x40] sm:$0xf]  ;;  %v3326_v59 = vld [vmem:[#allocation10 + $0xc4] sm:$0xf0]  ;;  %2469 = vmatpush.bf16.msra.mxu2 %v3100_v60 }
 0x270   : > { %v1997_v19 = vpop.f32.mrf.mxu1  ;;  %v2027_v62 = vadd.f32 %v2026_v13, %v4796_v44  ;;  %v3104_v40 = vor.u32 %v3310_v1, %v3103_v21  ;;  %v3168_v7 = vor.u32 %v3326_v59, %v3167_v12  ;;  %2497 = vmatpush.bf16.msra.mxu3 %v3172_v3  ;;  %v3088_v21 = vor.u32 %v3306_v2, %v3087_v11  ;;  %v3151_v1 = vld [vmem:[#allocation10 + $0xa0] sm:$0xf]  ;;  %v3322_v12 = vld [vmem:[#allocation10 + $0xa4] sm:$0xf0]  ;;  %v3079_v3 = vld [vmem:[#allocation10 + $0x10] sm:$0xf] }
 0x271   : > { %v2072_v57 = vmul.f32 %v4842_v50, %v4842_v50  ;;  %v4849_v34 = vadd.f32 %v1997_v19, %v1969_v25  ;;  %v1971_v43 = vpop.f32.mrf.mxu0  ;;  %v3152_v59 = vor.u32 %v3322_v12, %v3151_v1 }
 0x272   : > { %v1972_v49 = vadd.f32 %v1971_v43, %v4794_v15  ;;  %2410 = vmatpush.bf16.msra.mxu0 %v3104_v40  ;;  %2439 = vmatpush.bf16.msra.mxu1 %v3168_v7  ;;  %v3321_v43 = vld [vmem:[#allocation10 + $0xa4] sm:$0xf]  ;;  %v3304_v40 = vld [vmem:[#allocation10 + $0x14] sm:$0xf0] }
 0x273   : > { %v2091_v10 = vadd.f32 %v2072_v57, %v2071_v42  ;;  %v2073_v41 = vmul.f32 %v4849_v34, %v4849_v34  ;;  %v3156_v16 = vor.u32 %v3321_v43, %v3153_v63 }
 0x275   : > { %2092 = vadd.xlane.f32.xlu2 %v2091_v10 }
 0x276   : > { %v2055_v28 = vpop.f32.mrf.mxu3  ;;  %2411 = vmatpush.bf16.msra.mxu0 %v3096_v27 }
 0x277   : > { %v4852_v45 = vadd.f32 %v2055_v28, %v2027_v62  ;;  %v2029_v22 = vpop.f32.mrf.mxu2  ;;  %v3324_v62 = vld [vmem:[#allocation10 + $0xb4] sm:$0xf0]  ;;  %v3092_v28 = vor.u32 %v3305_v58, %v3089_v17 }
 0x278   : > { %v2000_v4 = vpop.f32.mrf.mxu1  ;;  %v2030_v8 = vadd.f32 %v2029_v22, %v4796_v44  ;;  %v3160_v18 = vor.u32 %v3324_v62, %v3159_v20  ;;  %v3081_v22 = vld [vmem:[#allocation10 + $0x18] sm:$0xf0] }
 0x279   : > { %v2074_v13 = vmul.f32 %v4852_v45, %v4852_v45  ;;  %v4859_v19 = vadd.f32 %v2000_v4, %v1972_v49  ;;  %v1973_v31 = vpop.f32.mrf.mxu0  ;;  %2470 = vmatpush.bf16.msra.mxu2 %v3092_v28  ;;  %v3303_v4 = vld [vmem:[#allocation10 + $0x14] sm:$0xf]  ;;  %v3080_v49 = vor.u32 %v3304_v40, %v3079_v3 }
 0x27a   : > { %v1974_v47 = vadd.f32 %v1973_v31, %v4794_v15  ;;  %v3323_v15 = vld [vmem:[#allocation10 + $0xb4] sm:$0xf]  ;;  %2440 = vmatpush.bf16.msra.mxu1 %v3160_v18  ;;  %2412 = vmatpush.bf16.msra.mxu0 %v3088_v21  ;;  %v3301_v31 = vld [vmem:[#allocation10 + $0x4] sm:$0xf] }
 0x27b   : > { %v2094_v6 = vadd.f32 %v2074_v13, %v2073_v41  ;;  %v2075_v42 = vmul.f32 %v4859_v19, %v4859_v19  ;;  %v3084_v41 = vor.u32 %v3303_v4, %v3081_v22  ;;  %v3145_v13 = vld [vmem:[#allocation10 + $0x98] sm:$0xf0] }
 0x27c   : > { %v3148_v7 = vor.u32 %v3319_v48, %v3145_v13 }
 0x27d   : > { %2095 = vadd.xlane.f32.xlu2 %v2094_v6  ;;  %v3143_v6 = vld [vmem:[#allocation10 + $0x90] sm:$0xf]  ;;  %2471 = vmatpush.bf16.msra.mxu2 %v3084_v41 }
 0x27e   : > { %v2058_v61 = vpop.f32.mrf.mxu3  ;;  %2441 = vmatpush.bf16.msra.mxu1 %v3152_v59  ;;  %2413 = vmatpush.bf16.msra.mxu0 %v3080_v49 }
 0x27f   : > { %v4862_v29 = vadd.f32 %v2058_v61, %v2030_v8  ;;  %v2031_v39 = vpop.f32.mrf.mxu2  ;;  %v3320_v8 = vld [vmem:[#allocation10 + $0x94] sm:$0xf0] }
 0x280   : > { %v2002_v36 = vpop.f32.mrf.mxu1  ;;  %v2032_v26 = vadd.f32 %v2031_v39, %v4796_v44  ;;  %v3164_v44 = vor.u32 %v3323_v15, %v3161_v46  ;;  %v3144_v61 = vor.u32 %v3320_v8, %v3143_v6  ;;  %v3137_v39 = vld [vmem:[#allocation10 + $0x88] sm:$0xf0] }
 0x281   : > { %v2076_v57 = vmul.f32 %v4862_v29, %v4862_v29  ;;  %v4869_v9 = vadd.f32 %v2002_v36, %v1974_v47  ;;  %v3071_v47 = vld [vmem:[#allocation10] sm:$0xf] }
 0x282   : > { %2498 = vmatpush.bf16.msra.mxu3 %v3164_v44  ;;  %2442 = vmatpush.bf16.msra.mxu1 %v3144_v61 }
 0x283   : > { %v2097_v55 = vadd.f32 %v2076_v57, %v2075_v42  ;;  %v2077_v51 = vmul.f32 %v4869_v9, %v4869_v9  ;;  %v3073_v42 = vld [vmem:[#allocation10 + $0x8] sm:$0xf0]  ;;  %v3317_v57 = vld [vmem:[#allocation10 + $0x84] sm:$0xf] }
 0x284   : > { %v3076_v36 = vor.u32 %v3301_v31, %v3073_v42 }
 0x285   : > { %2098 = vadd.xlane.f32.xlu0 %v2097_v55  ;;  %v3302_v55 = vld [vmem:[#allocation10 + $0x4] sm:$0xf0] }
 0x286   : > { %v2060_v30 = vpop.f32.mrf.mxu3  ;;  %2499 = vmatpush.bf16.msra.mxu3 %v3156_v16  ;;  %2472 = vmatpush.bf16.msra.mxu2 %v3076_v36 }
 0x287   : > { %v4872_v53 = vadd.f32 %v2060_v30, %v2032_v26  ;;  %v3140_v26 = vor.u32 %v3317_v57, %v3137_v39  ;;  %v3072_v30 = vor.u32 %v3302_v55, %v3071_v47 }
 0x289   : > { %v2078_v25 = vmul.f32 %v4872_v53, %v4872_v53  ;;  %2414 = vmatpush.bf16.msra.mxu0 %v3072_v30 }
 0x28a   : > { %2500 = vmatpush.bf16.msra.mxu3 %v3148_v7 }
 0x28b   : > { %v2100_v10 = vadd.f32 %v2078_v25, %v2077_v51  ;;  %v3135_v51 = vld [vmem:[#allocation10 + $0x80] sm:$0xf]  ;;  %v3318_v25 = vld [vmem:[#allocation10 + $0x84] sm:$0xf0] }
 0x28c   : > { %v3136_v52 = vor.u32 %v3318_v25, %v3135_v51 }
 0x28d   : > { %2101 = vadd.xlane.f32.xlu1 %v2100_v10 }
 0x28e   : > { %2501 = vmatpush.bf16.msra.mxu3 %v3140_v26  ;;  %2443 = vmatpush.bf16.msra.mxu1 %v3136_v52 }
 0x2c8   : > { %v2081_v10 = vpop.xlane.xlu0 %2080 }
 0x2c9   : > { %v2103_v37 = vadd.f32 1e-12, %v2081_v10 }
 0x2cb   : > { %3554 = vrsqrt.f32 %v2103_v37  ;;  %vm2117_vm1 = vweird.f32 %v2103_v37 }
 0x2d0   : > { %v2084_v15 = vpop.xlane.xlu0 %2083 }
 0x2d1   : > { %v3555_v60 = vpop.eup %3554  ;;  %v2104_v46 = vadd.f32 1e-12, %v2084_v15 }
 0x2d2   : > { %v2112_v24 = vmul.f32 %v3555_v60, %v2103_v37  ;;  %vm2118_vm0 = vweird.f32 %v3555_v60 }
 0x2d3   : > { %3556 = vrsqrt.f32 %v2104_v46  ;;  %vm2119_vm3 = vmor %vm2117_vm1, %vm2118_vm0  ;;  %vm2127_vm4 = vweird.f32 %v2104_v46 }
 0x2d4   : > { %v2113_v0 = vmul.f32 %v3555_v60, %v2112_v24 }
 0x2d6   : > { %v2114_v44 = vmul.f32 0.5, %v2113_v0 }
 0x2d8   : > { %v2087_v27 = vpop.xlane.xlu1 %2086  ;;  %v2115_v18 = vsub.f32 1.5, %v2114_v44 }
 0x2d9   : > { %v3557_v20 = vpop.eup %3556  ;;  %v2105_v62 = vadd.f32 1e-12, %v2087_v27 }
 0x2da   : > { %v2122_v58 = vmul.f32 %v3557_v20, %v2104_v46  ;;  %v2116_v43 = vmul.f32 %v3555_v60, %v2115_v18  ;;  %vm2128_vm2 = vweird.f32 %v3557_v20 }
 0x2db   : > { %3558 = vrsqrt.f32 %v2105_v62  ;;  %vm2129_vm5 = vmor %vm2127_vm4, %vm2128_vm2  ;;  %vm2137_vm7 = vweird.f32 %v2105_v62 }
 0x2dc   : > { %v2123_v17 = vmul.f32 %v3557_v20, %v2122_v58  ;;  %v2120_v21 = vsel %vm2119_vm3, %v3555_v60, %v2116_v43 }
 0x2dd   : > { %v2191_v22 = vmul.f32 %v2120_v21, %v4799_v32  ;;  %v2192_v48 = vmul.f32 %v2120_v21, %v4802_v23 }
 0x2de   : > { %v2124_v28 = vmul.f32 0.5, %v2123_v17 }
 0x2e0   : > { %v2125_v63 = vsub.f32 1.5, %v2124_v28  ;;  %v2090_v11 = vpop.xlane.xlu1 %2089 }
 0x2e1   : > { %v3559_v2 = vpop.eup %3558  ;;  %v2106_v16 = vadd.f32 1e-12, %v2090_v11 }
 0x2e2   : > { %v2126_v1 = vmul.f32 %v3557_v20, %v2125_v63  ;;  %v2132_v12 = vmul.f32 %v3559_v2, %v2105_v62  ;;  %vm2138_vm6 = vweird.f32 %v3559_v2 }
 0x2e3   : > { %3560 = vrsqrt.f32 %v2106_v16  ;;  %vm2139_vm9 = vmor %vm2137_vm7, %vm2138_vm6  ;;  %vm2147_vm10 = vweird.f32 %v2106_v16 }
 0x2e4   : > { %v2130_v59 = vsel %vm2129_vm5, %v3557_v20, %v2126_v1  ;;  %v2133_v4 = vmul.f32 %v3559_v2, %v2132_v12 }
 0x2e5   : > { %v2193_v41 = vmul.f32 %v2130_v59, %v4809_v33  ;;  %v2194_v13 = vmul.f32 %v2130_v59, %v4812_v56 }
 0x2e6   : > { %v2134_v3 = vmul.f32 0.5, %v2133_v4 }
 0x2e7   : > { %v2207_v40 = vpack.c.bf16 %v2193_v41, %v2191_v22  ;;  %v2208_v7 = vpack.c.bf16 %v2194_v13, %v2192_v48 }
 0x2e8   : > { %v2093_v49 = vpop.xlane.xlu2 %2092  ;;  %v2135_v61 = vsub.f32 1.5, %v2134_v3 }
 0x2e9   : > { %v3561_v6 = vpop.eup %3560  ;;  %v2107_v8 = vadd.f32 1e-12, %v2093_v49  ;;  %2415 = vmatmul.bf16.vlgmr.msra.gmra.mxu0 %v2207_v40  ;;  %2444 = vmatmul.bf16.vlgmr.msra.gmra.mxu1 %v2208_v7 }
 0x2ea   : > { %v2142_v31 = vmul.f32 %v3561_v6, %v2106_v16  ;;  %2473 = vmatmul.bf16.vlgmr.msra.gmra.mxu2 %v2207_v40  ;;  %2502 = vmatmul.bf16.vlgmr.msra.gmra.mxu3 %v2208_v7  ;;  %v2136_v42 = vmul.f32 %v3559_v2, %v2135_v61  ;;  %vm2148_vm8 = vweird.f32 %v3561_v6 }
 0x2eb   : > { %3562 = vrsqrt.f32 %v2107_v8  ;;  %vm2149_vm11 = vmor %vm2147_vm10, %vm2148_vm8  ;;  %vm2157_vm13 = vweird.f32 %v2107_v8 }
 0x2ec   : > { %v2143_v32 = vmul.f32 %v3561_v6, %v2142_v31  ;;  %v2140_v55 = vsel %vm2139_vm9, %v3559_v2, %v2136_v42 }
 0x2ed   : > { %v2195_v51 = vmul.f32 %v2140_v55, %v4819_v35  ;;  %v2196_v10 = vmul.f32 %v2140_v55, %v4822_v38 }
 0x2ee   : > { %v2144_v23 = vmul.f32 0.5, %v2143_v32 }
 0x2f0   : > { %v2145_v33 = vsub.f32 1.5, %v2144_v23  ;;  %v2096_v56 = vpop.xlane.xlu2 %2095 }
 0x2f1   : > { %v3563_v57 = vpop.eup %3562  ;;  %v2108_v36 = vadd.f32 1e-12, %v2096_v56 }
 0x2f2   : > { %v2146_v39 = vmul.f32 %v3561_v6, %v2145_v33  ;;  %v2152_v47 = vmul.f32 %v3563_v57, %v2107_v8  ;;  %vm2158_vm12 = vweird.f32 %v3563_v57 }
 0x2f3   : > { %3564 = vrsqrt.f32 %v2108_v36  ;;  %vm2159_vm15 = vmor %vm2157_vm13, %vm2158_vm12  ;;  %vm2167_vm0 = vweird.f32 %v2108_v36 }
 0x2f4   : > { %v2153_v26 = vmul.f32 %v3563_v57, %v2152_v47  ;;  %v2150_v30 = vsel %vm2149_vm11, %v3561_v6, %v2146_v39 }
 0x2f5   : > { %v2197_v25 = vmul.f32 %v2150_v30, %v4829_v5  ;;  %v2198_v52 = vmul.f32 %v2150_v30, %v4832_v14 }
 0x2f6   : > { %v2154_v37 = vmul.f32 0.5, %v2153_v26 }
 0x2f7   : > { %v2209_v15 = vpack.c.bf16 %v2197_v25, %v2195_v51  ;;  %v2210_v60 = vpack.c.bf16 %v2198_v52, %v2196_v10 }
 0x2f8   : > { %v2099_v46 = vpop.xlane.xlu0 %2098  ;;  %v2155_v44 = vsub.f32 1.5, %v2154_v37 }
 0x2f9   : > { %v3565_v24 = vpop.eup %3564  ;;  %v2109_v0 = vadd.f32 1e-12, %v2099_v46  ;;  %2420 = vmatmul.bf16.gmra.mxu0 %v2209_v15  ;;  %2449 = vmatmul.bf16.gmra.mxu1 %v2210_v60 }
 0x2fa   : > { %v2162_v27 = vmul.f32 %v3565_v24, %v2108_v36  ;;  %2478 = vmatmul.bf16.gmra.mxu2 %v2209_v15  ;;  %2507 = vmatmul.bf16.gmra.mxu3 %v2210_v60  ;;  %v2156_v20 = vmul.f32 %v3563_v57, %v2155_v44  ;;  %vm2168_vm14 = vweird.f32 %v3565_v24 }
 0x2fb   : > { %3566 = vrsqrt.f32 %v2109_v0  ;;  %vm2169_vm1 = vmor %vm2167_vm0, %vm2168_vm14  ;;  %vm2177_vm3 = vweird.f32 %v2109_v0 }
 0x2fc   : > { %v2163_v35 = vmul.f32 %v3565_v24, %v2162_v27  ;;  %v2160_v43 = vsel %vm2159_vm15, %v3563_v57, %v2156_v20 }
 0x2fd   : > { %v2199_v11 = vmul.f32 %v2160_v43, %v4839_v54  ;;  %v2200_v16 = vmul.f32 %v2160_v43, %v4842_v50 }
 0x2fe   : > { %v2164_v5 = vmul.f32 0.5, %v2163_v35 }
 0x300   : > { %v2165_v38 = vsub.f32 1.5, %v2164_v5  ;;  %v2102_v14 = vpop.xlane.xlu1 %2101 }
 0x301   : > { %v3567_v62 = vpop.eup %3566  ;;  %v2110_v18 = vadd.f32 1e-12, %v2102_v14 }
 0x302   : > { %v2166_v58 = vmul.f32 %v3565_v24, %v2165_v38  ;;  %v2172_v17 = vmul.f32 %v3567_v62, %v2109_v0  ;;  %vm2178_vm2 = vweird.f32 %v3567_v62 }
 0x303   : > { %3568 = vrsqrt.f32 %v2110_v18  ;;  %vm2179_vm5 = vmor %vm2177_vm3, %vm2178_vm2  ;;  %vm2187_vm6 = vweird.f32 %v2110_v18 }
 0x304   : > { %v2173_v28 = vmul.f32 %v3567_v62, %v2172_v17  ;;  %v2170_v63 = vsel %vm2169_vm1, %v3565_v24, %v2166_v58 }
 0x305   : > { %v2201_v2 = vmul.f32 %v2170_v63, %v4849_v34  ;;  %v2202_v21 = vmul.f32 %v2170_v63, %v4852_v45 }
 0x306   : > { %v2174_v1 = vmul.f32 0.5, %v2173_v28 }
 0x307   : > { %v2211_v12 = vpack.c.bf16 %v2201_v2, %v2199_v11  ;;  %v2212_v59 = vpack.c.bf16 %v2202_v21, %v2200_v16 }
 0x308   : > { %v2175_v22 = vsub.f32 1.5, %v2174_v1 }
 0x309   : > { %v3569_v4 = vpop.eup %3568  ;;  %2425 = vmatmul.bf16.gmra.mxu0 %v2211_v12  ;;  %2454 = vmatmul.bf16.gmra.mxu1 %v2212_v59 }
 0x30a   : > { %v2182_v48 = vmul.f32 %v3569_v4, %v2110_v18  ;;  %2483 = vmatmul.bf16.gmra.mxu2 %v2211_v12  ;;  %2512 = vmatmul.bf16.gmra.mxu3 %v2212_v59  ;;  %v2176_v13 = vmul.f32 %v3567_v62, %v2175_v22  ;;  %vm2188_vm4 = vweird.f32 %v3569_v4 }
 0x30b   : > { %vm2189_vm7 = vmor %vm2187_vm6, %vm2188_vm4 }
 0x30c   : > { %v2183_v41 = vmul.f32 %v3569_v4, %v2182_v48  ;;  %v2180_v45 = vsel %vm2179_vm5, %v3567_v62, %v2176_v13 }
 0x30d   : > { %v2203_v40 = vmul.f32 %v2180_v45, %v4859_v19  ;;  %v2204_v49 = vmul.f32 %v2180_v45, %v4862_v29 }
 0x30e   : > { %v2184_v54 = vmul.f32 0.5, %v2183_v41 }
 0x310   : > { %v2185_v34 = vsub.f32 1.5, %v2184_v54 }
 0x312   : > { %v2186_v50 = vmul.f32 %v3569_v4, %v2185_v34 }
 0x314   : > { %v2190_v3 = vsel %vm2189_vm7, %v3569_v4, %v2186_v50 }
 0x315   : > { %v2205_v7 = vmul.f32 %v2190_v3, %v4869_v9  ;;  %v2206_v6 = vmul.f32 %v2190_v3, %v4872_v53 }
 0x317   : > { %v2213_v8 = vpack.c.bf16 %v2205_v7, %v2203_v40  ;;  %v2214_v61 = vpack.c.bf16 %v2206_v6, %v2204_v49 }
 0x319   : > { %2430 = vmatmul.bf16.gmra.mxu0 %v2213_v8  ;;  %2459 = vmatmul.bf16.gmra.mxu1 %v2214_v61 }
 0x31a   : > { %2488 = vmatmul.bf16.gmra.mxu2 %v2213_v8  ;;  %2517 = vmatmul.bf16.gmra.mxu3 %v2214_v61 }
 0x366   : > { %v2416_v31 = vpop.f32.mrf.mxu0  ;;  %v2445_v32 = vpop.f32.mrf.mxu1 }
 0x367   : > { %v2446_v42 = vadd.f32 %v2445_v32, %v2416_v31 }
 0x369   : > { %2523 = vst [vmem:[%s4895_s13] sm:$0xff] %v2446_v42 }
 0x36d   : > { %v2474_v19 = vpop.f32.mrf.mxu2  ;;  %v2503_v29 = vpop.f32.mrf.mxu3 }
 0x36e   : > { %v2504_v9 = vadd.f32 %v2503_v29, %v2474_v19  ;;  %v2418_v53 = vpop.f32.mrf.mxu0  ;;  %v2447_v23 = vpop.f32.mrf.mxu1 }
 0x36f   : > { %v2448_v33 = vadd.f32 %v2447_v23, %v2418_v53 }
 0x370   : > { %2524 = vst [vmem:[%s4895_s13 + $0x8] sm:$0xff] %v2504_v9 }
 0x371   : > { %2525 = vst [vmem:[%s4895_s13 + $0x10] sm:$0xff] %v2448_v33 }
 0x375   : > { %v2476_v56 = vpop.f32.mrf.mxu2  ;;  %v2505_v57 = vpop.f32.mrf.mxu3 }
 0x376   : > { %v2506_v36 = vadd.f32 %v2505_v57, %v2476_v56  ;;  %v2421_v39 = vpop.f32.mrf.mxu0  ;;  %v2450_v47 = vpop.f32.mrf.mxu1 }
 0x377   : > { %v2451_v55 = vadd.f32 %v2450_v47, %v2421_v39 }
 0x378   : > { %2526 = vst [vmem:[%s4895_s13 + $0x18] sm:$0xff] %v2506_v36 }
 0x379   : > { %2527 = vst [vmem:[%s4895_s13 + $0x20] sm:$0xff] %v2451_v55 }
 0x37d   : > { %v2479_v26 = vpop.f32.mrf.mxu2  ;;  %v2508_v30 = vpop.f32.mrf.mxu3 }
 0x37e   : > { %v2509_v51 = vadd.f32 %v2508_v30, %v2479_v26  ;;  %v2423_v25 = vpop.f32.mrf.mxu0  ;;  %v2452_v10 = vpop.f32.mrf.mxu1 }
 0x37f   : > { %v2453_v52 = vadd.f32 %v2452_v10, %v2423_v25 }
 0x380   : > { %2528 = vst [vmem:[%s4895_s13 + $0x28] sm:$0xff] %v2509_v51 }
 0x381   : > { %2529 = vst [vmem:[%s4895_s13 + $0x30] sm:$0xff] %v2453_v52 }
 0x385   : > { %v2481_v37 = vpop.f32.mrf.mxu2  ;;  %v2510_v15 = vpop.f32.mrf.mxu3 }
 0x386   : > { %v2511_v60 = vadd.f32 %v2510_v15, %v2481_v37  ;;  %v2426_v46 = vpop.f32.mrf.mxu0  ;;  %v2455_v24 = vpop.f32.mrf.mxu1 }
 0x387   : > { %v2456_v0 = vadd.f32 %v2455_v24, %v2426_v46 }
 0x388   : > { %2530 = vst [vmem:[%s4895_s13 + $0x38] sm:$0xff] %v2511_v60 }
 0x389   : > { %2531 = vst [vmem:[%s4895_s13 + $0x40] sm:$0xff] %v2456_v0 }
 0x38d   : > { %v2484_v44 = vpop.f32.mrf.mxu2  ;;  %v2513_v27 = vpop.f32.mrf.mxu3 }
 0x38e   : > { %v2514_v35 = vadd.f32 %v2513_v27, %v2484_v44  ;;  %v2428_v20 = vpop.f32.mrf.mxu0  ;;  %v2457_v5 = vpop.f32.mrf.mxu1 }
 0x38f   : > { %v2458_v38 = vadd.f32 %v2457_v5, %v2428_v20 }
 0x390   : > { %2532 = vst [vmem:[%s4895_s13 + $0x48] sm:$0xff] %v2514_v35 }
 0x391   : > { %2533 = vst [vmem:[%s4895_s13 + $0x50] sm:$0xff] %v2458_v38 }
 0x395   : > { %v2486_v14 = vpop.f32.mrf.mxu2  ;;  %v2515_v62 = vpop.f32.mrf.mxu3 }
 0x396   : > { %v2516_v18 = vadd.f32 %v2515_v62, %v2486_v14  ;;  %v2431_v58 = vpop.f32.mrf.mxu0  ;;  %v2460_v17 = vpop.f32.mrf.mxu1 }
 0x397   : > { %v2461_v43 = vadd.f32 %v2460_v17, %v2431_v58 }
 0x398   : > { %2534 = vst [vmem:[%s4895_s13 + $0x58] sm:$0xff] %v2516_v18 }
 0x399   : > { %2535 = vst [vmem:[%s4895_s13 + $0x60] sm:$0xff] %v2461_v43 }
 0x39d   : > { %v2489_v28 = vpop.f32.mrf.mxu2  ;;  %v2518_v63 = vpop.f32.mrf.mxu3 }
 0x39e   : > { %v2519_v11 = vadd.f32 %v2518_v63, %v2489_v28  ;;  %v2433_v2 = vpop.f32.mrf.mxu0  ;;  %v2462_v16 = vpop.f32.mrf.mxu1 }
 0x39f   : > { %v2463_v21 = vadd.f32 %v2462_v16, %v2433_v2 }
 0x3a0   : > { %2536 = vst [vmem:[%s4895_s13 + $0x68] sm:$0xff] %v2519_v11 }
 0x3a1   : > { %2537 = vst [vmem:[%s4895_s13 + $0x70] sm:$0xff] %v2463_v21 }
 0x3a5   : > { %v2491_v1 = vpop.f32.mrf.mxu2  ;;  %v2520_v12 = vpop.f32.mrf.mxu3 }
 0x3a6   : > { %v2521_v59 = vadd.f32 %v2520_v12, %v2491_v1 }
 0x3a8   : > { %2538 = vst [vmem:[%s4895_s13 + $0x78] sm:$0xff] %v2521_v59 }
 0x3a9   : > { %3747 = shalt.err (!%p3744_p10)
}
 0x3aa   : > { %s3802_s29 = smov 256   ;;  %s3803_s13 = smov 16  }
 0x3ab   : > { %3353 = dma.vmem_to_hbm [thread:$0]  (%p3932_p3), %s2554_s9, 2048, %s2556_s11, %s2540_s25, %s3802_s29, %s3802_s29, %s3803_s13  }
 0x3ac PF: > { %s2570_s18 = sand.u32 1, %s3782_s21   ;;  %p4974_p12 = scmp.ge.s32.totalorder %s3794_s24, 2 }
 0x3ad   : > { %s2571_s17 = scalar_lea.sflag [#allocation4], %s2570_s18 }
 0x3ae   : > { %p3373_p13 = pnand %p4974_p12, %p3874_p6 }
 0x3b0   : > { %p3374_p0 = pneg %p3373_p13 }
 0x3b2   : > { %3777 = dma.done.wait (%p3374_p0), %s2571_s17, 2048  }
 0x3b3   : > { %3779 = vsyncadd (%p3374_p0), %s2571_s17, 4294965248  ;;  %p21_p5 = scmp.ge.s32.totalorder %s3922_s14, 4   ;;  %s4975_s21 = smov %s3786_s22 }
 0x3b4   : > { %s4976_s22 = smov %s3790_s23  ;;  %s4977_s23 = smov %s3938_s20 }
 0x3b5   : > { %s4978_s24 = smov %s3922_s14  ;;  %23 = sbr.rel (!%p21_p5) target bundleno = 7 (0x7), region = 105 }
 0x3ba   :  { %2577 = vsyncpa [#allocation3], 1 }
 0x3bb   :  { %2579 = vsyncpa [#allocation3 + $0x1], 1 }
 0x3bc   :  { %2580 = vsyncpa [#allocation6], 1 }
 0x3bd   :  { %2581 = vsyncpa [#allocation9], 1 }
 0x3be   :  { %2582 = vsyncpa [#allocation4], 1 }
 0x3bf   :  { %2584 = vsyncpa [#allocation4 + $0x1], 1 }

</bundles_post_ra>
